<compile_context>
chip_gen: v6e
topology: v6e:2x2x1
jax: 0.10.0
libtpu: 0.0.40
codegen_flags: <defaults>
</compile_context>

<pallas_src>
import functools
import math

import jax
import jax.numpy as jnp
from jax import lax
from jax.experimental import pallas as pl
from jax.experimental.pallas import tpu as pltpu


# ----------------------------------------------------------------------------
# Shared helper (pure f32 vector math, used in-kernel and in the reference)
# ----------------------------------------------------------------------------
def _ln(x, g, b, eps):
    mean = jnp.mean(x, axis=-1, keepdims=True)
    var = jnp.mean((x - mean) ** 2, axis=-1, keepdims=True)
    return (x - mean) * lax.rsqrt(var + eps) * g + b


# ----------------------------------------------------------------------------
# Kernel 1: word-embedding (already gathered) + positional embedding + LayerNorm
# ----------------------------------------------------------------------------
def _embed_ln_kernel(word_ref, pos_ref, g_ref, b_ref, o_ref, *, eps):
    x = word_ref[0].astype(jnp.float32) + pos_ref[0].astype(jnp.float32)   # [S, H]
    o_ref[0] = _ln(x, g_ref[...], b_ref[...], eps).astype(o_ref.dtype)


def embed_layernorm(word, pos, gamma, beta, eps=1e-5):
    B, S, H = word.shape
    return pl.pallas_call(
        functools.partial(_embed_ln_kernel, eps=eps),
        out_shape=jax.ShapeDtypeStruct((B, S, H), jnp.bfloat16),   # bf16 activations
        grid=(B,),
        in_specs=[
            pl.BlockSpec((1, S, H), lambda b: (b, 0, 0)),
            pl.BlockSpec((1, S, H), lambda b: (0, 0, 0)),
            pl.BlockSpec((1, H), lambda b: (0, 0)),
            pl.BlockSpec((1, H), lambda b: (0, 0)),
        ],
        out_specs=pl.BlockSpec((1, S, H), lambda b: (b, 0, 0)),
        compiler_params=pltpu.CompilerParams(dimension_semantics=("parallel",)),
    )(word, pos[None], gamma.reshape(1, H), beta.reshape(1, H))


# ----------------------------------------------------------------------------
# Kernel 2: fully fused transformer layer, grid = (batch, query_tile)
# ----------------------------------------------------------------------------
def _layer_kernel(x_ref, mask_ref,
                  wqkv_ref, bqkv_ref, wo_ref, bo_ref,
                  ln1g_ref, ln1b_ref,
                  w1_ref, b1_ref, w2_ref, b2_ref,
                  ln2g_ref, ln2b_ref,
                  o_ref,
                  k_sc, v_sc, ctx_sc,
                  *, num_heads, tq, eps):
    qi = pl.program_id(1)
    S = x_ref.shape[1]
    H = x_ref.shape[2]
    D = H // num_heads
    scale = 1.0 / math.sqrt(D)

    # ---- K/V for the whole row: computed once per batch row (qi == 0), kept in
    #      VMEM scratch and reused by every query tile of this row. ----
    @pl.when(qi == 0)
    def _():
        x_full = x_ref[0]                                              # [S, H] bf16
        kv = jnp.dot(x_full, wqkv_ref[:, H:],
                     preferred_element_type=jnp.float32) + bqkv_ref[:, H:]   # [S, 2H]
        k = kv[:, :H]
        v = kv[:, H:]
        # Single head-split relayout per row, hoisted out of the per-tile work.
        k_sc[...] = jnp.stack([k[:, h * D:(h + 1) * D] for h in range(num_heads)],
                              axis=0).astype(k_sc.dtype)               # [heads, S, D]
        v_sc[...] = jnp.stack([v[:, h * D:(h + 1) * D] for h in range(num_heads)],
                              axis=0).astype(v_sc.dtype)

    # ---- per-tile query projection ----
    row0 = pl.multiple_of(qi * tq, tq)
    x_tile = x_ref[0, pl.ds(row0, tq), :]                              # [tq, H] bf16
    q = jnp.dot(x_tile, wqkv_ref[:, :H],
                preferred_element_type=jnp.float32) + bqkv_ref[:, :H]  # [tq, H] f32
    q3 = jnp.stack([q[:, h * D:(h + 1) * D] for h in range(num_heads)],
                   axis=0).astype(jnp.bfloat16)                        # [heads, tq, D]

    # ---- head-batched attention: ONE dot_general over all heads per GEMM ----
    k3 = k_sc[...]                                                     # [heads, S, D]
    v3 = v_sc[...]
    s = jnp.einsum("hqd,hkd->hqk", q3, k3,
                   preferred_element_type=jnp.float32) * scale         # [heads, tq, S]
    s = s + mask_ref[0]                                                # [1, S] additive bias
    s = s - jnp.max(s, axis=-1, keepdims=True)
    p = jnp.exp(s)
    p = p * pl.reciprocal(jnp.sum(p, axis=-1, keepdims=True), approx=True)
    ctx = jnp.einsum("hqk,hkd->hqd", p.astype(jnp.bfloat16), v3,
                     preferred_element_type=jnp.float32)               # [heads, tq, D]

    # ---- merge heads into a [tq, H] VMEM slab -> ONE K=H output-projection GEMM ----
    for h in range(num_heads):
        ctx_sc[:, h * D:(h + 1) * D] = ctx[h].astype(ctx_sc.dtype)
    attn_out = jnp.dot(ctx_sc[...], wo_ref[...],
                       preferred_element_type=jnp.float32) + bo_ref[...]   # [tq, H]

    # ---- residual + LayerNorm (f32), FFN, residual + LayerNorm ----
    h1 = _ln(x_tile.astype(jnp.float32) + attn_out, ln1g_ref[...], ln1b_ref[...], eps)
    ff = jnp.dot(h1.astype(jnp.bfloat16), w1_ref[...],
                 preferred_element_type=jnp.float32) + b1_ref[...]
    # TODO(synk): HF roberta-base uses exact erf-GELU; tanh approximation used here.
    ff = jax.nn.gelu(ff, approximate=True)
    ff = jnp.dot(ff.astype(jnp.bfloat16), w2_ref[...],
                 preferred_element_type=jnp.float32) + b2_ref[...]
    o_ref[0] = _ln(h1 + ff, ln2g_ref[...], ln2b_ref[...], eps).astype(o_ref.dtype)


def _layer_vmem_limit_bytes(S, H, F, num_heads, tq, single_buffer_weights):
    bf16, f32 = 2, 4
    wbuf = 1 if single_buffer_weights else 2
    weights = (H * 3 * H + H * H + H * F + F * H) * bf16 * wbuf
    io_blocks = 2 * (S * H * bf16) + 2 * (tq * H * bf16) + 2 * (S * f32)
    scratch = 2 * num_heads * S * (H // num_heads) * bf16 + tq * H * bf16
    temps = (S * 2 * H + 2 * num_heads * tq * S + 2 * tq * F + 6 * tq * H) * f32
    need = weights + io_blocks + scratch + temps + (8 << 20)
    # >= default scoped limit (32 MiB), <= safe headroom under v7x's 64 MiB physical.
    return int(min(max(need, 32 << 20), 56 << 20))


def transformer_layer(x, mask_bias, p, *, num_heads, q_tile=None,
                      single_buffer_weights=True, eps=1e-5):
    B, S, H = x.shape
    F = p["w1"].shape[1]
    D = H // num_heads
    tq = min(q_tile or 256, S)
    assert S % tq == 0, (S, tq)
    nq = S // tq

    def wspec(shape):
        # Grid-invariant weight/bias blocks: no prefetch buffer needed.
        if single_buffer_weights:
            return pl.BlockSpec(shape, lambda b, qi: (0, 0),
                                pipeline_mode=pl.Buffered(1))
        return pl.BlockSpec(shape, lambda b, qi: (0, 0))

    return pl.pallas_call(
        functools.partial(_layer_kernel, num_heads=num_heads, tq=tq, eps=eps),
        out_shape=jax.ShapeDtypeStruct((B, S, H), jnp.bfloat16),   # bf16 activations
        grid=(B, nq),
        in_specs=[
            pl.BlockSpec((1, S, H), lambda b, qi: (b, 0, 0)),   # x (full row; re-DMA'd only when b changes)
            pl.BlockSpec((1, 1, S), lambda b, qi: (b, 0, 0)),   # additive mask bias
            wspec((H, 3 * H)), wspec((1, 3 * H)),               # wqkv, bqkv
            wspec((H, H)), wspec((1, H)),                       # wo, bo
            wspec((1, H)), wspec((1, H)),                       # ln1 gamma/beta
            wspec((H, F)), wspec((1, F)),                       # w1, b1
            wspec((F, H)), wspec((1, H)),                       # w2, b2
            wspec((1, H)), wspec((1, H)),                       # ln2 gamma/beta
        ],
        out_specs=pl.BlockSpec((1, tq, H), lambda b, qi: (b, qi, 0)),
        scratch_shapes=[
            pltpu.VMEM((num_heads, S, D), jnp.bfloat16),        # K, head-major, cached per row
            pltpu.VMEM((num_heads, S, D), jnp.bfloat16),        # V, head-major, cached per row
            pltpu.VMEM((tq, H), jnp.bfloat16),                  # merged head contexts
        ],
        compiler_params=pltpu.CompilerParams(
            dimension_semantics=("parallel", "arbitrary"),
            vmem_limit_bytes=_layer_vmem_limit_bytes(
                S, H, F, num_heads, tq, single_buffer_weights)),
    )(x, mask_bias,
      p["wqkv"], p["bqkv"].reshape(1, 3 * H),
      p["wo"], p["bo"].reshape(1, H),
      p["ln1_g"].reshape(1, H), p["ln1_b"].reshape(1, H),
      p["w1"], p["b1"].reshape(1, F),
      p["w2"], p["b2"].reshape(1, H),
      p["ln2_g"].reshape(1, H), p["ln2_b"].reshape(1, H))


# ----------------------------------------------------------------------------
# Kernel 3: masked mean-pooling + L2 normalization
# ----------------------------------------------------------------------------
def _pool_norm_kernel(h_ref, m_ref, o_ref):
    h = h_ref[0].astype(jnp.float32)                               # [S, H]
    m = m_ref[0].astype(jnp.float32)                               # [S, 1]
    summed = jnp.sum(h * m, axis=0, keepdims=True)                 # [1, H]
    count = jnp.maximum(jnp.sum(m, axis=0, keepdims=True), 1e-9)   # clamp(min=1e-9)
    pooled = summed / count
    # F.normalize(dim=-1): x / max(||x||_2, 1e-12)
    norm = jnp.sqrt(jnp.sum(pooled * pooled, axis=-1, keepdims=True))
    o_ref[0] = (pooled / jnp.maximum(norm, 1e-12)).astype(o_ref.dtype)


def mean_pool_normalize(hidden, attention_mask):
    B, S, H = hidden.shape
    mask3 = attention_mask.astype(jnp.float32).reshape(B, S, 1)
    out = pl.pallas_call(
        _pool_norm_kernel,
        out_shape=jax.ShapeDtypeStruct((B, 1, H), jnp.float32),
        grid=(B,),
        in_specs=[
            pl.BlockSpec((1, S, H), lambda b: (b, 0, 0)),
            pl.BlockSpec((1, S, 1), lambda b: (b, 0, 0)),
        ],
        out_specs=pl.BlockSpec((1, 1, H), lambda b: (b, 0, 0)),
        compiler_params=pltpu.CompilerParams(dimension_semantics=("parallel",)),
    )(hidden, mask3)
    return out.reshape(B, H)


# ----------------------------------------------------------------------------
# Synthetic roberta-style encoder parameters (matmul weights stored in bf16)
# ----------------------------------------------------------------------------
def init_params(key, vocab, max_pos, hidden, ffn, num_layers):
    keys = jax.random.split(key, 2 + 4 * num_layers)
    std = 0.02
    params = {
        "word_emb": std * jax.random.normal(keys[0], (vocab, hidden), jnp.float32),
        "pos_emb": std * jax.random.normal(keys[1], (max_pos, hidden), jnp.float32),
        "emb_ln_g": jnp.ones((hidden,), jnp.float32),
        "emb_ln_b": jnp.zeros((hidden,), jnp.float32),
    }
    layers = []
    for l in range(num_layers):
        k = keys[2 + 4 * l: 2 + 4 * (l + 1)]
        layers.append({
            "wqkv": (std * jax.random.normal(k[0], (hidden, 3 * hidden), jnp.float32)
                     ).astype(jnp.bfloat16),
            "bqkv": jnp.zeros((3 * hidden,), jnp.float32),
            "wo": (std * jax.random.normal(k[1], (hidden, hidden), jnp.float32)
                   ).astype(jnp.bfloat16),
            "bo": jnp.zeros((hidden,), jnp.float32),
            "ln1_g": jnp.ones((hidden,), jnp.float32),
            "ln1_b": jnp.zeros((hidden,), jnp.float32),
            "w1": (std * jax.random.normal(k[2], (hidden, ffn), jnp.float32)
                   ).astype(jnp.bfloat16),
            "b1": jnp.zeros((ffn,), jnp.float32),
            "w2": (std * jax.random.normal(k[3], (ffn, hidden), jnp.float32)
                   ).astype(jnp.bfloat16),
            "b2": jnp.zeros((hidden,), jnp.float32),
            "ln2_g": jnp.ones((hidden,), jnp.float32),
            "ln2_b": jnp.zeros((hidden,), jnp.float32),
        })
    params["layers"] = layers
    return params


# ----------------------------------------------------------------------------
# Full forward: embeddings -> N fused layers -> mean-pool + L2 normalize
# ----------------------------------------------------------------------------
def barlow_twins_forward(params, input_ids, attention_mask, *, num_heads,
                         q_tile=None, single_buffer_weights=True):
    B, S = input_ids.shape
    # Word-embedding lookup as a gather (no one-hot @ vocab matmul).
    # TODO(synk): real RoBERTa position ids start at padding_idx+1 and skip pads.
    word = jnp.take(params["word_emb"], input_ids, axis=0)                 # [B, S, H]
    x = embed_layernorm(word, params["pos_emb"][:S],
                        params["emb_ln_g"], params["emb_ln_b"])            # bf16 [B,S,H]

    # Additive attention-mask bias: 0 for real tokens, -1e9 for padding.
    mask_bias = (1.0 - attention_mask.astype(jnp.float32))[:, None, :] * -1e9   # [B,1,S]

    for p in params["layers"]:
        x = transformer_layer(x, mask_bias, p, num_heads=num_heads,
                              q_tile=q_tile,
                              single_buffer_weights=single_buffer_weights)

    return mean_pool_normalize(x, attention_mask)


# ----------------------------------------------------------------------------
# Pure-JAX reference (same math / same bf16 rounding points) for validation
# ----------------------------------------------------------------------------
def reference_forward(params, input_ids, attention_mask, *, num_heads, eps=1e-5):
    B, S = input_ids.shape
    H = params["word_emb"].shape[1]
    D = H // num_heads
    word = jnp.take(params["word_emb"], input_ids, axis=0)
    x = _ln(word + params["pos_emb"][:S][None], params["emb_ln_g"],
            params["emb_ln_b"], eps).astype(jnp.bfloat16)
    mask_bias = (1.0 - attention_mask.astype(jnp.float32))[:, None, :] * -1e9

    for p in params["layers"]:
        xf = x.astype(jnp.float32)
        qkv = jnp.einsum("bsh,hf->bsf", x, p["wqkv"],
                         preferred_element_type=jnp.float32) + p["bqkv"]

        def heads_first(t):
            return t.reshape(B, S, num_heads, D).transpose(0, 2, 1, 3).astype(jnp.bfloat16)

        qh = heads_first(qkv[..., :H])
        kh = heads_first(qkv[..., H:2 * H])
        vh = heads_first(qkv[..., 2 * H:])
        s = jnp.einsum("bhqd,bhkd->bhqk", qh, kh,
                       preferred_element_type=jnp.float32) / math.sqrt(D)
        s = s + mask_bias[:, None]
        pattn = jax.nn.softmax(s, axis=-1)
        ctx = jnp.einsum("bhqk,bhkd->bhqd", pattn.astype(jnp.bfloat16), vh,
                         preferred_element_type=jnp.float32)
        ctx = ctx.transpose(0, 2, 1, 3).reshape(B, S, H).astype(jnp.bfloat16)
        attn = jnp.einsum("bsh,ho->bso", ctx, p["wo"],
                          preferred_element_type=jnp.float32) + p["bo"]
        h1 = _ln(xf + attn, p["ln1_g"], p["ln1_b"], eps)
        ff = jnp.einsum("bsh,hf->bsf", h1.astype(jnp.bfloat16), p["w1"],
                        preferred_element_type=jnp.float32) + p["b1"]
        ff = jax.nn.gelu(ff, approximate=True)
        ff = jnp.einsum("bsf,fh->bsh", ff.astype(jnp.bfloat16), p["w2"],
                        preferred_element_type=jnp.float32) + p["b2"]
        x = _ln(h1 + ff, p["ln2_g"], p["ln2_b"], eps).astype(jnp.bfloat16)

    h = x.astype(jnp.float32)
    m = attention_mask.astype(jnp.float32)[..., None]
    pooled = jnp.sum(h * m, axis=1) / jnp.clip(jnp.sum(m, axis=1), 1e-9, None)
    n = jnp.sqrt(jnp.sum(pooled * pooled, axis=-1, keepdims=True))
    return pooled / jnp.maximum(n, 1e-12)


# ----------------------------------------------------------------------------
if __name__ == "__main__":
    B, S = 2, 32            # lane/sublane-friendly small shapes (H, F multiples of 128)
    VOCAB = 64
    HIDDEN = 128
    FFN = 256
    NUM_HEADS = 2           # head dim 64, same as roberta-base
    NUM_LAYERS = 2
    MAX_POS = 64
    Q_TILE = 16             # 2 query tiles per row -> exercises the (batch, q_tile) grid

    key = jax.random.PRNGKey(0)
    pkey, ikey = jax.random.split(key)
    params = init_params(pkey, VOCAB, MAX_POS, HIDDEN, FFN, NUM_LAYERS)

    input_ids = jax.random.randint(ikey, (B, S), 0, VOCAB, dtype=jnp.int32)
    lengths = jnp.array([24, 12], dtype=jnp.int32)
    attention_mask = (jnp.arange(S)[None, :] < lengths[:, None]).astype(jnp.int32)

    ref = reference_forward(params, input_ids, attention_mask, num_heads=NUM_HEADS)

    def run(single_buffer_weights):
        fwd = jax.jit(functools.partial(
            barlow_twins_forward, num_heads=NUM_HEADS, q_tile=Q_TILE,
            single_buffer_weights=single_buffer_weights))
        return jax.block_until_ready(fwd(params, input_ids, attention_mask))

    try:
        out = run(True)
        if not bool(jnp.allclose(out, ref, atol=3e-2, rtol=3e-2)):
            raise ValueError("single-buffered weight path mismatch")
    except Exception:
        # Graceful fallback if this JAX build rejects pipeline_mode=pl.Buffered(1)
        # on top-level pallas_call BlockSpecs: use default double-buffered weights.
        out = run(False)

    assert out.shape == (B, HIDDEN), out.shape
    max_err = float(jnp.max(jnp.abs(out - ref)))
    assert max_err < 3e-2, f"kernel vs reference max abs err {max_err}"
    norms = jnp.sqrt(jnp.sum(out * out, axis=-1))
    assert bool(jnp.allclose(norms, 1.0, atol=1e-3)), norms
    print("KERNEL_OK")
</pallas_src>

<mosaic_0001>
module attributes {stable_mosaic.version = 11 : i64} {
  func.func @_embed_ln_kernel(%arg0: i32, %arg1: memref<1x32x128xf32, #tpu.memory_space<vmem>>, %arg2: memref<1x32x128xf32, #tpu.memory_space<vmem>>, %arg3: memref<1x128xf32, #tpu.memory_space<vmem>>, %arg4: memref<1x128xf32, #tpu.memory_space<vmem>>, %arg5: memref<1x32x128xbf16, #tpu.memory_space<vmem>>) attributes {dimension_semantics = [#tpu.dimension_semantics<parallel>], iteration_bounds = array<i64: 2>, scalar_prefetch = 0 : i64, scratch_operands = 0 : i64, tpu.core_type = #tpu.core_type<tc>, window_params = [{transform_indices = @transform_0, window_bounds = array<i64: 1, 32, 128>}, {pipeline_mode = #tpu.pipeline_mode<synchronous>, transform_indices = @transform_1, window_bounds = array<i64: 1, 32, 128>}, {pipeline_mode = #tpu.pipeline_mode<synchronous>, transform_indices = @transform_2, window_bounds = array<i64: 1, 128>}, {pipeline_mode = #tpu.pipeline_mode<synchronous>, transform_indices = @transform_3, window_bounds = array<i64: 1, 128>}, {transform_indices = @transform_4, window_bounds = array<i64: 1, 32, 128>}]} {
    %c0 = arith.constant 0 : index
    %c0_0 = arith.constant 0 : index
    %c0_1 = arith.constant 0 : index
    %0 = vector.load %arg1[%c0, %c0_0, %c0_1] : memref<1x32x128xf32, #tpu.memory_space<vmem>>, vector<1x32x128xf32>
    %1 = vector.shape_cast %0 : vector<1x32x128xf32> to vector<32x128xf32>
    %c0_2 = arith.constant 0 : index
    %c0_3 = arith.constant 0 : index
    %c0_4 = arith.constant 0 : index
    %2 = vector.load %arg2[%c0_2, %c0_3, %c0_4] : memref<1x32x128xf32, #tpu.memory_space<vmem>>, vector<1x32x128xf32>
    %3 = vector.shape_cast %2 : vector<1x32x128xf32> to vector<32x128xf32>
    %4 = arith.addf %1, %3 : vector<32x128xf32>
    %c0_5 = arith.constant 0 : index
    %c0_6 = arith.constant 0 : index
    %5 = vector.load %arg3[%c0_5, %c0_6] : memref<1x128xf32, #tpu.memory_space<vmem>>, vector<1x128xf32>
    %c0_7 = arith.constant 0 : index
    %c0_8 = arith.constant 0 : index
    %6 = vector.load %arg4[%c0_7, %c0_8] : memref<1x128xf32, #tpu.memory_space<vmem>>, vector<1x128xf32>
    %cst = arith.constant dense<0.000000e+00> : vector<32xf32>
    %7 = vector.multi_reduction <add>, %4, %cst [1] : vector<32x128xf32> to vector<32xf32>
    %8 = vector.shape_cast %7 : vector<32xf32> to vector<32x1xf32>
    %cst_9 = arith.constant 1.280000e+02 : f32
    %9 = vector.broadcast %cst_9 : f32 to vector<32x1xf32>
    %10 = arith.divf %8, %9 : vector<32x1xf32>
    %11 = vector.broadcast %10 : vector<32x1xf32> to vector<32x128xf32>
    %12 = arith.subf %4, %11 : vector<32x128xf32>
    %13 = arith.mulf %12, %12 : vector<32x128xf32>
    %cst_10 = arith.constant dense<0.000000e+00> : vector<32xf32>
    %14 = vector.multi_reduction <add>, %13, %cst_10 [1] : vector<32x128xf32> to vector<32xf32>
    %15 = vector.shape_cast %14 : vector<32xf32> to vector<32x1xf32>
    %cst_11 = arith.constant 1.280000e+02 : f32
    %16 = vector.broadcast %cst_11 : f32 to vector<32x1xf32>
    %17 = arith.divf %15, %16 : vector<32x1xf32>
    %18 = vector.broadcast %10 : vector<32x1xf32> to vector<32x128xf32>
    %19 = arith.subf %4, %18 : vector<32x128xf32>
    %cst_12 = arith.constant 9.99999974E-6 : f32
    %20 = vector.broadcast %cst_12 : f32 to vector<32x1xf32>
    %21 = arith.addf %17, %20 : vector<32x1xf32>
    %22 = math.rsqrt %21 : vector<32x1xf32>
    %23 = vector.broadcast %22 : vector<32x1xf32> to vector<32x128xf32>
    %24 = arith.mulf %19, %23 : vector<32x128xf32>
    %25 = vector.broadcast %5 : vector<1x128xf32> to vector<32x128xf32>
    %26 = arith.mulf %24, %25 : vector<32x128xf32>
    %27 = vector.broadcast %6 : vector<1x128xf32> to vector<32x128xf32>
    %28 = arith.addf %26, %27 : vector<32x128xf32>
    %29 = arith.truncf %28 : vector<32x128xf32> to vector<32x128xbf16>
    %c0_13 = arith.constant 0 : index
    %c0_14 = arith.constant 0 : index
    %c0_15 = arith.constant 0 : index
    %30 = vector.load %arg5[%c0_13, %c0_14, %c0_15] : memref<1x32x128xbf16, #tpu.memory_space<vmem>>, vector<1x32x128xbf16>
    %31 = vector.shape_cast %30 : vector<1x32x128xbf16> to vector<32x128xbf16>
    %32 = vector.shape_cast %29 : vector<32x128xbf16> to vector<1x32x128xbf16>
    tpu.vector_store %arg5[%c0_13, %c0_14, %c0_15], %32 {strides = array<i32>} : memref<1x32x128xbf16, #tpu.memory_space<vmem>>, vector<1x32x128xbf16>,
    return
  }
  func.func @transform_0(%arg0: i32) -> (i32, i32, i32) {
    %c0_i32 = arith.constant 0 : i32
    %c0_i32_0 = arith.constant 0 : i32
    %c0_i32_1 = arith.constant 0 : i32
    return %arg0, %c0_i32, %c0_i32_0 : i32, i32, i32
  }
  func.func @transform_1(%arg0: i32) -> (i32, i32, i32) {
    %c0_i32 = arith.constant 0 : i32
    %c0_i32_0 = arith.constant 0 : i32
    %c0_i32_1 = arith.constant 0 : i32
    %c0_i32_2 = arith.constant 0 : i32
    return %c0_i32, %c0_i32_0, %c0_i32_1 : i32, i32, i32
  }
  func.func @transform_2(%arg0: i32) -> (i32, i32) {
    %c0_i32 = arith.constant 0 : i32
    %c0_i32_0 = arith.constant 0 : i32
    %c0_i32_1 = arith.constant 0 : i32
    return %c0_i32, %c0_i32_0 : i32, i32
  }
  func.func @transform_3(%arg0: i32) -> (i32, i32) {
    %c0_i32 = arith.constant 0 : i32
    %c0_i32_0 = arith.constant 0 : i32
    %c0_i32_1 = arith.constant 0 : i32
    return %c0_i32, %c0_i32_0 : i32, i32
  }
  func.func @transform_4(%arg0: i32) -> (i32, i32, i32) {
    %c0_i32 = arith.constant 0 : i32
    %c0_i32_0 = arith.constant 0 : i32
    %c0_i32_1 = arith.constant 0 : i32
    return %arg0, %c0_i32, %c0_i32_0 : i32, i32, i32
  }
}

module attributes {stable_mosaic.version = 11 : i64} {
  func.func @_pool_norm_kernel(%arg0: i32, %arg1: memref<1x32x128xbf16, #tpu.memory_space<vmem>>, %arg2: memref<1x32x1xf32, #tpu.memory_space<vmem>>, %arg3: memref<1x1x128xf32, #tpu.memory_space<vmem>>) attributes {dimension_semantics = [#tpu.dimension_semantics<parallel>], iteration_bounds = array<i64: 2>, scalar_prefetch = 0 : i64, scratch_operands = 0 : i64, tpu.core_type = #tpu.core_type<tc>, window_params = [{transform_indices = @transform_0, window_bounds = array<i64: 1, 32, 128>}, {transform_indices = @transform_1, window_bounds = array<i64: 1, 32, 1>}, {transform_indices = @transform_2, window_bounds = array<i64: 1, 1, 128>}]} {
    %c0 = arith.constant 0 : index
    %c0_0 = arith.constant 0 : index
    %c0_1 = arith.constant 0 : index
    %0 = vector.load %arg1[%c0, %c0_0, %c0_1] : memref<1x32x128xbf16, #tpu.memory_space<vmem>>, vector<1x32x128xbf16>
    %1 = vector.shape_cast %0 : vector<1x32x128xbf16> to vector<32x128xbf16>
    %2 = arith.extf %1 : vector<32x128xbf16> to vector<32x128xf32>
    %c0_2 = arith.constant 0 : index
    %c0_3 = arith.constant 0 : index
    %c0_4 = arith.constant 0 : index
    %3 = vector.load %arg2[%c0_2, %c0_3, %c0_4] : memref<1x32x1xf32, #tpu.memory_space<vmem>>, vector<1x32x1xf32>
    %4 = vector.shape_cast %3 : vector<1x32x1xf32> to vector<32x1xf32>
    %5 = vector.broadcast %4 : vector<32x1xf32> to vector<32x128xf32>
    %6 = arith.mulf %2, %5 : vector<32x128xf32>
    %cst = arith.constant dense<0.000000e+00> : vector<128xf32>
    %7 = vector.multi_reduction <add>, %6, %cst [0] : vector<32x128xf32> to vector<128xf32>
    %8 = vector.shape_cast %7 : vector<128xf32> to vector<1x128xf32>
    %cst_5 = arith.constant dense<0.000000e+00> : vector<1xf32>
    %9 = vector.multi_reduction <add>, %4, %cst_5 [0] : vector<32x1xf32> to vector<1xf32>
    %10 = vector.shape_cast %9 : vector<1xf32> to vector<1x1xf32>
    %cst_6 = arith.constant 9.99999971E-10 : f32
    %11 = vector.broadcast %cst_6 : f32 to vector<1x1xf32>
    %12 = arith.maximumf %10, %11 : vector<1x1xf32>
    %13 = vector.broadcast %12 : vector<1x1xf32> to vector<1x128xf32>
    %14 = arith.divf %8, %13 : vector<1x128xf32>
    %15 = arith.mulf %14, %14 : vector<1x128xf32>
    %cst_7 = arith.constant dense<0.000000e+00> : vector<1xf32>
    %16 = vector.multi_reduction <add>, %15, %cst_7 [1] : vector<1x128xf32> to vector<1xf32>
    %17 = vector.shape_cast %16 : vector<1xf32> to vector<1x1xf32>
    %18 = math.sqrt %17 : vector<1x1xf32>
    %cst_8 = arith.constant 9.99999996E-13 : f32
    %19 = vector.broadcast %cst_8 : f32 to vector<1x1xf32>
    %20 = arith.maximumf %18, %19 : vector<1x1xf32>
    %21 = vector.broadcast %20 : vector<1x1xf32> to vector<1x128xf32>
    %22 = arith.divf %14, %21 : vector<1x128xf32>
    %c0_9 = arith.constant 0 : index
    %c0_10 = arith.constant 0 : index
    %c0_11 = arith.constant 0 : index
    %23 = vector.load %arg3[%c0_9, %c0_10, %c0_11] : memref<1x1x128xf32, #tpu.memory_space<vmem>>, vector<1x1x128xf32>
    %24 = vector.shape_cast %23 : vector<1x1x128xf32> to vector<1x128xf32>
    %25 = vector.shape_cast %22 : vector<1x128xf32> to vector<1x1x128xf32>
    tpu.vector_store %arg3[%c0_9, %c0_10, %c0_11], %25 {strides = array<i32>} : memref<1x1x128xf32, #tpu.memory_space<vmem>>, vector<1x1x128xf32>,
    return
  }
  func.func @transform_0(%arg0: i32) -> (i32, i32, i32) {
    %c0_i32 = arith.constant 0 : i32
    %c0_i32_0 = arith.constant 0 : i32
    %c0_i32_1 = arith.constant 0 : i32
    return %arg0, %c0_i32, %c0_i32_0 : i32, i32, i32
  }
  func.func @transform_1(%arg0: i32) -> (i32, i32, i32) {
    %c0_i32 = arith.constant 0 : i32
    %c0_i32_0 = arith.constant 0 : i32
    %c0_i32_1 = arith.constant 0 : i32
    return %arg0, %c0_i32, %c0_i32_0 : i32, i32, i32
  }
  func.func @transform_2(%arg0: i32) -> (i32, i32, i32) {
    %c0_i32 = arith.constant 0 : i32
    %c0_i32_0 = arith.constant 0 : i32
    %c0_i32_1 = arith.constant 0 : i32
    return %arg0, %c0_i32, %c0_i32_0 : i32, i32, i32
  }
}

module attributes {stable_mosaic.version = 11 : i64} {
  func.func @_layer_kernel(%arg0: i32, %arg1: i32, %arg2: memref<1x32x128xbf16, #tpu.memory_space<vmem>>, %arg3: memref<1x1x32xf32, #tpu.memory_space<vmem>>, %arg4: memref<128x384xbf16, #tpu.memory_space<vmem>>, %arg5: memref<1x384xf32, #tpu.memory_space<vmem>>, %arg6: memref<128x128xbf16, #tpu.memory_space<vmem>>, %arg7: memref<1x128xf32, #tpu.memory_space<vmem>>, %arg8: memref<1x128xf32, #tpu.memory_space<vmem>>, %arg9: memref<1x128xf32, #tpu.memory_space<vmem>>, %arg10: memref<128x256xbf16, #tpu.memory_space<vmem>>, %arg11: memref<1x256xf32, #tpu.memory_space<vmem>>, %arg12: memref<256x128xbf16, #tpu.memory_space<vmem>>, %arg13: memref<1x128xf32, #tpu.memory_space<vmem>>, %arg14: memref<1x128xf32, #tpu.memory_space<vmem>>, %arg15: memref<1x128xf32, #tpu.memory_space<vmem>>, %arg16: memref<1x16x128xbf16, #tpu.memory_space<vmem>>, %arg17: memref<2x32x64xbf16, #tpu.memory_space<vmem>>, %arg18: memref<2x32x64xbf16, #tpu.memory_space<vmem>>, %arg19: memref<16x128xbf16, #tpu.memory_space<vmem>>) attributes {dimension_semantics = [#tpu.dimension_semantics<parallel>, #tpu.dimension_semantics<arbitrary>], iteration_bounds = array<i64: 2, 2>, scalar_prefetch = 0 : i64, scratch_operands = 3 : i64, tpu.core_type = #tpu.core_type<tc>, window_params = [{transform_indices = @transform_0, window_bounds = array<i64: 1, 32, 128>}, {transform_indices = @transform_1, window_bounds = array<i64: 1, 1, 32>}, {pipeline_mode = #tpu.pipeline_mode<synchronous>, transform_indices = @transform_2, window_bounds = array<i64: 128, 384>}, {pipeline_mode = #tpu.pipeline_mode<synchronous>, transform_indices = @transform_3, window_bounds = array<i64: 1, 384>}, {pipeline_mode = #tpu.pipeline_mode<synchronous>, transform_indices = @transform_4, window_bounds = array<i64: 128, 128>}, {pipeline_mode = #tpu.pipeline_mode<synchronous>, transform_indices = @transform_5, window_bounds = array<i64: 1, 128>}, {pipeline_mode = #tpu.pipeline_mode<synchronous>, transform_indices = @transform_6, window_bounds = array<i64: 1, 128>}, {pipeline_mode = #tpu.pipeline_mode<synchronous>, transform_indices = @transform_7, window_bounds = array<i64: 1, 128>}, {pipeline_mode = #tpu.pipeline_mode<synchronous>, transform_indices = @transform_8, window_bounds = array<i64: 128, 256>}, {pipeline_mode = #tpu.pipeline_mode<synchronous>, transform_indices = @transform_9, window_bounds = array<i64: 1, 256>}, {pipeline_mode = #tpu.pipeline_mode<synchronous>, transform_indices = @transform_10, window_bounds = array<i64: 256, 128>}, {pipeline_mode = #tpu.pipeline_mode<synchronous>, transform_indices = @transform_11, window_bounds = array<i64: 1, 128>}, {pipeline_mode = #tpu.pipeline_mode<synchronous>, transform_indices = @transform_12, window_bounds = array<i64: 1, 128>}, {pipeline_mode = #tpu.pipeline_mode<synchronous>, transform_indices = @transform_13, window_bounds = array<i64: 1, 128>}, {transform_indices = @transform_14, window_bounds = array<i64: 1, 16, 128>}]} {
    %c0_i32 = arith.constant 0 : i32
    %0 = arith.cmpi eq, %arg1, %c0_i32 : i32
    %1 = arith.extui %0 : i1 to i32
    %c0_i32_0 = arith.constant 0 : i32
    %2 = arith.cmpi ne, %1, %c0_i32_0 : i32
    scf.if %2 {
      %c0_65 = arith.constant 0 : index
      %c0_66 = arith.constant 0 : index
      %c0_67 = arith.constant 0 : index
      %135 = vector.load %arg2[%c0_65, %c0_66, %c0_67] : memref<1x32x128xbf16, #tpu.memory_space<vmem>>, vector<1x32x128xbf16>
      %136 = vector.shape_cast %135 : vector<1x32x128xbf16> to vector<32x128xbf16>
      %c0_68 = arith.constant 0 : index
      %c128 = arith.constant 128 : index
      %137 = vector.load %arg4[%c0_68, %c128] : memref<128x384xbf16, #tpu.memory_space<vmem>>, vector<128x256xbf16>
      %cst_69 = arith.constant dense<0.000000e+00> : vector<32x256xf32>
      %138 = tpu.matmul %136, %137, %cst_69 {dimension_numbers = #tpu.dot_dimension_numbers<[1], [0], [0], [1], [0, 0, 1, 1], [], []>} : vector<32x128xbf16>, vector<128x256xbf16>, vector<32x256xf32> -> vector<32x256xf32>
      %c0_70 = arith.constant 0 : index
      %c128_71 = arith.constant 128 : index
      %139 = vector.load %arg5[%c0_70, %c128_71] : memref<1x384xf32, #tpu.memory_space<vmem>>, vector<1x256xf32>
      %140 = vector.broadcast %139 : vector<1x256xf32> to vector<32x256xf32>
      %141 = arith.addf %138, %140 : vector<32x256xf32>
      %142 = vector.extract_strided_slice %141 {offsets = [0, 0], sizes = [32, 128], strides = [1, 1]} : vector<32x256xf32> to vector<32x128xf32>
      %143 = vector.extract_strided_slice %141 {offsets = [0, 128], sizes = [32, 128], strides = [1, 1]} : vector<32x256xf32> to vector<32x128xf32>
      %144 = vector.extract_strided_slice %142 {offsets = [0, 0], sizes = [32, 64], strides = [1, 1]} : vector<32x128xf32> to vector<32x64xf32>
      %145 = vector.extract_strided_slice %142 {offsets = [0, 64], sizes = [32, 64], strides = [1, 1]} : vector<32x128xf32> to vector<32x64xf32>
      %146 = vector.shape_cast %144 : vector<32x64xf32> to vector<1x32x64xf32>
      %147 = vector.shape_cast %145 : vector<32x64xf32> to vector<1x32x64xf32>
      %148 = tpu.concatenate %146, %147 in 0 : vector<1x32x64xf32>, vector<1x32x64xf32> -> vector<2x32x64xf32>
      %149 = arith.truncf %148 : vector<2x32x64xf32> to vector<2x32x64xbf16>
      %c0_72 = arith.constant 0 : index
      %c0_73 = arith.constant 0 : index
      %c0_74 = arith.constant 0 : index
      %150 = vector.load %arg17[%c0_72, %c0_73, %c0_74] : memref<2x32x64xbf16, #tpu.memory_space<vmem>>, vector<2x32x64xbf16>
      tpu.vector_store %arg17[%c0_72, %c0_73, %c0_74], %149 {strides = array<i32>} : memref<2x32x64xbf16, #tpu.memory_space<vmem>>, vector<2x32x64xbf16>,
      %151 = vector.extract_strided_slice %143 {offsets = [0, 0], sizes = [32, 64], strides = [1, 1]} : vector<32x128xf32> to vector<32x64xf32>
      %152 = vector.extract_strided_slice %143 {offsets = [0, 64], sizes = [32, 64], strides = [1, 1]} : vector<32x128xf32> to vector<32x64xf32>
      %153 = vector.shape_cast %151 : vector<32x64xf32> to vector<1x32x64xf32>
      %154 = vector.shape_cast %152 : vector<32x64xf32> to vector<1x32x64xf32>
      %155 = tpu.concatenate %153, %154 in 0 : vector<1x32x64xf32>, vector<1x32x64xf32> -> vector<2x32x64xf32>
      %156 = arith.truncf %155 : vector<2x32x64xf32> to vector<2x32x64xbf16>
      %c0_75 = arith.constant 0 : index
      %c0_76 = arith.constant 0 : index
      %c0_77 = arith.constant 0 : index
      %157 = vector.load %arg18[%c0_75, %c0_76, %c0_77] : memref<2x32x64xbf16, #tpu.memory_space<vmem>>, vector<2x32x64xbf16>
      tpu.vector_store %arg18[%c0_75, %c0_76, %c0_77], %156 {strides = array<i32>} : memref<2x32x64xbf16, #tpu.memory_space<vmem>>, vector<2x32x64xbf16>,
    } else {
    }
    %c16_i32 = arith.constant 16 : i32
    %3 = arith.muli %arg1, %c16_i32 : i32
    %4 = tpu.assume_multiple %3, 16 : i32
    %c0 = arith.constant 0 : index
    %5 = arith.index_cast %4 : i32 to index
    %c0_1 = arith.constant 0 : index
    %6 = vector.load %arg2[%c0, %5, %c0_1] : memref<1x32x128xbf16, #tpu.memory_space<vmem>>, vector<1x16x128xbf16>
    %7 = vector.shape_cast %6 : vector<1x16x128xbf16> to vector<16x128xbf16>
    %c0_2 = arith.constant 0 : index
    %c0_3 = arith.constant 0 : index
    %8 = vector.load %arg4[%c0_2, %c0_3] : memref<128x384xbf16, #tpu.memory_space<vmem>>, vector<128x128xbf16>
    %cst = arith.constant dense<0.000000e+00> : vector<16x128xf32>
    %9 = tpu.matmul %7, %8, %cst {dimension_numbers = #tpu.dot_dimension_numbers<[1], [0], [0], [1], [0, 0, 1, 1], [], []>} : vector<16x128xbf16>, vector<128x128xbf16>, vector<16x128xf32> -> vector<16x128xf32>
    %c0_4 = arith.constant 0 : index
    %c0_5 = arith.constant 0 : index
    %10 = vector.load %arg5[%c0_4, %c0_5] : memref<1x384xf32, #tpu.memory_space<vmem>>, vector<1x128xf32>
    %11 = vector.broadcast %10 : vector<1x128xf32> to vector<16x128xf32>
    %12 = arith.addf %9, %11 : vector<16x128xf32>
    %13 = vector.extract_strided_slice %12 {offsets = [0, 0], sizes = [16, 64], strides = [1, 1]} : vector<16x128xf32> to vector<16x64xf32>
    %14 = vector.extract_strided_slice %12 {offsets = [0, 64], sizes = [16, 64], strides = [1, 1]} : vector<16x128xf32> to vector<16x64xf32>
    %15 = vector.shape_cast %13 : vector<16x64xf32> to vector<1x16x64xf32>
    %16 = vector.shape_cast %14 : vector<16x64xf32> to vector<1x16x64xf32>
    %17 = tpu.concatenate %15, %16 in 0 : vector<1x16x64xf32>, vector<1x16x64xf32> -> vector<2x16x64xf32>
    %18 = arith.truncf %17 : vector<2x16x64xf32> to vector<2x16x64xbf16>
    %c0_6 = arith.constant 0 : index
    %c0_7 = arith.constant 0 : index
    %c0_8 = arith.constant 0 : index
    %19 = vector.load %arg17[%c0_6, %c0_7, %c0_8] : memref<2x32x64xbf16, #tpu.memory_space<vmem>>, vector<2x32x64xbf16>
    %c0_9 = arith.constant 0 : index
    %c0_10 = arith.constant 0 : index
    %c0_11 = arith.constant 0 : index
    %20 = vector.load %arg18[%c0_9, %c0_10, %c0_11] : memref<2x32x64xbf16, #tpu.memory_space<vmem>>, vector<2x32x64xbf16>
    "tpu.trace_start"() <{level = 10 : i32, message = "hqd,hkd->hqk"}> : () -> ()
    %cst_12 = arith.constant dense<0.000000e+00> : vector<2x16x32xf32>
    %21 = tpu.matmul %18, %19, %cst_12 {dimension_numbers = #tpu.dot_dimension_numbers<[2], [2], [1], [1], [0, 0, 0, 1, 1, 1], [0], [0]>} : vector<2x16x64xbf16>, vector<2x32x64xbf16>, vector<2x16x32xf32> -> vector<2x16x32xf32>
    "tpu.trace_stop"() : () -> ()
    %cst_13 = arith.constant 1.250000e-01 : f32
    %22 = vector.broadcast %cst_13 : f32 to vector<2x16x32xf32>
    %23 = arith.mulf %21, %22 : vector<2x16x32xf32>
    %c0_14 = arith.constant 0 : index
    %c0_15 = arith.constant 0 : index
    %c0_16 = arith.constant 0 : index
    %24 = vector.load %arg3[%c0_14, %c0_15, %c0_16] : memref<1x1x32xf32, #tpu.memory_space<vmem>>, vector<1x1x32xf32>
    %25 = vector.shape_cast %24 : vector<1x1x32xf32> to vector<1x32xf32>
    %26 = vector.shape_cast %25 : vector<1x32xf32> to vector<1x1x32xf32>
    %27 = vector.broadcast %26 : vector<1x1x32xf32> to vector<2x16x32xf32>
    %28 = arith.addf %23, %27 : vector<2x16x32xf32>
    %cst_17 = arith.constant dense<0xFF800000> : vector<2x16xf32>
    %29 = vector.multi_reduction <maximumf>, %28, %cst_17 [2] : vector<2x16x32xf32> to vector<2x16xf32>
    %30 = vector.shape_cast %29 : vector<2x16xf32> to vector<2x16x1xf32>
    %31 = vector.broadcast %30 : vector<2x16x1xf32> to vector<2x16x32xf32>
    %32 = arith.subf %28, %31 : vector<2x16x32xf32>
    %33 = math.exp %32 : vector<2x16x32xf32>
    %cst_18 = arith.constant dense<0.000000e+00> : vector<2x16xf32>
    %34 = vector.multi_reduction <add>, %33, %cst_18 [2] : vector<2x16x32xf32> to vector<2x16xf32>
    %35 = vector.shape_cast %34 : vector<2x16xf32> to vector<2x16x1xf32>
    %36 = tpu.reciprocal %35 {approx = true} : vector<2x16x1xf32> -> vector<2x16x1xf32>
    %37 = vector.broadcast %36 : vector<2x16x1xf32> to vector<2x16x32xf32>
    %38 = arith.mulf %33, %37 : vector<2x16x32xf32>
    %39 = arith.truncf %38 : vector<2x16x32xf32> to vector<2x16x32xbf16>
    "tpu.trace_start"() <{level = 10 : i32, message = "hqk,hkd->hqd"}> : () -> ()
    %cst_19 = arith.constant dense<0.000000e+00> : vector<2x16x64xf32>
    %40 = tpu.matmul %39, %20, %cst_19 {dimension_numbers = #tpu.dot_dimension_numbers<[2], [1], [1], [2], [0, 0, 0, 1, 1, 2], [0], [0]>} : vector<2x16x32xbf16>, vector<2x32x64xbf16>, vector<2x16x64xf32> -> vector<2x16x64xf32>
    "tpu.trace_stop"() : () -> ()
    %41 = vector.extract_strided_slice %40 {offsets = [0, 0, 0], sizes = [1, 16, 64], strides = [1, 1, 1]} : vector<2x16x64xf32> to vector<1x16x64xf32>
    %42 = vector.shape_cast %41 : vector<1x16x64xf32> to vector<16x64xf32>
    %43 = arith.truncf %42 : vector<16x64xf32> to vector<16x64xbf16>
    %c0_20 = arith.constant 0 : index
    %c0_21 = arith.constant 0 : index
    %44 = vector.load %arg19[%c0_20, %c0_21] : memref<16x128xbf16, #tpu.memory_space<vmem>>, vector<16x64xbf16>
    tpu.vector_store %arg19[%c0_20, %c0_21], %43 {strides = array<i32>} : memref<16x128xbf16, #tpu.memory_space<vmem>>, vector<16x64xbf16>,
    %45 = vector.extract_strided_slice %40 {offsets = [1, 0, 0], sizes = [1, 16, 64], strides = [1, 1, 1]} : vector<2x16x64xf32> to vector<1x16x64xf32>
    %46 = vector.shape_cast %45 : vector<1x16x64xf32> to vector<16x64xf32>
    %47 = arith.truncf %46 : vector<16x64xf32> to vector<16x64xbf16>
    %c0_22 = arith.constant 0 : index
    %c64 = arith.constant 64 : index
    %48 = vector.load %arg19[%c0_22, %c64] : memref<16x128xbf16, #tpu.memory_space<vmem>>, vector<16x64xbf16>
    tpu.vector_store %arg19[%c0_22, %c64], %47 {strides = array<i32>} : memref<16x128xbf16, #tpu.memory_space<vmem>>, vector<16x64xbf16>,
    %c0_23 = arith.constant 0 : index
    %c0_24 = arith.constant 0 : index
    %49 = vector.load %arg19[%c0_23, %c0_24] : memref<16x128xbf16, #tpu.memory_space<vmem>>, vector<16x128xbf16>
    %c0_25 = arith.constant 0 : index
    %c0_26 = arith.constant 0 : index
    %50 = vector.load %arg6[%c0_25, %c0_26] : memref<128x128xbf16, #tpu.memory_space<vmem>>, vector<128x128xbf16>
    %cst_27 = arith.constant dense<0.000000e+00> : vector<16x128xf32>
    %51 = tpu.matmul %49, %50, %cst_27 {dimension_numbers = #tpu.dot_dimension_numbers<[1], [0], [0], [1], [0, 0, 1, 1], [], []>} : vector<16x128xbf16>, vector<128x128xbf16>, vector<16x128xf32> -> vector<16x128xf32>
    %c0_28 = arith.constant 0 : index
    %c0_29 = arith.constant 0 : index
    %52 = vector.load %arg7[%c0_28, %c0_29] : memref<1x128xf32, #tpu.memory_space<vmem>>, vector<1x128xf32>
    %53 = vector.broadcast %52 : vector<1x128xf32> to vector<16x128xf32>
    %54 = arith.addf %51, %53 : vector<16x128xf32>
    %55 = arith.extf %7 : vector<16x128xbf16> to vector<16x128xf32>
    %56 = arith.addf %55, %54 : vector<16x128xf32>
    %c0_30 = arith.constant 0 : index
    %c0_31 = arith.constant 0 : index
    %57 = vector.load %arg8[%c0_30, %c0_31] : memref<1x128xf32, #tpu.memory_space<vmem>>, vector<1x128xf32>
    %c0_32 = arith.constant 0 : index
    %c0_33 = arith.constant 0 : index
    %58 = vector.load %arg9[%c0_32, %c0_33] : memref<1x128xf32, #tpu.memory_space<vmem>>, vector<1x128xf32>
    %cst_34 = arith.constant dense<0.000000e+00> : vector<16xf32>
    %59 = vector.multi_reduction <add>, %56, %cst_34 [1] : vector<16x128xf32> to vector<16xf32>
    %60 = vector.shape_cast %59 : vector<16xf32> to vector<16x1xf32>
    %cst_35 = arith.constant 1.280000e+02 : f32
    %61 = vector.broadcast %cst_35 : f32 to vector<16x1xf32>
    %62 = arith.divf %60, %61 : vector<16x1xf32>
    %63 = vector.broadcast %62 : vector<16x1xf32> to vector<16x128xf32>
    %64 = arith.subf %56, %63 : vector<16x128xf32>
    %65 = arith.mulf %64, %64 : vector<16x128xf32>
    %cst_36 = arith.constant dense<0.000000e+00> : vector<16xf32>
    %66 = vector.multi_reduction <add>, %65, %cst_36 [1] : vector<16x128xf32> to vector<16xf32>
    %67 = vector.shape_cast %66 : vector<16xf32> to vector<16x1xf32>
    %cst_37 = arith.constant 1.280000e+02 : f32
    %68 = vector.broadcast %cst_37 : f32 to vector<16x1xf32>
    %69 = arith.divf %67, %68 : vector<16x1xf32>
    %70 = vector.broadcast %62 : vector<16x1xf32> to vector<16x128xf32>
    %71 = arith.subf %56, %70 : vector<16x128xf32>
    %cst_38 = arith.constant 9.99999974E-6 : f32
    %72 = vector.broadcast %cst_38 : f32 to vector<16x1xf32>
    %73 = arith.addf %69, %72 : vector<16x1xf32>
    %74 = math.rsqrt %73 : vector<16x1xf32>
    %75 = vector.broadcast %74 : vector<16x1xf32> to vector<16x128xf32>
    %76 = arith.mulf %71, %75 : vector<16x128xf32>
    %77 = vector.broadcast %57 : vector<1x128xf32> to vector<16x128xf32>
    %78 = arith.mulf %76, %77 : vector<16x128xf32>
    %79 = vector.broadcast %58 : vector<1x128xf32> to vector<16x128xf32>
    %80 = arith.addf %78, %79 : vector<16x128xf32>
    %81 = arith.truncf %80 : vector<16x128xf32> to vector<16x128xbf16>
    %c0_39 = arith.constant 0 : index
    %c0_40 = arith.constant 0 : index
    %82 = vector.load %arg10[%c0_39, %c0_40] : memref<128x256xbf16, #tpu.memory_space<vmem>>, vector<128x256xbf16>
    %cst_41 = arith.constant dense<0.000000e+00> : vector<16x256xf32>
    %83 = tpu.matmul %81, %82, %cst_41 {dimension_numbers = #tpu.dot_dimension_numbers<[1], [0], [0], [1], [0, 0, 1, 1], [], []>} : vector<16x128xbf16>, vector<128x256xbf16>, vector<16x256xf32> -> vector<16x256xf32>
    %c0_42 = arith.constant 0 : index
    %c0_43 = arith.constant 0 : index
    %84 = vector.load %arg11[%c0_42, %c0_43] : memref<1x256xf32, #tpu.memory_space<vmem>>, vector<1x256xf32>
    %85 = vector.broadcast %84 : vector<1x256xf32> to vector<16x256xf32>
    %86 = arith.addf %83, %85 : vector<16x256xf32>
    %87 = arith.mulf %86, %86 : vector<16x256xf32>
    %88 = arith.mulf %86, %87 : vector<16x256xf32>
    %cst_44 = arith.constant 4.471500e-02 : f32
    %89 = vector.broadcast %cst_44 : f32 to vector<16x256xf32>
    %90 = arith.mulf %89, %88 : vector<16x256xf32>
    %91 = arith.addf %86, %90 : vector<16x256xf32>
    %cst_45 = arith.constant 0.797884583 : f32
    %92 = vector.broadcast %cst_45 : f32 to vector<16x256xf32>
    %93 = arith.mulf %92, %91 : vector<16x256xf32>
    %94 = math.tanh %93 : vector<16x256xf32>
    %cst_46 = arith.constant 1.000000e+00 : f32
    %95 = vector.broadcast %cst_46 : f32 to vector<16x256xf32>
    %96 = arith.addf %95, %94 : vector<16x256xf32>
    %cst_47 = arith.constant 5.000000e-01 : f32
    %97 = vector.broadcast %cst_47 : f32 to vector<16x256xf32>
    %98 = arith.mulf %97, %96 : vector<16x256xf32>
    %99 = arith.mulf %86, %98 : vector<16x256xf32>
    %100 = arith.truncf %99 : vector<16x256xf32> to vector<16x256xbf16>
    %c0_48 = arith.constant 0 : index
    %c0_49 = arith.constant 0 : index
    %101 = vector.load %arg12[%c0_48, %c0_49] : memref<256x128xbf16, #tpu.memory_space<vmem>>, vector<256x128xbf16>
    %cst_50 = arith.constant dense<0.000000e+00> : vector<16x128xf32>
    %102 = tpu.matmul %100, %101, %cst_50 {dimension_numbers = #tpu.dot_dimension_numbers<[1], [0], [0], [1], [0, 0, 1, 1], [], []>} : vector<16x256xbf16>, vector<256x128xbf16>, vector<16x128xf32> -> vector<16x128xf32>
    %c0_51 = arith.constant 0 : index
    %c0_52 = arith.constant 0 : index
    %103 = vector.load %arg13[%c0_51, %c0_52] : memref<1x128xf32, #tpu.memory_space<vmem>>, vector<1x128xf32>
    %104 = vector.broadcast %103 : vector<1x128xf32> to vector<16x128xf32>
    %105 = arith.addf %102, %104 : vector<16x128xf32>
    %106 = arith.addf %80, %105 : vector<16x128xf32>
    %c0_53 = arith.constant 0 : index
    %c0_54 = arith.constant 0 : index
    %107 = vector.load %arg14[%c0_53, %c0_54] : memref<1x128xf32, #tpu.memory_space<vmem>>, vector<1x128xf32>
    %c0_55 = arith.constant 0 : index
    %c0_56 = arith.constant 0 : index
    %108 = vector.load %arg15[%c0_55, %c0_56] : memref<1x128xf32, #tpu.memory_space<vmem>>, vector<1x128xf32>
    %cst_57 = arith.constant dense<0.000000e+00> : vector<16xf32>
    %109 = vector.multi_reduction <add>, %106, %cst_57 [1] : vector<16x128xf32> to vector<16xf32>
    %110 = vector.shape_cast %109 : vector<16xf32> to vector<16x1xf32>
    %cst_58 = arith.constant 1.280000e+02 : f32
    %111 = vector.broadcast %cst_58 : f32 to vector<16x1xf32>
    %112 = arith.divf %110, %111 : vector<16x1xf32>
    %113 = vector.broadcast %112 : vector<16x1xf32> to vector<16x128xf32>
    %114 = arith.subf %106, %113 : vector<16x128xf32>
    %115 = arith.mulf %114, %114 : vector<16x128xf32>
    %cst_59 = arith.constant dense<0.000000e+00> : vector<16xf32>
    %116 = vector.multi_reduction <add>, %115, %cst_59 [1] : vector<16x128xf32> to vector<16xf32>
    %117 = vector.shape_cast %116 : vector<16xf32> to vector<16x1xf32>
    %cst_60 = arith.constant 1.280000e+02 : f32
    %118 = vector.broadcast %cst_60 : f32 to vector<16x1xf32>
    %119 = arith.divf %117, %118 : vector<16x1xf32>
    %120 = vector.broadcast %112 : vector<16x1xf32> to vector<16x128xf32>
    %121 = arith.subf %106, %120 : vector<16x128xf32>
    %cst_61 = arith.constant 9.99999974E-6 : f32
    %122 = vector.broadcast %cst_61 : f32 to vector<16x1xf32>
    %123 = arith.addf %119, %122 : vector<16x1xf32>
    %124 = math.rsqrt %123 : vector<16x1xf32>
    %125 = vector.broadcast %124 : vector<16x1xf32> to vector<16x128xf32>
    %126 = arith.mulf %121, %125 : vector<16x128xf32>
    %127 = vector.broadcast %107 : vector<1x128xf32> to vector<16x128xf32>
    %128 = arith.mulf %126, %127 : vector<16x128xf32>
    %129 = vector.broadcast %108 : vector<1x128xf32> to vector<16x128xf32>
    %130 = arith.addf %128, %129 : vector<16x128xf32>
    %131 = arith.truncf %130 : vector<16x128xf32> to vector<16x128xbf16>
    %c0_62 = arith.constant 0 : index
    %c0_63 = arith.constant 0 : index
    %c0_64 = arith.constant 0 : index
    %132 = vector.load %arg16[%c0_62, %c0_63, %c0_64] : memref<1x16x128xbf16, #tpu.memory_space<vmem>>, vector<1x16x128xbf16>
    %133 = vector.shape_cast %132 : vector<1x16x128xbf16> to vector<16x128xbf16>
    %134 = vector.shape_cast %131 : vector<16x128xbf16> to vector<1x16x128xbf16>
    tpu.vector_store %arg16[%c0_62, %c0_63, %c0_64], %134 {strides = array<i32>} : memref<1x16x128xbf16, #tpu.memory_space<vmem>>, vector<1x16x128xbf16>,
    return
  }
  func.func @transform_0(%arg0: i32, %arg1: i32) -> (i32, i32, i32) {
    %c0_i32 = arith.constant 0 : i32
    %c0_i32_0 = arith.constant 0 : i32
    %c0_i32_1 = arith.constant 0 : i32
    return %arg0, %c0_i32, %c0_i32_0 : i32, i32, i32
  }
  func.func @transform_1(%arg0: i32, %arg1: i32) -> (i32, i32, i32) {
    %c0_i32 = arith.constant 0 : i32
    %c0_i32_0 = arith.constant 0 : i32
    %c0_i32_1 = arith.constant 0 : i32
    return %arg0, %c0_i32, %c0_i32_0 : i32, i32, i32
  }
  func.func @transform_2(%arg0: i32, %arg1: i32) -> (i32, i32) {
    %c0_i32 = arith.constant 0 : i32
    %c0_i32_0 = arith.constant 0 : i32
    %c0_i32_1 = arith.constant 0 : i32
    return %c0_i32, %c0_i32_0 : i32, i32
  }
  func.func @transform_3(%arg0: i32, %arg1: i32) -> (i32, i32) {
    %c0_i32 = arith.constant 0 : i32
    %c0_i32_0 = arith.constant 0 : i32
    %c0_i32_1 = arith.constant 0 : i32
    return %c0_i32, %c0_i32_0 : i32, i32
  }
  func.func @transform_4(%arg0: i32, %arg1: i32) -> (i32, i32) {
    %c0_i32 = arith.constant 0 : i32
    %c0_i32_0 = arith.constant 0 : i32
    %c0_i32_1 = arith.constant 0 : i32
    return %c0_i32, %c0_i32_0 : i32, i32
  }
  func.func @transform_5(%arg0: i32, %arg1: i32) -> (i32, i32) {
    %c0_i32 = arith.constant 0 : i32
    %c0_i32_0 = arith.constant 0 : i32
    %c0_i32_1 = arith.constant 0 : i32
    return %c0_i32, %c0_i32_0 : i32, i32
  }
  func.func @transform_6(%arg0: i32, %arg1: i32) -> (i32, i32) {
    %c0_i32 = arith.constant 0 : i32
    %c0_i32_0 = arith.constant 0 : i32
    %c0_i32_1 = arith.constant 0 : i32
    return %c0_i32, %c0_i32_0 : i32, i32
  }
  func.func @transform_7(%arg0: i32, %arg1: i32) -> (i32, i32) {
    %c0_i32 = arith.constant 0 : i32
    %c0_i32_0 = arith.constant 0 : i32
    %c0_i32_1 = arith.constant 0 : i32
    return %c0_i32, %c0_i32_0 : i32, i32
  }
  func.func @transform_8(%arg0: i32, %arg1: i32) -> (i32, i32) {
    %c0_i32 = arith.constant 0 : i32
    %c0_i32_0 = arith.constant 0 : i32
    %c0_i32_1 = arith.constant 0 : i32
    return %c0_i32, %c0_i32_0 : i32, i32
  }
  func.func @transform_9(%arg0: i32, %arg1: i32) -> (i32, i32) {
    %c0_i32 = arith.constant 0 : i32
    %c0_i32_0 = arith.constant 0 : i32
    %c0_i32_1 = arith.constant 0 : i32
    return %c0_i32, %c0_i32_0 : i32, i32
  }
  func.func @transform_10(%arg0: i32, %arg1: i32) -> (i32, i32) {
    %c0_i32 = arith.constant 0 : i32
    %c0_i32_0 = arith.constant 0 : i32
    %c0_i32_1 = arith.constant 0 : i32
    return %c0_i32, %c0_i32_0 : i32, i32
  }
  func.func @transform_11(%arg0: i32, %arg1: i32) -> (i32, i32) {
    %c0_i32 = arith.constant 0 : i32
    %c0_i32_0 = arith.constant 0 : i32
    %c0_i32_1 = arith.constant 0 : i32
    return %c0_i32, %c0_i32_0 : i32, i32
  }
  func.func @transform_12(%arg0: i32, %arg1: i32) -> (i32, i32) {
    %c0_i32 = arith.constant 0 : i32
    %c0_i32_0 = arith.constant 0 : i32
    %c0_i32_1 = arith.constant 0 : i32
    return %c0_i32, %c0_i32_0 : i32, i32
  }
  func.func @transform_13(%arg0: i32, %arg1: i32) -> (i32, i32) {
    %c0_i32 = arith.constant 0 : i32
    %c0_i32_0 = arith.constant 0 : i32
    %c0_i32_1 = arith.constant 0 : i32
    return %c0_i32, %c0_i32_0 : i32, i32
  }
  func.func @transform_14(%arg0: i32, %arg1: i32) -> (i32, i32, i32) {
    %c0_i32 = arith.constant 0 : i32
    %c0_i32_0 = arith.constant 0 : i32
    return %arg0, %arg1, %c0_i32 : i32, i32, i32
  }
}

module attributes {stable_mosaic.version = 11 : i64} {
  func.func @_pool_norm_kernel(%arg0: i32, %arg1: memref<1x32x128xbf16, #tpu.memory_space<vmem>>, %arg2: memref<1x32x1xf32, #tpu.memory_space<vmem>>, %arg3: memref<1x1x128xf32, #tpu.memory_space<vmem>>) attributes {dimension_semantics = [#tpu.dimension_semantics<parallel>], iteration_bounds = array<i64: 2>, scalar_prefetch = 0 : i64, scratch_operands = 0 : i64, tpu.core_type = #tpu.core_type<tc>, window_params = [{transform_indices = @transform_0, window_bounds = array<i64: 1, 32, 128>}, {transform_indices = @transform_1, window_bounds = array<i64: 1, 32, 1>}, {transform_indices = @transform_2, window_bounds = array<i64: 1, 1, 128>}]} {
    %c0 = arith.constant 0 : index
    %c0_0 = arith.constant 0 : index
    %c0_1 = arith.constant 0 : index
    %0 = vector.load %arg1[%c0, %c0_0, %c0_1] : memref<1x32x128xbf16, #tpu.memory_space<vmem>>, vector<1x32x128xbf16>
    %1 = vector.shape_cast %0 : vector<1x32x128xbf16> to vector<32x128xbf16>
    %2 = arith.extf %1 : vector<32x128xbf16> to vector<32x128xf32>
    %c0_2 = arith.constant 0 : index
    %c0_3 = arith.constant 0 : index
    %c0_4 = arith.constant 0 : index
    %3 = vector.load %arg2[%c0_2, %c0_3, %c0_4] : memref<1x32x1xf32, #tpu.memory_space<vmem>>, vector<1x32x1xf32>
    %4 = vector.shape_cast %3 : vector<1x32x1xf32> to vector<32x1xf32>
    %5 = vector.broadcast %4 : vector<32x1xf32> to vector<32x128xf32>
    %6 = arith.mulf %2, %5 : vector<32x128xf32>
    %cst = arith.constant dense<0.000000e+00> : vector<128xf32>
    %7 = vector.multi_reduction <add>, %6, %cst [0] : vector<32x128xf32> to vector<128xf32>
    %8 = vector.shape_cast %7 : vector<128xf32> to vector<1x128xf32>
    %cst_5 = arith.constant dense<0.000000e+00> : vector<1xf32>
    %9 = vector.multi_reduction <add>, %4, %cst_5 [0] : vector<32x1xf32> to vector<1xf32>
    %10 = vector.shape_cast %9 : vector<1xf32> to vector<1x1xf32>
    %cst_6 = arith.constant 9.99999971E-10 : f32
    %11 = vector.broadcast %cst_6 : f32 to vector<1x1xf32>
    %12 = arith.maximumf %10, %11 : vector<1x1xf32>
    %13 = vector.broadcast %12 : vector<1x1xf32> to vector<1x128xf32>
    %14 = arith.divf %8, %13 : vector<1x128xf32>
    %15 = arith.mulf %14, %14 : vector<1x128xf32>
    %cst_7 = arith.constant dense<0.000000e+00> : vector<1xf32>
    %16 = vector.multi_reduction <add>, %15, %cst_7 [1] : vector<1x128xf32> to vector<1xf32>
    %17 = vector.shape_cast %16 : vector<1xf32> to vector<1x1xf32>
    %18 = math.sqrt %17 : vector<1x1xf32>
    %cst_8 = arith.constant 9.99999996E-13 : f32
    %19 = vector.broadcast %cst_8 : f32 to vector<1x1xf32>
    %20 = arith.maximumf %18, %19 : vector<1x1xf32>
    %21 = vector.broadcast %20 : vector<1x1xf32> to vector<1x128xf32>
    %22 = arith.divf %14, %21 : vector<1x128xf32>
    %c0_9 = arith.constant 0 : index
    %c0_10 = arith.constant 0 : index
    %c0_11 = arith.constant 0 : index
    %23 = vector.load %arg3[%c0_9, %c0_10, %c0_11] : memref<1x1x128xf32, #tpu.memory_space<vmem>>, vector<1x1x128xf32>
    %24 = vector.shape_cast %23 : vector<1x1x128xf32> to vector<1x128xf32>
    %25 = vector.shape_cast %22 : vector<1x128xf32> to vector<1x1x128xf32>
    tpu.vector_store %arg3[%c0_9, %c0_10, %c0_11], %25 {strides = array<i32>} : memref<1x1x128xf32, #tpu.memory_space<vmem>>, vector<1x1x128xf32>,
    return
  }
  func.func @transform_0(%arg0: i32) -> (i32, i32, i32) {
    %c0_i32 = arith.constant 0 : i32
    %c0_i32_0 = arith.constant 0 : i32
    %c0_i32_1 = arith.constant 0 : i32
    return %arg0, %c0_i32, %c0_i32_0 : i32, i32, i32
  }
  func.func @transform_1(%arg0: i32) -> (i32, i32, i32) {
    %c0_i32 = arith.constant 0 : i32
    %c0_i32_0 = arith.constant 0 : i32
    %c0_i32_1 = arith.constant 0 : i32
    return %arg0, %c0_i32, %c0_i32_0 : i32, i32, i32
  }
  func.func @transform_2(%arg0: i32) -> (i32, i32, i32) {
    %c0_i32 = arith.constant 0 : i32
    %c0_i32_0 = arith.constant 0 : i32
    %c0_i32_1 = arith.constant 0 : i32
    return %arg0, %c0_i32, %c0_i32_0 : i32, i32, i32
  }
}

module attributes {stable_mosaic.version = 11 : i64} {
  func.func @_layer_kernel(%arg0: i32, %arg1: i32, %arg2: memref<1x32x128xbf16, #tpu.memory_space<vmem>>, %arg3: memref<1x1x32xf32, #tpu.memory_space<vmem>>, %arg4: memref<128x384xbf16, #tpu.memory_space<vmem>>, %arg5: memref<1x384xf32, #tpu.memory_space<vmem>>, %arg6: memref<128x128xbf16, #tpu.memory_space<vmem>>, %arg7: memref<1x128xf32, #tpu.memory_space<vmem>>, %arg8: memref<1x128xf32, #tpu.memory_space<vmem>>, %arg9: memref<1x128xf32, #tpu.memory_space<vmem>>, %arg10: memref<128x256xbf16, #tpu.memory_space<vmem>>, %arg11: memref<1x256xf32, #tpu.memory_space<vmem>>, %arg12: memref<256x128xbf16, #tpu.memory_space<vmem>>, %arg13: memref<1x128xf32, #tpu.memory_space<vmem>>, %arg14: memref<1x128xf32, #tpu.memory_space<vmem>>, %arg15: memref<1x128xf32, #tpu.memory_space<vmem>>, %arg16: memref<1x16x128xbf16, #tpu.memory_space<vmem>>, %arg17: memref<2x32x64xbf16, #tpu.memory_space<vmem>>, %arg18: memref<2x32x64xbf16, #tpu.memory_space<vmem>>, %arg19: memref<16x128xbf16, #tpu.memory_space<vmem>>) attributes {dimension_semantics = [#tpu.dimension_semantics<parallel>, #tpu.dimension_semantics<arbitrary>], iteration_bounds = array<i64: 2, 2>, scalar_prefetch = 0 : i64, scratch_operands = 3 : i64, tpu.core_type = #tpu.core_type<tc>, window_params = [{transform_indices = @transform_0, window_bounds = array<i64: 1, 32, 128>}, {transform_indices = @transform_1, window_bounds = array<i64: 1, 1, 32>}, {pipeline_mode = #tpu.pipeline_mode<synchronous>, transform_indices = @transform_2, window_bounds = array<i64: 128, 384>}, {pipeline_mode = #tpu.pipeline_mode<synchronous>, transform_indices = @transform_3, window_bounds = array<i64: 1, 384>}, {pipeline_mode = #tpu.pipeline_mode<synchronous>, transform_indices = @transform_4, window_bounds = array<i64: 128, 128>}, {pipeline_mode = #tpu.pipeline_mode<synchronous>, transform_indices = @transform_5, window_bounds = array<i64: 1, 128>}, {pipeline_mode = #tpu.pipeline_mode<synchronous>, transform_indices = @transform_6, window_bounds = array<i64: 1, 128>}, {pipeline_mode = #tpu.pipeline_mode<synchronous>, transform_indices = @transform_7, window_bounds = array<i64: 1, 128>}, {pipeline_mode = #tpu.pipeline_mode<synchronous>, transform_indices = @transform_8, window_bounds = array<i64: 128, 256>}, {pipeline_mode = #tpu.pipeline_mode<synchronous>, transform_indices = @transform_9, window_bounds = array<i64: 1, 256>}, {pipeline_mode = #tpu.pipeline_mode<synchronous>, transform_indices = @transform_10, window_bounds = array<i64: 256, 128>}, {pipeline_mode = #tpu.pipeline_mode<synchronous>, transform_indices = @transform_11, window_bounds = array<i64: 1, 128>}, {pipeline_mode = #tpu.pipeline_mode<synchronous>, transform_indices = @transform_12, window_bounds = array<i64: 1, 128>}, {pipeline_mode = #tpu.pipeline_mode<synchronous>, transform_indices = @transform_13, window_bounds = array<i64: 1, 128>}, {transform_indices = @transform_14, window_bounds = array<i64: 1, 16, 128>}]} {
    %c0_i32 = arith.constant 0 : i32
    %0 = arith.cmpi eq, %arg1, %c0_i32 : i32
    %1 = arith.extui %0 : i1 to i32
    %c0_i32_0 = arith.constant 0 : i32
    %2 = arith.cmpi ne, %1, %c0_i32_0 : i32
    scf.if %2 {
      %c0_65 = arith.constant 0 : index
      %c0_66 = arith.constant 0 : index
      %c0_67 = arith.constant 0 : index
      %135 = vector.load %arg2[%c0_65, %c0_66, %c0_67] : memref<1x32x128xbf16, #tpu.memory_space<vmem>>, vector<1x32x128xbf16>
      %136 = vector.shape_cast %135 : vector<1x32x128xbf16> to vector<32x128xbf16>
      %c0_68 = arith.constant 0 : index
      %c128 = arith.constant 128 : index
      %137 = vector.load %arg4[%c0_68, %c128] : memref<128x384xbf16, #tpu.memory_space<vmem>>, vector<128x256xbf16>
      %cst_69 = arith.constant dense<0.000000e+00> : vector<32x256xf32>
      %138 = tpu.matmul %136, %137, %cst_69 {dimension_numbers = #tpu.dot_dimension_numbers<[1], [0], [0], [1], [0, 0, 1, 1], [], []>} : vector<32x128xbf16>, vector<128x256xbf16>, vector<32x256xf32> -> vector<32x256xf32>
      %c0_70 = arith.constant 0 : index
      %c128_71 = arith.constant 128 : index
      %139 = vector.load %arg5[%c0_70, %c128_71] : memref<1x384xf32, #tpu.memory_space<vmem>>, vector<1x256xf32>
      %140 = vector.broadcast %139 : vector<1x256xf32> to vector<32x256xf32>
      %141 = arith.addf %138, %140 : vector<32x256xf32>
      %142 = vector.extract_strided_slice %141 {offsets = [0, 0], sizes = [32, 128], strides = [1, 1]} : vector<32x256xf32> to vector<32x128xf32>
      %143 = vector.extract_strided_slice %141 {offsets = [0, 128], sizes = [32, 128], strides = [1, 1]} : vector<32x256xf32> to vector<32x128xf32>
      %144 = vector.extract_strided_slice %142 {offsets = [0, 0], sizes = [32, 64], strides = [1, 1]} : vector<32x128xf32> to vector<32x64xf32>
      %145 = vector.extract_strided_slice %142 {offsets = [0, 64], sizes = [32, 64], strides = [1, 1]} : vector<32x128xf32> to vector<32x64xf32>
      %146 = vector.shape_cast %144 : vector<32x64xf32> to vector<1x32x64xf32>
      %147 = vector.shape_cast %145 : vector<32x64xf32> to vector<1x32x64xf32>
      %148 = tpu.concatenate %146, %147 in 0 : vector<1x32x64xf32>, vector<1x32x64xf32> -> vector<2x32x64xf32>
      %149 = arith.truncf %148 : vector<2x32x64xf32> to vector<2x32x64xbf16>
      %c0_72 = arith.constant 0 : index
      %c0_73 = arith.constant 0 : index
      %c0_74 = arith.constant 0 : index
      %150 = vector.load %arg17[%c0_72, %c0_73, %c0_74] : memref<2x32x64xbf16, #tpu.memory_space<vmem>>, vector<2x32x64xbf16>
      tpu.vector_store %arg17[%c0_72, %c0_73, %c0_74], %149 {strides = array<i32>} : memref<2x32x64xbf16, #tpu.memory_space<vmem>>, vector<2x32x64xbf16>,
      %151 = vector.extract_strided_slice %143 {offsets = [0, 0], sizes = [32, 64], strides = [1, 1]} : vector<32x128xf32> to vector<32x64xf32>
      %152 = vector.extract_strided_slice %143 {offsets = [0, 64], sizes = [32, 64], strides = [1, 1]} : vector<32x128xf32> to vector<32x64xf32>
      %153 = vector.shape_cast %151 : vector<32x64xf32> to vector<1x32x64xf32>
      %154 = vector.shape_cast %152 : vector<32x64xf32> to vector<1x32x64xf32>
      %155 = tpu.concatenate %153, %154 in 0 : vector<1x32x64xf32>, vector<1x32x64xf32> -> vector<2x32x64xf32>
      %156 = arith.truncf %155 : vector<2x32x64xf32> to vector<2x32x64xbf16>
      %c0_75 = arith.constant 0 : index
      %c0_76 = arith.constant 0 : index
      %c0_77 = arith.constant 0 : index
      %157 = vector.load %arg18[%c0_75, %c0_76, %c0_77] : memref<2x32x64xbf16, #tpu.memory_space<vmem>>, vector<2x32x64xbf16>
      tpu.vector_store %arg18[%c0_75, %c0_76, %c0_77], %156 {strides = array<i32>} : memref<2x32x64xbf16, #tpu.memory_space<vmem>>, vector<2x32x64xbf16>,
    } else {
    }
    %c16_i32 = arith.constant 16 : i32
    %3 = arith.muli %arg1, %c16_i32 : i32
    %4 = tpu.assume_multiple %3, 16 : i32
    %c0 = arith.constant 0 : index
    %5 = arith.index_cast %4 : i32 to index
    %c0_1 = arith.constant 0 : index
    %6 = vector.load %arg2[%c0, %5, %c0_1] : memref<1x32x128xbf16, #tpu.memory_space<vmem>>, vector<1x16x128xbf16>
    %7 = vector.shape_cast %6 : vector<1x16x128xbf16> to vector<16x128xbf16>
    %c0_2 = arith.constant 0 : index
    %c0_3 = arith.constant 0 : index
    %8 = vector.load %arg4[%c0_2, %c0_3] : memref<128x384xbf16, #tpu.memory_space<vmem>>, vector<128x128xbf16>
    %cst = arith.constant dense<0.000000e+00> : vector<16x128xf32>
    %9 = tpu.matmul %7, %8, %cst {dimension_numbers = #tpu.dot_dimension_numbers<[1], [0], [0], [1], [0, 0, 1, 1], [], []>} : vector<16x128xbf16>, vector<128x128xbf16>, vector<16x128xf32> -> vector<16x128xf32>
    %c0_4 = arith.constant 0 : index
    %c0_5 = arith.constant 0 : index
    %10 = vector.load %arg5[%c0_4, %c0_5] : memref<1x384xf32, #tpu.memory_space<vmem>>, vector<1x128xf32>
    %11 = vector.broadcast %10 : vector<1x128xf32> to vector<16x128xf32>
    %12 = arith.addf %9, %11 : vector<16x128xf32>
    %13 = vector.extract_strided_slice %12 {offsets = [0, 0], sizes = [16, 64], strides = [1, 1]} : vector<16x128xf32> to vector<16x64xf32>
    %14 = vector.extract_strided_slice %12 {offsets = [0, 64], sizes = [16, 64], strides = [1, 1]} : vector<16x128xf32> to vector<16x64xf32>
    %15 = vector.shape_cast %13 : vector<16x64xf32> to vector<1x16x64xf32>
    %16 = vector.shape_cast %14 : vector<16x64xf32> to vector<1x16x64xf32>
    %17 = tpu.concatenate %15, %16 in 0 : vector<1x16x64xf32>, vector<1x16x64xf32> -> vector<2x16x64xf32>
    %18 = arith.truncf %17 : vector<2x16x64xf32> to vector<2x16x64xbf16>
    %c0_6 = arith.constant 0 : index
    %c0_7 = arith.constant 0 : index
    %c0_8 = arith.constant 0 : index
    %19 = vector.load %arg17[%c0_6, %c0_7, %c0_8] : memref<2x32x64xbf16, #tpu.memory_space<vmem>>, vector<2x32x64xbf16>
    %c0_9 = arith.constant 0 : index
    %c0_10 = arith.constant 0 : index
    %c0_11 = arith.constant 0 : index
    %20 = vector.load %arg18[%c0_9, %c0_10, %c0_11] : memref<2x32x64xbf16, #tpu.memory_space<vmem>>, vector<2x32x64xbf16>
    "tpu.trace_start"() <{level = 10 : i32, message = "hqd,hkd->hqk"}> : () -> ()
    %cst_12 = arith.constant dense<0.000000e+00> : vector<2x16x32xf32>
    %21 = tpu.matmul %18, %19, %cst_12 {dimension_numbers = #tpu.dot_dimension_numbers<[2], [2], [1], [1], [0, 0, 0, 1, 1, 1], [0], [0]>} : vector<2x16x64xbf16>, vector<2x32x64xbf16>, vector<2x16x32xf32> -> vector<2x16x32xf32>
    "tpu.trace_stop"() : () -> ()
    %cst_13 = arith.constant 1.250000e-01 : f32
    %22 = vector.broadcast %cst_13 : f32 to vector<2x16x32xf32>
    %23 = arith.mulf %21, %22 : vector<2x16x32xf32>
    %c0_14 = arith.constant 0 : index
    %c0_15 = arith.constant 0 : index
    %c0_16 = arith.constant 0 : index
    %24 = vector.load %arg3[%c0_14, %c0_15, %c0_16] : memref<1x1x32xf32, #tpu.memory_space<vmem>>, vector<1x1x32xf32>
    %25 = vector.shape_cast %24 : vector<1x1x32xf32> to vector<1x32xf32>
    %26 = vector.shape_cast %25 : vector<1x32xf32> to vector<1x1x32xf32>
    %27 = vector.broadcast %26 : vector<1x1x32xf32> to vector<2x16x32xf32>
    %28 = arith.addf %23, %27 : vector<2x16x32xf32>
    %cst_17 = arith.constant dense<0xFF800000> : vector<2x16xf32>
    %29 = vector.multi_reduction <maximumf>, %28, %cst_17 [2] : vector<2x16x32xf32> to vector<2x16xf32>
    %30 = vector.shape_cast %29 : vector<2x16xf32> to vector<2x16x1xf32>
    %31 = vector.broadcast %30 : vector<2x16x1xf32> to vector<2x16x32xf32>
    %32 = arith.subf %28, %31 : vector<2x16x32xf32>
    %33 = math.exp %32 : vector<2x16x32xf32>
    %cst_18 = arith.constant dense<0.000000e+00> : vector<2x16xf32>
    %34 = vector.multi_reduction <add>, %33, %cst_18 [2] : vector<2x16x32xf32> to vector<2x16xf32>
    %35 = vector.shape_cast %34 : vector<2x16xf32> to vector<2x16x1xf32>
    %36 = tpu.reciprocal %35 {approx = true} : vector<2x16x1xf32> -> vector<2x16x1xf32>
    %37 = vector.broadcast %36 : vector<2x16x1xf32> to vector<2x16x32xf32>
    %38 = arith.mulf %33, %37 : vector<2x16x32xf32>
    %39 = arith.truncf %38 : vector<2x16x32xf32> to vector<2x16x32xbf16>
    "tpu.trace_start"() <{level = 10 : i32, message = "hqk,hkd->hqd"}> : () -> ()
    %cst_19 = arith.constant dense<0.000000e+00> : vector<2x16x64xf32>
    %40 = tpu.matmul %39, %20, %cst_19 {dimension_numbers = #tpu.dot_dimension_numbers<[2], [1], [1], [2], [0, 0, 0, 1, 1, 2], [0], [0]>} : vector<2x16x32xbf16>, vector<2x32x64xbf16>, vector<2x16x64xf32> -> vector<2x16x64xf32>
    "tpu.trace_stop"() : () -> ()
    %41 = vector.extract_strided_slice %40 {offsets = [0, 0, 0], sizes = [1, 16, 64], strides = [1, 1, 1]} : vector<2x16x64xf32> to vector<1x16x64xf32>
    %42 = vector.shape_cast %41 : vector<1x16x64xf32> to vector<16x64xf32>
    %43 = arith.truncf %42 : vector<16x64xf32> to vector<16x64xbf16>
    %c0_20 = arith.constant 0 : index
    %c0_21 = arith.constant 0 : index
    %44 = vector.load %arg19[%c0_20, %c0_21] : memref<16x128xbf16, #tpu.memory_space<vmem>>, vector<16x64xbf16>
    tpu.vector_store %arg19[%c0_20, %c0_21], %43 {strides = array<i32>} : memref<16x128xbf16, #tpu.memory_space<vmem>>, vector<16x64xbf16>,
    %45 = vector.extract_strided_slice %40 {offsets = [1, 0, 0], sizes = [1, 16, 64], strides = [1, 1, 1]} : vector<2x16x64xf32> to vector<1x16x64xf32>
    %46 = vector.shape_cast %45 : vector<1x16x64xf32> to vector<16x64xf32>
    %47 = arith.truncf %46 : vector<16x64xf32> to vector<16x64xbf16>
    %c0_22 = arith.constant 0 : index
    %c64 = arith.constant 64 : index
    %48 = vector.load %arg19[%c0_22, %c64] : memref<16x128xbf16, #tpu.memory_space<vmem>>, vector<16x64xbf16>
    tpu.vector_store %arg19[%c0_22, %c64], %47 {strides = array<i32>} : memref<16x128xbf16, #tpu.memory_space<vmem>>, vector<16x64xbf16>,
    %c0_23 = arith.constant 0 : index
    %c0_24 = arith.constant 0 : index
    %49 = vector.load %arg19[%c0_23, %c0_24] : memref<16x128xbf16, #tpu.memory_space<vmem>>, vector<16x128xbf16>
    %c0_25 = arith.constant 0 : index
    %c0_26 = arith.constant 0 : index
    %50 = vector.load %arg6[%c0_25, %c0_26] : memref<128x128xbf16, #tpu.memory_space<vmem>>, vector<128x128xbf16>
    %cst_27 = arith.constant dense<0.000000e+00> : vector<16x128xf32>
    %51 = tpu.matmul %49, %50, %cst_27 {dimension_numbers = #tpu.dot_dimension_numbers<[1], [0], [0], [1], [0, 0, 1, 1], [], []>} : vector<16x128xbf16>, vector<128x128xbf16>, vector<16x128xf32> -> vector<16x128xf32>
    %c0_28 = arith.constant 0 : index
    %c0_29 = arith.constant 0 : index
    %52 = vector.load %arg7[%c0_28, %c0_29] : memref<1x128xf32, #tpu.memory_space<vmem>>, vector<1x128xf32>
    %53 = vector.broadcast %52 : vector<1x128xf32> to vector<16x128xf32>
    %54 = arith.addf %51, %53 : vector<16x128xf32>
    %55 = arith.extf %7 : vector<16x128xbf16> to vector<16x128xf32>
    %56 = arith.addf %55, %54 : vector<16x128xf32>
    %c0_30 = arith.constant 0 : index
    %c0_31 = arith.constant 0 : index
    %57 = vector.load %arg8[%c0_30, %c0_31] : memref<1x128xf32, #tpu.memory_space<vmem>>, vector<1x128xf32>
    %c0_32 = arith.constant 0 : index
    %c0_33 = arith.constant 0 : index
    %58 = vector.load %arg9[%c0_32, %c0_33] : memref<1x128xf32, #tpu.memory_space<vmem>>, vector<1x128xf32>
    %cst_34 = arith.constant dense<0.000000e+00> : vector<16xf32>
    %59 = vector.multi_reduction <add>, %56, %cst_34 [1] : vector<16x128xf32> to vector<16xf32>
    %60 = vector.shape_cast %59 : vector<16xf32> to vector<16x1xf32>
    %cst_35 = arith.constant 1.280000e+02 : f32
    %61 = vector.broadcast %cst_35 : f32 to vector<16x1xf32>
    %62 = arith.divf %60, %61 : vector<16x1xf32>
    %63 = vector.broadcast %62 : vector<16x1xf32> to vector<16x128xf32>
    %64 = arith.subf %56, %63 : vector<16x128xf32>
    %65 = arith.mulf %64, %64 : vector<16x128xf32>
    %cst_36 = arith.constant dense<0.000000e+00> : vector<16xf32>
    %66 = vector.multi_reduction <add>, %65, %cst_36 [1] : vector<16x128xf32> to vector<16xf32>
    %67 = vector.shape_cast %66 : vector<16xf32> to vector<16x1xf32>
    %cst_37 = arith.constant 1.280000e+02 : f32
    %68 = vector.broadcast %cst_37 : f32 to vector<16x1xf32>
    %69 = arith.divf %67, %68 : vector<16x1xf32>
    %70 = vector.broadcast %62 : vector<16x1xf32> to vector<16x128xf32>
    %71 = arith.subf %56, %70 : vector<16x128xf32>
    %cst_38 = arith.constant 9.99999974E-6 : f32
    %72 = vector.broadcast %cst_38 : f32 to vector<16x1xf32>
    %73 = arith.addf %69, %72 : vector<16x1xf32>
    %74 = math.rsqrt %73 : vector<16x1xf32>
    %75 = vector.broadcast %74 : vector<16x1xf32> to vector<16x128xf32>
    %76 = arith.mulf %71, %75 : vector<16x128xf32>
    %77 = vector.broadcast %57 : vector<1x128xf32> to vector<16x128xf32>
    %78 = arith.mulf %76, %77 : vector<16x128xf32>
    %79 = vector.broadcast %58 : vector<1x128xf32> to vector<16x128xf32>
    %80 = arith.addf %78, %79 : vector<16x128xf32>
    %81 = arith.truncf %80 : vector<16x128xf32> to vector<16x128xbf16>
    %c0_39 = arith.constant 0 : index
    %c0_40 = arith.constant 0 : index
    %82 = vector.load %arg10[%c0_39, %c0_40] : memref<128x256xbf16, #tpu.memory_space<vmem>>, vector<128x256xbf16>
    %cst_41 = arith.constant dense<0.000000e+00> : vector<16x256xf32>
    %83 = tpu.matmul %81, %82, %cst_41 {dimension_numbers = #tpu.dot_dimension_numbers<[1], [0], [0], [1], [0, 0, 1, 1], [], []>} : vector<16x128xbf16>, vector<128x256xbf16>, vector<16x256xf32> -> vector<16x256xf32>
    %c0_42 = arith.constant 0 : index
    %c0_43 = arith.constant 0 : index
    %84 = vector.load %arg11[%c0_42, %c0_43] : memref<1x256xf32, #tpu.memory_space<vmem>>, vector<1x256xf32>
    %85 = vector.broadcast %84 : vector<1x256xf32> to vector<16x256xf32>
    %86 = arith.addf %83, %85 : vector<16x256xf32>
    %87 = arith.mulf %86, %86 : vector<16x256xf32>
    %88 = arith.mulf %86, %87 : vector<16x256xf32>
    %cst_44 = arith.constant 4.471500e-02 : f32
    %89 = vector.broadcast %cst_44 : f32 to vector<16x256xf32>
    %90 = arith.mulf %89, %88 : vector<16x256xf32>
    %91 = arith.addf %86, %90 : vector<16x256xf32>
    %cst_45 = arith.constant 0.797884583 : f32
    %92 = vector.broadcast %cst_45 : f32 to vector<16x256xf32>
    %93 = arith.mulf %92, %91 : vector<16x256xf32>
    %94 = math.tanh %93 : vector<16x256xf32>
    %cst_46 = arith.constant 1.000000e+00 : f32
    %95 = vector.broadcast %cst_46 : f32 to vector<16x256xf32>
    %96 = arith.addf %95, %94 : vector<16x256xf32>
    %cst_47 = arith.constant 5.000000e-01 : f32
    %97 = vector.broadcast %cst_47 : f32 to vector<16x256xf32>
    %98 = arith.mulf %97, %96 : vector<16x256xf32>
    %99 = arith.mulf %86, %98 : vector<16x256xf32>
    %100 = arith.truncf %99 : vector<16x256xf32> to vector<16x256xbf16>
    %c0_48 = arith.constant 0 : index
    %c0_49 = arith.constant 0 : index
    %101 = vector.load %arg12[%c0_48, %c0_49] : memref<256x128xbf16, #tpu.memory_space<vmem>>, vector<256x128xbf16>
    %cst_50 = arith.constant dense<0.000000e+00> : vector<16x128xf32>
    %102 = tpu.matmul %100, %101, %cst_50 {dimension_numbers = #tpu.dot_dimension_numbers<[1], [0], [0], [1], [0, 0, 1, 1], [], []>} : vector<16x256xbf16>, vector<256x128xbf16>, vector<16x128xf32> -> vector<16x128xf32>
    %c0_51 = arith.constant 0 : index
    %c0_52 = arith.constant 0 : index
    %103 = vector.load %arg13[%c0_51, %c0_52] : memref<1x128xf32, #tpu.memory_space<vmem>>, vector<1x128xf32>
    %104 = vector.broadcast %103 : vector<1x128xf32> to vector<16x128xf32>
    %105 = arith.addf %102, %104 : vector<16x128xf32>
    %106 = arith.addf %80, %105 : vector<16x128xf32>
    %c0_53 = arith.constant 0 : index
    %c0_54 = arith.constant 0 : index
    %107 = vector.load %arg14[%c0_53, %c0_54] : memref<1x128xf32, #tpu.memory_space<vmem>>, vector<1x128xf32>
    %c0_55 = arith.constant 0 : index
    %c0_56 = arith.constant 0 : index
    %108 = vector.load %arg15[%c0_55, %c0_56] : memref<1x128xf32, #tpu.memory_space<vmem>>, vector<1x128xf32>
    %cst_57 = arith.constant dense<0.000000e+00> : vector<16xf32>
    %109 = vector.multi_reduction <add>, %106, %cst_57 [1] : vector<16x128xf32> to vector<16xf32>
    %110 = vector.shape_cast %109 : vector<16xf32> to vector<16x1xf32>
    %cst_58 = arith.constant 1.280000e+02 : f32
    %111 = vector.broadcast %cst_58 : f32 to vector<16x1xf32>
    %112 = arith.divf %110, %111 : vector<16x1xf32>
    %113 = vector.broadcast %112 : vector<16x1xf32> to vector<16x128xf32>
    %114 = arith.subf %106, %113 : vector<16x128xf32>
    %115 = arith.mulf %114, %114 : vector<16x128xf32>
    %cst_59 = arith.constant dense<0.000000e+00> : vector<16xf32>
    %116 = vector.multi_reduction <add>, %115, %cst_59 [1] : vector<16x128xf32> to vector<16xf32>
    %117 = vector.shape_cast %116 : vector<16xf32> to vector<16x1xf32>
    %cst_60 = arith.constant 1.280000e+02 : f32
    %118 = vector.broadcast %cst_60 : f32 to vector<16x1xf32>
    %119 = arith.divf %117, %118 : vector<16x1xf32>
    %120 = vector.broadcast %112 : vector<16x1xf32> to vector<16x128xf32>
    %121 = arith.subf %106, %120 : vector<16x128xf32>
    %cst_61 = arith.constant 9.99999974E-6 : f32
    %122 = vector.broadcast %cst_61 : f32 to vector<16x1xf32>
    %123 = arith.addf %119, %122 : vector<16x1xf32>
    %124 = math.rsqrt %123 : vector<16x1xf32>
    %125 = vector.broadcast %124 : vector<16x1xf32> to vector<16x128xf32>
    %126 = arith.mulf %121, %125 : vector<16x128xf32>
    %127 = vector.broadcast %107 : vector<1x128xf32> to vector<16x128xf32>
    %128 = arith.mulf %126, %127 : vector<16x128xf32>
    %129 = vector.broadcast %108 : vector<1x128xf32> to vector<16x128xf32>
    %130 = arith.addf %128, %129 : vector<16x128xf32>
    %131 = arith.truncf %130 : vector<16x128xf32> to vector<16x128xbf16>
    %c0_62 = arith.constant 0 : index
    %c0_63 = arith.constant 0 : index
    %c0_64 = arith.constant 0 : index
    %132 = vector.load %arg16[%c0_62, %c0_63, %c0_64] : memref<1x16x128xbf16, #tpu.memory_space<vmem>>, vector<1x16x128xbf16>
    %133 = vector.shape_cast %132 : vector<1x16x128xbf16> to vector<16x128xbf16>
    %134 = vector.shape_cast %131 : vector<16x128xbf16> to vector<1x16x128xbf16>
    tpu.vector_store %arg16[%c0_62, %c0_63, %c0_64], %134 {strides = array<i32>} : memref<1x16x128xbf16, #tpu.memory_space<vmem>>, vector<1x16x128xbf16>,
    return
  }
  func.func @transform_0(%arg0: i32, %arg1: i32) -> (i32, i32, i32) {
    %c0_i32 = arith.constant 0 : i32
    %c0_i32_0 = arith.constant 0 : i32
    %c0_i32_1 = arith.constant 0 : i32
    return %arg0, %c0_i32, %c0_i32_0 : i32, i32, i32
  }
  func.func @transform_1(%arg0: i32, %arg1: i32) -> (i32, i32, i32) {
    %c0_i32 = arith.constant 0 : i32
    %c0_i32_0 = arith.constant 0 : i32
    %c0_i32_1 = arith.constant 0 : i32
    return %arg0, %c0_i32, %c0_i32_0 : i32, i32, i32
  }
  func.func @transform_2(%arg0: i32, %arg1: i32) -> (i32, i32) {
    %c0_i32 = arith.constant 0 : i32
    %c0_i32_0 = arith.constant 0 : i32
    %c0_i32_1 = arith.constant 0 : i32
    return %c0_i32, %c0_i32_0 : i32, i32
  }
  func.func @transform_3(%arg0: i32, %arg1: i32) -> (i32, i32) {
    %c0_i32 = arith.constant 0 : i32
    %c0_i32_0 = arith.constant 0 : i32
    %c0_i32_1 = arith.constant 0 : i32
    return %c0_i32, %c0_i32_0 : i32, i32
  }
  func.func @transform_4(%arg0: i32, %arg1: i32) -> (i32, i32) {
    %c0_i32 = arith.constant 0 : i32
    %c0_i32_0 = arith.constant 0 : i32
    %c0_i32_1 = arith.constant 0 : i32
    return %c0_i32, %c0_i32_0 : i32, i32
  }
  func.func @transform_5(%arg0: i32, %arg1: i32) -> (i32, i32) {
    %c0_i32 = arith.constant 0 : i32
    %c0_i32_0 = arith.constant 0 : i32
    %c0_i32_1 = arith.constant 0 : i32
    return %c0_i32, %c0_i32_0 : i32, i32
  }
  func.func @transform_6(%arg0: i32, %arg1: i32) -> (i32, i32) {
    %c0_i32 = arith.constant 0 : i32
    %c0_i32_0 = arith.constant 0 : i32
    %c0_i32_1 = arith.constant 0 : i32
    return %c0_i32, %c0_i32_0 : i32, i32
  }
  func.func @transform_7(%arg0: i32, %arg1: i32) -> (i32, i32) {
    %c0_i32 = arith.constant 0 : i32
    %c0_i32_0 = arith.constant 0 : i32
    %c0_i32_1 = arith.constant 0 : i32
    return %c0_i32, %c0_i32_0 : i32, i32
  }
  func.func @transform_8(%arg0: i32, %arg1: i32) -> (i32, i32) {
    %c0_i32 = arith.constant 0 : i32
    %c0_i32_0 = arith.constant 0 : i32
    %c0_i32_1 = arith.constant 0 : i32
    return %c0_i32, %c0_i32_0 : i32, i32
  }
  func.func @transform_9(%arg0: i32, %arg1: i32) -> (i32, i32) {
    %c0_i32 = arith.constant 0 : i32
    %c0_i32_0 = arith.constant 0 : i32
    %c0_i32_1 = arith.constant 0 : i32
    return %c0_i32, %c0_i32_0 : i32, i32
  }
  func.func @transform_10(%arg0: i32, %arg1: i32) -> (i32, i32) {
    %c0_i32 = arith.constant 0 : i32
    %c0_i32_0 = arith.constant 0 : i32
    %c0_i32_1 = arith.constant 0 : i32
    return %c0_i32, %c0_i32_0 : i32, i32
  }
  func.func @transform_11(%arg0: i32, %arg1: i32) -> (i32, i32) {
    %c0_i32 = arith.constant 0 : i32
    %c0_i32_0 = arith.constant 0 : i32
    %c0_i32_1 = arith.constant 0 : i32
    return %c0_i32, %c0_i32_0 : i32, i32
  }
  func.func @transform_12(%arg0: i32, %arg1: i32) -> (i32, i32) {
    %c0_i32 = arith.constant 0 : i32
    %c0_i32_0 = arith.constant 0 : i32
    %c0_i32_1 = arith.constant 0 : i32
    return %c0_i32, %c0_i32_0 : i32, i32
  }
  func.func @transform_13(%arg0: i32, %arg1: i32) -> (i32, i32) {
    %c0_i32 = arith.constant 0 : i32
    %c0_i32_0 = arith.constant 0 : i32
    %c0_i32_1 = arith.constant 0 : i32
    return %c0_i32, %c0_i32_0 : i32, i32
  }
  func.func @transform_14(%arg0: i32, %arg1: i32) -> (i32, i32, i32) {
    %c0_i32 = arith.constant 0 : i32
    %c0_i32_0 = arith.constant 0 : i32
    return %arg0, %arg1, %c0_i32 : i32, i32, i32
  }
}

module attributes {stable_mosaic.version = 11 : i64} {
  func.func @_embed_ln_kernel(%arg0: i32, %arg1: memref<1x32x128xf32, #tpu.memory_space<vmem>>, %arg2: memref<1x32x128xf32, #tpu.memory_space<vmem>>, %arg3: memref<1x128xf32, #tpu.memory_space<vmem>>, %arg4: memref<1x128xf32, #tpu.memory_space<vmem>>, %arg5: memref<1x32x128xbf16, #tpu.memory_space<vmem>>) attributes {dimension_semantics = [#tpu.dimension_semantics<parallel>], iteration_bounds = array<i64: 2>, scalar_prefetch = 0 : i64, scratch_operands = 0 : i64, tpu.core_type = #tpu.core_type<tc>, window_params = [{transform_indices = @transform_0, window_bounds = array<i64: 1, 32, 128>}, {pipeline_mode = #tpu.pipeline_mode<synchronous>, transform_indices = @transform_1, window_bounds = array<i64: 1, 32, 128>}, {pipeline_mode = #tpu.pipeline_mode<synchronous>, transform_indices = @transform_2, window_bounds = array<i64: 1, 128>}, {pipeline_mode = #tpu.pipeline_mode<synchronous>, transform_indices = @transform_3, window_bounds = array<i64: 1, 128>}, {transform_indices = @transform_4, window_bounds = array<i64: 1, 32, 128>}]} {
    %c0 = arith.constant 0 : index
    %c0_0 = arith.constant 0 : index
    %c0_1 = arith.constant 0 : index
    %0 = vector.load %arg1[%c0, %c0_0, %c0_1] : memref<1x32x128xf32, #tpu.memory_space<vmem>>, vector<1x32x128xf32>
    %1 = vector.shape_cast %0 : vector<1x32x128xf32> to vector<32x128xf32>
    %c0_2 = arith.constant 0 : index
    %c0_3 = arith.constant 0 : index
    %c0_4 = arith.constant 0 : index
    %2 = vector.load %arg2[%c0_2, %c0_3, %c0_4] : memref<1x32x128xf32, #tpu.memory_space<vmem>>, vector<1x32x128xf32>
    %3 = vector.shape_cast %2 : vector<1x32x128xf32> to vector<32x128xf32>
    %4 = arith.addf %1, %3 : vector<32x128xf32>
    %c0_5 = arith.constant 0 : index
    %c0_6 = arith.constant 0 : index
    %5 = vector.load %arg3[%c0_5, %c0_6] : memref<1x128xf32, #tpu.memory_space<vmem>>, vector<1x128xf32>
    %c0_7 = arith.constant 0 : index
    %c0_8 = arith.constant 0 : index
    %6 = vector.load %arg4[%c0_7, %c0_8] : memref<1x128xf32, #tpu.memory_space<vmem>>, vector<1x128xf32>
    %cst = arith.constant dense<0.000000e+00> : vector<32xf32>
    %7 = vector.multi_reduction <add>, %4, %cst [1] : vector<32x128xf32> to vector<32xf32>
    %8 = vector.shape_cast %7 : vector<32xf32> to vector<32x1xf32>
    %cst_9 = arith.constant 1.280000e+02 : f32
    %9 = vector.broadcast %cst_9 : f32 to vector<32x1xf32>
    %10 = arith.divf %8, %9 : vector<32x1xf32>
    %11 = vector.broadcast %10 : vector<32x1xf32> to vector<32x128xf32>
    %12 = arith.subf %4, %11 : vector<32x128xf32>
    %13 = arith.mulf %12, %12 : vector<32x128xf32>
    %cst_10 = arith.constant dense<0.000000e+00> : vector<32xf32>
    %14 = vector.multi_reduction <add>, %13, %cst_10 [1] : vector<32x128xf32> to vector<32xf32>
    %15 = vector.shape_cast %14 : vector<32xf32> to vector<32x1xf32>
    %cst_11 = arith.constant 1.280000e+02 : f32
    %16 = vector.broadcast %cst_11 : f32 to vector<32x1xf32>
    %17 = arith.divf %15, %16 : vector<32x1xf32>
    %18 = vector.broadcast %10 : vector<32x1xf32> to vector<32x128xf32>
    %19 = arith.subf %4, %18 : vector<32x128xf32>
    %cst_12 = arith.constant 9.99999974E-6 : f32
    %20 = vector.broadcast %cst_12 : f32 to vector<32x1xf32>
    %21 = arith.addf %17, %20 : vector<32x1xf32>
    %22 = math.rsqrt %21 : vector<32x1xf32>
    %23 = vector.broadcast %22 : vector<32x1xf32> to vector<32x128xf32>
    %24 = arith.mulf %19, %23 : vector<32x128xf32>
    %25 = vector.broadcast %5 : vector<1x128xf32> to vector<32x128xf32>
    %26 = arith.mulf %24, %25 : vector<32x128xf32>
    %27 = vector.broadcast %6 : vector<1x128xf32> to vector<32x128xf32>
    %28 = arith.addf %26, %27 : vector<32x128xf32>
    %29 = arith.truncf %28 : vector<32x128xf32> to vector<32x128xbf16>
    %c0_13 = arith.constant 0 : index
    %c0_14 = arith.constant 0 : index
    %c0_15 = arith.constant 0 : index
    %30 = vector.load %arg5[%c0_13, %c0_14, %c0_15] : memref<1x32x128xbf16, #tpu.memory_space<vmem>>, vector<1x32x128xbf16>
    %31 = vector.shape_cast %30 : vector<1x32x128xbf16> to vector<32x128xbf16>
    %32 = vector.shape_cast %29 : vector<32x128xbf16> to vector<1x32x128xbf16>
    tpu.vector_store %arg5[%c0_13, %c0_14, %c0_15], %32 {strides = array<i32>} : memref<1x32x128xbf16, #tpu.memory_space<vmem>>, vector<1x32x128xbf16>,
    return
  }
  func.func @transform_0(%arg0: i32) -> (i32, i32, i32) {
    %c0_i32 = arith.constant 0 : i32
    %c0_i32_0 = arith.constant 0 : i32
    %c0_i32_1 = arith.constant 0 : i32
    return %arg0, %c0_i32, %c0_i32_0 : i32, i32, i32
  }
  func.func @transform_1(%arg0: i32) -> (i32, i32, i32) {
    %c0_i32 = arith.constant 0 : i32
    %c0_i32_0 = arith.constant 0 : i32
    %c0_i32_1 = arith.constant 0 : i32
    %c0_i32_2 = arith.constant 0 : i32
    return %c0_i32, %c0_i32_0, %c0_i32_1 : i32, i32, i32
  }
  func.func @transform_2(%arg0: i32) -> (i32, i32) {
    %c0_i32 = arith.constant 0 : i32
    %c0_i32_0 = arith.constant 0 : i32
    %c0_i32_1 = arith.constant 0 : i32
    return %c0_i32, %c0_i32_0 : i32, i32
  }
  func.func @transform_3(%arg0: i32) -> (i32, i32) {
    %c0_i32 = arith.constant 0 : i32
    %c0_i32_0 = arith.constant 0 : i32
    %c0_i32_1 = arith.constant 0 : i32
    return %c0_i32, %c0_i32_0 : i32, i32
  }
  func.func @transform_4(%arg0: i32) -> (i32, i32, i32) {
    %c0_i32 = arith.constant 0 : i32
    %c0_i32_0 = arith.constant 0 : i32
    %c0_i32_1 = arith.constant 0 : i32
    return %arg0, %c0_i32, %c0_i32_0 : i32, i32, i32
  }
}

</mosaic_0001>

<bundles_post_ra>
// kernel: barlow_twins_forward.4
= control target key start
LH: loop header
LB: loop body
LE: loop exit
PB: predicated region body
PF: predicated region fallthrough
CT: control target
= control target key end

     0   :  { %s435_s15 = smov 0   ;;  %s474_s0 = inlined_call_operand.vmem [shape: f32[2,32,128], index: 0, kind: input, shape index: {}]   ;;  %s475_s1 = inlined_call_operand.vmem [shape: f32[1,32,128], index: 1, kind: input, shape index: {}]   ;;  %s476_s2 = inlined_call_operand.vmem [shape: f32[1,128], index: 2, kind: input, shape index: {}]   ;;  %s477_s3 = inlined_call_operand.vmem [shape: f32[1,128], index: 3, kind: input, shape index: {}]   ;;  %s478_s4 = inlined_call_operand.vmem [shape: bf16[2,32,128], index: 4, kind: output, shape index: {}]  }
   0x1 LB: > { %s352_s16 = sadd.s32 4294967295, %s408_s15   ;;  %p356_p0 = scmp.ge.s32.totalorder %s408_s15, 1  ;;  %s408_s15 = sphi %s435_s15, %s14_s15  }
   0x2   : > { %p162_p1 = scmp.lt.s32.totalorder %s408_s15, 3 }
   0x4   : > { %p163_p2 = pnand %p356_p0, %p162_p1 }
   0x5   : > { %p188_p3 = scmp.lt.s32.totalorder (!%p163_p2), %s352_s16, 1 }
   0x6   : > { %166 = sbr.rel (%p163_p2) target bundleno = 334 (0x14e), region = 36 }
   0xb   : > { %s480_s16 = smov (!%p188_p3, %s352_s16), 1  ;;  %v202_v0 = vld [vmem:[%s475_s1] sm:$0xff]  ;;  %v204_v1 = vld [vmem:[%s475_s1 + $0x10] sm:$0xff]  ;;  %v203_v2 = vld [vmem:[%s475_s1 + $0x8] sm:$0xff] }
   0xc   : > { %s369_s17 = sshll.u32 %s480_s16, 5  ;;  %v205_v3 = vld [vmem:[%s475_s1 + $0x18] sm:$0xff]  ;;  %v361_v42 = vld [vmem:[%s476_s2] ss:$0 sm:$0xff]  ;;  %s370_s7 = sshll.u32 %s480_s16, 4 }
   0xd   : > { %s192_s24 = scalar_lea.vmem %s474_s0, %s369_s17  ;;  %v362_v47 = vld [vmem:[%s477_s3] ss:$0 sm:$0xff]  ;;  %s197_s10 = scalar_lea.vmem %s478_s4, %s370_s7 }
   0xe   : > { %v198_v4 = vld [vmem:[%s192_s24] sm:$0xff]  ;;  %v200_v5 = vld [vmem:[%s192_s24 + $0x10] sm:$0xff]  ;;  %v199_v6 = vld [vmem:[%s192_s24 + $0x8] sm:$0xff] }
   0xf   : > { %v206_v7 = vadd.f32 %v202_v0, %v198_v4  ;;  %v208_v8 = vadd.f32 %v204_v1, %v200_v5  ;;  %v201_v9 = vld [vmem:[%s192_s24 + $0x18] sm:$0xff]  ;;  %v207_v10 = vadd.f32 %v203_v2, %v199_v6 }
  0x10   : > { %v209_v11 = vadd.f32 %v205_v3, %v201_v9 }
  0x11   : > { %212 = vadd.xlane.f32.xlu0 %v206_v7  ;;  %216 = vadd.xlane.f32.xlu1 %v208_v8 }
  0x15   : > { %214 = vadd.xlane.f32.xlu0 %v207_v10  ;;  %218 = vadd.xlane.f32.xlu1 %v209_v11 }
  0x9a   : > { %v213_v12 = vpop.xlane.xlu0 %212  ;;  %v217_v13 = vpop.xlane.xlu1 %216 }
  0x9b   : > { %v221_v14 = vmul.f32 0.0078125, %v213_v12  ;;  %v223_v15 = vmul.f32 0.0078125, %v217_v13 }
  0x9d   : > { %v225_v16 = vsub.f32 %v206_v7, %v221_v14  ;;  %v227_v17 = vsub.f32 %v208_v8, %v223_v15 }
  0x9e   : > { %v215_v18 = vpop.xlane.xlu0 %214  ;;  %v219_v19 = vpop.xlane.xlu1 %218 }
  0x9f   : > { %v222_v20 = vmul.f32 0.0078125, %v215_v18  ;;  %v229_v21 = vmul.f32 %v225_v16, %v225_v16  ;;  %v224_v22 = vmul.f32 0.0078125, %v219_v19  ;;  %v231_v25 = vmul.f32 %v227_v17, %v227_v17 }
  0xa1   : > { %v226_v23 = vsub.f32 %v207_v10, %v222_v20  ;;  %233 = vadd.xlane.f32.xlu0 %v229_v21  ;;  %v228_v24 = vsub.f32 %v209_v11, %v224_v22 }
  0xa3   : > { %v230_v26 = vmul.f32 %v226_v23, %v226_v23  ;;  %v232_v27 = vmul.f32 %v228_v24, %v228_v24 }
  0xa5   : > { %237 = vadd.xlane.f32.xlu0 %v231_v25  ;;  %235 = vadd.xlane.f32.xlu1 %v230_v26 }
  0xa9   : > { %239 = vadd.xlane.f32.xlu1 %v232_v27 }
 0x12a   : > { %v234_v28 = vpop.xlane.xlu0 %233 }
 0x12b   : > { %v241_v29 = vmul.f32 0.0078125, %v234_v28 }
 0x12d   : > { %v245_v30 = vadd.f32 1e-05, %v241_v29 }
 0x12e   : > { %v236_v31 = vpop.xlane.xlu1 %235  ;;  %v238_v32 = vpop.xlane.xlu0 %237 }
 0x12f   : > { %394 = vrsqrt.f32 %v245_v30  ;;  %v242_v33 = vmul.f32 0.0078125, %v236_v31  ;;  %v243_v34 = vmul.f32 0.0078125, %v238_v32 }
 0x131   : > { %v246_v35 = vadd.f32 1e-05, %v242_v33  ;;  %v247_v36 = vadd.f32 1e-05, %v243_v34 }
 0x132   : > { %v240_v37 = vpop.xlane.xlu1 %239 }
 0x133   : > { %396 = vrsqrt.f32 %v246_v35  ;;  %v244_v38 = vmul.f32 0.0078125, %v240_v37 }
 0x134   : > { %398 = vrsqrt.f32 %v247_v36 }
 0x135   : > { %v248_v39 = vadd.f32 1e-05, %v244_v38 }
 0x137   : > { %400 = vrsqrt.f32 %v248_v39 }
 0x13c   : > { %v395_v40 = vpop.eup %394 }
 0x13d   : > { %v253_v41 = vmul.f32 %v395_v40, %v225_v16 }
 0x13f   : > { %v263_v45 = vmul.f32 %v361_v42, %v253_v41 }
 0x140   : > { %v397_v43 = vpop.eup %396 }
 0x141   : > { %v399_v44 = vpop.eup %398  ;;  %v254_v46 = vmul.f32 %v397_v43, %v226_v23  ;;  %v273_v51 = vadd.f32 %v362_v47, %v263_v45 }
 0x142   : > { %v255_v48 = vmul.f32 %v399_v44, %v227_v17 }
 0x143   : > { %v264_v49 = vmul.f32 %v361_v42, %v254_v46 }
 0x144   : > { %v401_v50 = vpop.eup %400  ;;  %v265_v53 = vmul.f32 %v361_v42, %v255_v48 }
 0x145   : > { %v274_v52 = vadd.f32 %v362_v47, %v264_v49  ;;  %v256_v54 = vmul.f32 %v401_v50, %v228_v24 }
 0x146   : > { %v275_v57 = vadd.f32 %v362_v47, %v265_v53 }
 0x147   : > { %v378_v55 = vpack.c.bf16 %v274_v52, %v273_v51  ;;  %v266_v56 = vmul.f32 %v361_v42, %v256_v54 }
 0x149   : > { %379 = vst [vmem:[%s197_s10] sm:$0xff] %v378_v55   ;;  %v276_v58 = vadd.f32 %v362_v47, %v266_v56 }
 0x14b   : > { %v383_v59 = vpack.c.bf16 %v276_v58, %v275_v57 }
 0x14d   : > { %385 = vst [vmem:[%s197_s10 + $0x8] sm:$0xff] %v383_v59  }
 0x14e PF: > { %s14_s15 = sadd.s32 1, %s408_s15  }
 0x14f   : > { %p11_p4 = scmp.ge.s32.totalorder %s14_s15, 4  }
 0x151   :  { %13 = sbr.rel (!%p11_p4) target bundleno = 1 (0x1), region = 66 }

// kernel: barlow_twins_forward.7
= control target key start
LH: loop header
LB: loop body
LE: loop exit
PB: predicated region body
PF: predicated region fallthrough
CT: control target
= control target key end

     0   :  { %7 = vsyncpa [#allocation3], 0  ;;  %s565_s0 = inlined_call_operand.vmem [shape: bf16[2,32,128], index: 0, kind: input, shape index: {}]   ;;  %s566_s1 = inlined_call_operand.vmem [shape: f32[2,32,1], index: 1, kind: input, shape index: {}]   ;;  %s567_s2 = inlined_call_operand.hbm [shape: f32[2,1,128], index: 2, kind: output, shape index: {}]  }
   0x1   :  { %9 = vsyncpa [#allocation3 + $0x1], 0  ;;  %s471_s9 = smov 0   ;;  %s473_s10 = smov 0  }
   0x2   :  { %s475_s11 = smov 0   ;;  %s477_s12 = smov 0  }
   0x3 LB: > { %s492_s13 = sadd.s32 4294967295, %s452_s12   ;;  %s322_s14 = sadd.s32 4294967294, %s452_s12   ;;  %s452_s12 = sphi %s477_s12, %s573_s12   ;;  %s448_s11 = sphi %s475_s11, %s572_s11   ;;  %s444_s10 = sphi %s473_s10, %s571_s10   ;;  %s440_s9 = sphi %s471_s9, %s570_s9  }
   0x4   : > { %s496_s15 = sadd.s32 1, %s452_s12   ;;  %s74_s16 = sadd.s32 1, %s448_s11 }
   0x5   : > { %s71_s17 = ssub.s32 %s452_s12, %s496_s15  ;;  %p84_p0 = scmp.ne.s32.totalorder %s448_s11, %s444_s10 }
   0x6   : > { %p72_p1 = scmp.eq.s32.totalorder %s71_s17, 0  ;;  %p85_p2 = scmp.eq.s32.totalorder %s492_s13, 1 }
   0x7   : > { %p90_p3 = scmp.ne.s32.totalorder %s444_s10, %s440_s9  ;;  %p91_p4 = scmp.eq.s32.totalorder %s322_s14, 1 }
   0x8   : > { %s507_s18 = scalar_select %p72_p1, %s448_s11, %s74_s16  }
   0x9   : > { %p509_p5 = por %p85_p2, %p84_p0  ;;  %p513_p6 = por %p91_p4, %p90_p3 }
   0xa   : > { %p325_p7 = scmp.ge.s32.totalorder %s452_s12, 1  ;;  %p125_p8 = scmp.lt.s32.totalorder %s452_s12, 3 }
   0xc   : > { %p126_p9 = pnand %p325_p7, %p125_p8 }
   0xd   : > { %p151_p10 = scmp.lt.s32.totalorder (!%p126_p9), %s492_s13, 1  ;;  %s149_s30 = sand.u32 (!%p126_p9), 1, %s444_s10  }
   0xe   : > { %129 = sbr.rel (%p126_p9) target bundleno = 374 (0x176), region = 28  ;;  %s330_s3 = sshll.u32 (!%p126_p9), %s492_s13, 4 }
   0xf   : > { %s150_s4 = scalar_lea.vmem (!%p126_p9), [#allocation2], %s149_s30  ;;  %s253_s8 = scalar_lea.hbm (!%p126_p9), %s567_s2, %s330_s3 }
  0x10   : > { %s255_s5 = sshll.u32 (!%p126_p9), %s150_s4, 4  ;;  %s243_s14 = scalar_lea.sflag (!%p126_p9), [#allocation3], %s149_s30  ;;  %s256_s5 = int_to_ptr.vmem [resolvable:$true] %s255_s5 }
  0x11   : > { %s392_s16 = scalar_lea.vmem (!%p126_p9), %s256_s5, 16  ;;  %s455_s17 = smov (!%p126_p9), [#allocation2]  }
  0x12   : > { %p393_p11 = scmp.ne.s32.totalorder (!%p126_p9), %s256_s5, %s392_s16 }
  0x13   : > { %v454_v0 = vmov 0   ;;  %s521_s21 = scalar_select %p151_p10, %s492_s13, 1  ;;  %vm206_vm0 = vcmask 7168  }
  0x14   : > { %384 = vset.pattern.permute.xlu0 %v454_v0  ;;  %385 = vset.pattern.permute.xlu1 %v454_v0  ;;  %p394_p12 = pnand %p393_p11, %p509_p5 }
  0x15   : > { %s334_s22 = sshll.u32 %s521_s21, 5  ;;  %s333_s26 = sshll.u32 %s521_s21, 4 }
  0x16   : > { %s160_s25 = scalar_lea.vmem %s566_s1, %s334_s22  ;;  %s155_s29 = scalar_lea.vmem %s565_s0, %s333_s26 }
  0x17   : > { %v169_v1 = vld [vmem:[%s160_s25] sm:$0xff]  ;;  %v171_v2 = vld [vmem:[%s160_s25 + $0x10] sm:$0xff]  ;;  %v170_v3 = vld [vmem:[%s160_s25 + $0x8] sm:$0xff]  ;;  %p395_p13 = pneg %p394_p12  ;;  %s396_s21 = sshll.u32 %s455_s17, 4  ;;  %s397_s21 = int_to_ptr.vmem [resolvable:$false] %s396_s21 }
  0x18   : > { %175 = vperm.xlu0 %384, %v169_v1   ;;  %v207_v4 = vsel %vm206_vm0, %v169_v1, 0.0  ;;  %185 = vperm.xlu1 %385, %v171_v2   ;;  %v210_v5 = vsel %vm206_vm0, %v171_v2, 0.0  ;;  %v208_v6 = vsel %vm206_vm0, %v170_v3, 0.0  ;;  %v172_v7 = vld [vmem:[%s160_s25 + $0x18] sm:$0xff]  ;;  %v336_v19 = vld [vmem:[%s155_s29] sm:$0xff]   ;;  %v343_v20 = vld [vmem:[%s155_s29 + $0x8] sm:$0xff]   ;;  %p399_p0 = scmp.lt.s32.totalorder %s256_s5, %s397_s21 }
  0x19   : > { %v209_v8 = vadd.f32 %v208_v6, %v207_v4  ;;  %v212_v9 = vsel %vm206_vm0, %v172_v7, 0.0  ;;  %v337_v21 = vunpack.c.l.bf16 %v336_v19  ;;  %v341_v24 = vunpack.c.l.bf16 %v343_v20  ;;  %s398_s13 = scalar_lea.vmem %s397_s21, 32 }
  0x1a   : > { %v338_v25 = vunpack.c.h.bf16 %v336_v19  ;;  %v342_v27 = vunpack.c.h.bf16 %v343_v20  ;;  %p400_p1 = scmp.lt.s32.totalorder %s398_s13, %s392_s16 }
  0x1b   : > { %v211_v10 = vadd.f32 %v210_v5, %v209_v8 }
  0x1c   : > { %180 = vperm.xlu0 %384, %v170_v3   ;;  %190 = vperm.xlu1 %385, %v172_v7   ;;  %p401_p2 = por %p400_p1, %p399_p0 }
  0x1d   : > { %v213_v11 = vadd.f32 %v212_v9, %v211_v10 }
  0x1e   : > { %p402_p3 = pnand %p401_p2, %p395_p13 }
  0x1f   : > { %v214_v12 = vrot.slane %v213_v11, 4 }
  0x21   : > { %v215_v13 = vadd.f32 %v214_v12, %v213_v11 }
  0x23   : > { %v216_v14 = vrot.slane %v215_v13, 2 }
  0x25   : > { %v217_v15 = vadd.f32 %v216_v14, %v215_v13 }
  0x27   : > { %v218_v16 = vrot.slane %v217_v15, 1 }
  0x29   : > { %v219_v17 = vadd.f32 %v218_v16, %v217_v15 }
  0x2b   : > { %v220_v18 = vmax.f32 %v219_v17, 1e-09 }
  0x2d   : > { %223 = vperm.xlu0 %384, %v220_v18  }
  0x93   : > { %v176_v22 = vpop.permute.xlu0 %175  ;;  %v186_v23 = vpop.permute.xlu1 %185 }
  0x94   : > { %v193_v26 = vmul.f32 %v337_v21, %v176_v22  ;;  %v195_v30 = vmul.f32 %v341_v24, %v186_v23 }
  0x97   : > { %v181_v28 = vpop.permute.xlu0 %180  ;;  %v191_v29 = vpop.permute.xlu1 %190 }
  0x98   : > { %v194_v31 = vmul.f32 %v338_v25, %v181_v28  ;;  %v196_v33 = vmul.f32 %v342_v27, %v191_v29 }
  0x9a   : > { %v197_v32 = vadd.f32 %v194_v31, %v193_v26 }
  0x9c   : > { %v198_v34 = vadd.f32 %v197_v32, %v195_v30 }
  0x9e   : > { %v199_v35 = vadd.f32 %v198_v34, %v196_v33 }
  0xa0   : > { %v200_v36 = vrot.slane %v199_v35, 4 }
  0xa2   : > { %v201_v37 = vadd.f32 %v200_v36, %v199_v35 }
  0xa4   : > { %v202_v39 = vrot.slane %v201_v37, 2 }
  0xa6   : > { %v203_v40 = vadd.f32 %v202_v39, %v201_v37 }
  0xa8   : > { %v224_v38 = vpop.permute.xlu0 %223  ;;  %v204_v41 = vrot.slane %v203_v40, 1 }
  0xa9   : > { %386 = vrcp.f32 %v224_v38 }
  0xaa   : > { %v205_v42 = vadd.f32 %v204_v41, %v203_v40 }
  0xb6   : > { %v387_v43 = vpop.eup %386 }
  0xb7   : > { %v227_v44 = vmul.f32 %v387_v43, %v205_v42 }
  0xb9   : > { %v228_v45 = vmul.f32 %v227_v44, %v227_v44 }
  0xbb   : > { %229 = vadd.xlane.f32.xlu1 %v228_v45 }
 0x144   : > { %v230_v46 = vpop.xlane.xlu1 %229 }
 0x145   : > { %388 = vrsqrt.f32 %v230_v46  ;;  %vm233_vm1 = vcmp.eq.f32.partialorder %v230_v46, inf  ;;  %v236_v49 = vand.u32 2147483648, %v230_v46  ;;  %vm235_vm2 = vcmp.eq.f32.partialorder %v230_v46, 0.0 }
 0x152   : > { %v389_v47 = vpop.eup %388 }
 0x153   : > { %v232_v48 = vmul.f32 %v389_v47, %v230_v46 }
 0x155   : > { %v234_v50 = vsel %vm233_vm1, %v230_v46, %v232_v48 }
 0x156   : > { %v237_v51 = vsel %vm235_vm2, %v236_v49, %v234_v50 }
 0x157   : > { %v238_v52 = vmax.f32 %v237_v51, 1e-12 }
 0x159   : > { %390 = vrcp.f32 %v238_v52 }
 0x166   : > { %v391_v53 = vpop.eup %390 }
 0x167   : > { %v240_v54 = vmul.f32 %v391_v53, %v227_v44 }
 0x169   : > { %241 = vst [vmem:[%s150_s4] sm:$0x1] %v240_v54 }
 0x16a   : > { %405 = shalt.err (!%p402_p3)
}
 0x16b   : > { %s406_s22 = scalar_lea.hbm %s253_s8, 16  ;;  %s410_s25 = scalar_lea.hbm %s567_s2, 32 }
 0x16c   : > { %p407_p4 = scmp.ne.s32.totalorder %s253_s8, %s406_s22  ;;  %p411_p9 = scmp.lt.s32.totalorder %s253_s8, %s567_s2 }
 0x16d   : > { %p412_p10 = scmp.lt.s32.totalorder %s410_s25, %s406_s22 }
 0x16e   : > { %p408_p7 = pnand %p407_p4, %p509_p5 }
 0x16f   : > { %p413_p11 = por %p412_p10, %p411_p9 }
 0x170   : > { %p409_p8 = pneg %p408_p7 }
 0x172   : > { %p414_p12 = pnand %p413_p11, %p409_p8 }
 0x174   : > { %417 = shalt.err (!%p414_p12)
}
 0x175   : > { %344 = dma.vmem_to_hbm [thread:$0]  (%p509_p5), %s256_s5, 16, %s253_s8, %s243_s14  }
 0x176 PF: > { %p350_p13 = scmp.ge.s32.totalorder %s452_s12, 2  ;;  %s267_s28 = sand.u32 1, %s440_s9  }
 0x177   : > { %s268_s29 = scalar_lea.sflag [#allocation3], %s267_s28 }
 0x178   : > { %p347_p0 = pnand %p350_p13, %p513_p6 }
 0x17a   : > { %p348_p1 = pneg %p347_p0 }
 0x17c   : > { %435 = dma.done.wait (%p348_p1), %s268_s29, 16  }
 0x17d   : > { %437 = vsyncadd (%p348_p1), %s268_s29, 4294967280  ;;  %p12_p2 = scmp.ge.s32.totalorder %s496_s15, 4   ;;  %s570_s9 = smov %s444_s10 }
 0x17e   : > { %s571_s10 = smov %s448_s11  ;;  %s572_s11 = smov %s507_s18 }
 0x17f   : > { %s573_s12 = smov %s496_s15  ;;  %14 = sbr.rel (!%p12_p2) target bundleno = 3 (0x3), region = 66 }
 0x184   :  { %272 = vsyncpa [#allocation3], 1 }
 0x185   :  { %274 = vsyncpa [#allocation3 + $0x1], 1 }

// kernel: barlow_twins_forward.5
= control target key start
LH: loop header
LB: loop body
LE: loop exit
PB: predicated region body
PF: predicated region fallthrough
CT: control target
= control target key end

     0   :  { %s2560_s29 = smov 0   ;;  %s2562_s30 = smov 0   ;;  %s2940_s0 = inlined_call_operand.vmem [shape: bf16[2,32,128], index: 0, kind: input, shape index: {}]   ;;  %s2941_s1 = inlined_call_operand.vmem [shape: f32[2,1,32], index: 1, kind: input, shape index: {}]   ;;  %s2942_s2 = inlined_call_operand.vmem [shape: bf16[128,384], index: 2, kind: input, shape index: {}]   ;;  %s2943_s3 = inlined_call_operand.vmem [shape: f32[1,384], index: 3, kind: input, shape index: {}]   ;;  %s2944_s4 = inlined_call_operand.vmem [shape: bf16[128,128], index: 4, kind: input, shape index: {}]   ;;  %s2945_s5 = inlined_call_operand.vmem [shape: f32[1,128], index: 5, kind: input, shape index: {}]   ;;  %s2946_s6 = inlined_call_operand.vmem [shape: f32[1,128], index: 6, kind: input, shape index: {}]   ;;  %s2947_s7 = inlined_call_operand.vmem [shape: f32[1,128], index: 7, kind: input, shape index: {}]   ;;  %s2948_s8 = inlined_call_operand.vmem [shape: bf16[128,256], index: 8, kind: input, shape index: {}]   ;;  %s2949_s9 = inlined_call_operand.vmem [shape: f32[1,256], index: 9, kind: input, shape index: {}]   ;;  %s2950_s10 = inlined_call_operand.vmem [shape: bf16[256,128], index: 10, kind: input, shape index: {}]   ;;  %s2951_s11 = inlined_call_operand.vmem [shape: f32[1,128], index: 11, kind: input, shape index: {}]   ;;  %s2952_s12 = inlined_call_operand.vmem [shape: f32[1,128], index: 12, kind: input, shape index: {}]   ;;  %s2953_s13 = inlined_call_operand.vmem [shape: f32[1,128], index: 13, kind: input, shape index: {}]   ;;  %s2954_s14 = inlined_call_operand.vmem [shape: bf16[2,32,128], index: 14, kind: output, shape index: {}]  }
   0x1   :  { %2958 = sst [smem:[#allocation10_spill]] %s2952_s12  ;;  %s2564_s15 = smov 0  }
   0x2   :  { %2959 = sst [smem:[#allocation11_spill]] %s2953_s13  ;;  %s2566_s16 = smov 0  }
   0x3   :  { %s2568_s17 = smov 0  }
   0x4 LB: > { %2960 = sst [smem:[#allocation5_spill]] %s2469_s15  ;;  %s33_s18 = sadd.s32 1, %s2469_s15  ;;  %s2477_s17 = sphi %s2568_s17, %s24_s17   ;;  %s2473_s16 = sphi %s2566_s16, %s2971_s16   ;;  %s2469_s15 = sphi %s2564_s15, %s2970_s15   ;;  %s2465_s30 = sphi %s2562_s30, %s2969_s30   ;;  %s2461_s29 = sphi %s2560_s29, %s2968_s29  }
   0x5   : > { %2961 = sst [smem:[#allocation6_spill]] %s2473_s16  ;;  %s36_s19 = sadd.s32 1, %s2473_s16 }
   0x6   : > { %2962 = sst [smem:[#allocation7_spill]] %s2477_s17  ;;  %p34_p0 = scmp.ge.s32.totalorder %s33_s18, 2 }
   0x7   : > { %p1954_p1 = scmp.ge.s32.totalorder %s2477_s17, 1  ;;  %p434_p2 = scmp.lt.s32.totalorder %s2477_s17, 5 }
   0x8   : > { %s2973_s18 = smov (%p34_p0, %s33_s18), 0  ;;  %s2975_s19 = smov (!%p34_p0, %s36_s19), %s2473_s16 }
   0x9   : > { %2963 = sst [smem:[#allocation8_spill]] %s2973_s18  ;;  %p435_p3 = pnand %p1954_p1, %p434_p2 }
   0xa   : > { %p38_p4 = scmp.ge.s32.totalorder %s2975_s19, 2  ;;  %p487_p5 = scmp.lt.s32.totalorder (!%p435_p3), %s2465_s30, 1 }
   0xb   : > { %438 = sbr.rel (%p435_p3) target bundleno = 2833 (0xb11), region = 76  ;;  %s1957_s20 = sshll.u32 (!%p435_p3), %s2461_s29, 1 }
   0xc   : > { %s2977_s19 = smov (%p38_p4, %s2975_s19), 0  ;;  %p498_p6 = scmp.lt.s32.totalorder (!%p435_p3), %s1957_s20, 3 }
   0xd   : > { %2964 = sst [smem:[#allocation9_spill]] %s2977_s19  ;;  %p1960_p7 = scmp.ne.s32.totalorder (!%p435_p3), %s2461_s29, 0 }
  0x10   : > { %s2979_s30 = smov (!%p487_p5, %s2465_s30), 1  ;;  %s2981_s20 = smov (!%p498_p6, %s1957_s20), 3 }
  0x11   : > { %s2075_s21 = sshll.u32 %s2979_s30, 4  ;;  %s494_s24 = scalar_lea.vmem %s2941_s1, %s2979_s30 }
  0x12   : > { %s2603_s27 = scalar_lea.vmem %s2940_s0, %s2075_s21  ;;  %s1958_s28 = sshll.u32 %s2979_s30, 2 }
  0x13   : > { %s501_s19 = sadd.s32 %s1958_s28, %s2981_s20  ;;  %509 = sbr.rel (%p1960_p7) target bundleno = 385 (0x181), region = 80 }
  0x14   : > { %s1959_s18 = sshll.u32 %s501_s19, 2  ;;  %s2480_s12 = smov (!%p1960_p7), 64  }
  0x15   : > { %s2609_s17 = scalar_lea.vmem %s2954_s14, %s1959_s18 }
  0x18   : > { %v2309_v0 = vld [vmem:[%s2942_s2 + $0xb0] ss:$12 sps:$4 sm:$0xff]   ;;  %v2311_v1 = vld [vmem:[%s2942_s2 + $0xac] ss:$12 sps:$4 sm:$0xff]   ;;  %v2479_v2 = vmov 0   ;;  %v2333_v17 = vld [vmem:[%s2603_s27] sm:$0xff]   ;;  %v532_v19 = vlaneseq }
  0x19   : > { %666 = vmatprep.mubr.bf16.mxu0 %v2479_v2  ;;  %676 = vmatprep.mubr.bf16.mxu1 %v2479_v2  ;;  %v2312_v3 = vld [vmem:[%s2942_s2 + $0x98] ss:$12 sps:$4 sm:$0xff]   ;;  %v2314_v4 = vld [vmem:[%s2942_s2 + $0x94] ss:$12 sps:$4 sm:$0xff]   ;;  %v2317_v6 = vld [vmem:[%s2942_s2 + $0x7c] ss:$12 sps:$4 sm:$0xff]  }
  0x1a   : > { %634 = vmatprep.subr.bf16.mxu0 %v2309_v0  ;;  %2227 = vmatprep.subr.bf16.mxu1 %v2309_v0  ;;  %v2315_v5 = vld [vmem:[%s2942_s2 + $0x80] ss:$12 sps:$4 sm:$0xff]   ;;  %v2318_v7 = vld [vmem:[%s2942_s2 + $0x68] ss:$12 sps:$4 sm:$0xff]   ;;  %v2320_v8 = vld [vmem:[%s2942_s2 + $0x64] ss:$12 sps:$4 sm:$0xff]  }
  0x1b   : > { %635 = vmatpush1.bf16.msra.mxu0 %v2311_v1  ;;  %2235 = vmatpush1.bf16.msra.mxu1 %v2311_v1  ;;  %v2321_v9 = vld [vmem:[%s2942_s2 + $0x50] ss:$12 sps:$4 sm:$0xff]   ;;  %v2323_v10 = vld [vmem:[%s2942_s2 + $0x4c] ss:$12 sps:$4 sm:$0xff]   ;;  %v2326_v12 = vld [vmem:[%s2942_s2 + $0x34] ss:$12 sps:$4 sm:$0xff]  }
  0x1c   : > { %636 = vmatprep.subr.bf16.mxu0 %v2312_v3  ;;  %2228 = vmatprep.subr.bf16.mxu1 %v2312_v3  ;;  %v2324_v11 = vld [vmem:[%s2942_s2 + $0x38] ss:$12 sps:$4 sm:$0xff]   ;;  %v2327_v13 = vld [vmem:[%s2942_s2 + $0x20] ss:$12 sps:$4 sm:$0xff]   ;;  %v2329_v14 = vld [vmem:[%s2942_s2 + $0x1c] ss:$12 sps:$4 sm:$0xff]  }
  0x1d   : > { %v2330_v15 = vld [vmem:[%s2942_s2 + $0x8] ss:$12 sps:$4 sm:$0xff]   ;;  %v2332_v16 = vld [vmem:[%s2942_s2 + $0x4] ss:$12 sps:$4 sm:$0xff]   ;;  %v533_v20 = vshrl.u32 %v532_v19, 7  ;;  %vm735_vm0 = vcmask 519168  }
  0x1e   : > { %v2334_v18 = vld [vmem:[%s2603_s27 + $0x8] sm:$0xff]   ;;  %v530_v22 = vld [vmem:[%s2943_s3 + $0x1] sm:$0x3] }
  0x1f   : > { %637 = vmatpush1.bf16.msra.mxu0 %v2314_v4  ;;  %2236 = vmatpush1.bf16.msra.mxu1 %v2314_v4  ;;  %v534_v21 = vsub.s32 0, %v533_v20  ;;  %v538_v23 = vsub.s32 1, %v533_v20 }
  0x20   : > { %638 = vmatprep.subr.bf16.mxu0 %v2315_v5  ;;  %2229 = vmatprep.subr.bf16.mxu1 %v2315_v5 }
  0x21   : > { %v535_v24 = vrot.slane %v530_v22, %v534_v21  ;;  %v539_v25 = vrot.slane %v530_v22, %v538_v23 }
  0x23   : > { %639 = vmatpush1.bf16.msra.mxu0 %v2317_v6  ;;  %2237 = vmatpush1.bf16.msra.mxu1 %v2317_v6 }
  0x24   : > { %640 = vmatprep.subr.bf16.mxu0 %v2318_v7  ;;  %2230 = vmatprep.subr.bf16.mxu1 %v2318_v7 }
  0x27   : > { %641 = vmatpush1.bf16.msra.mxu0 %v2320_v8  ;;  %2238 = vmatpush1.bf16.msra.mxu1 %v2320_v8 }
  0x28   : > { %642 = vmatprep.subr.bf16.mxu0 %v2321_v9  ;;  %2231 = vmatprep.subr.bf16.mxu1 %v2321_v9 }
  0x2b   : > { %643 = vmatpush1.bf16.msra.mxu0 %v2323_v10  ;;  %2239 = vmatpush1.bf16.msra.mxu1 %v2323_v10 }
  0x2c   : > { %644 = vmatprep.subr.bf16.mxu0 %v2324_v11  ;;  %2232 = vmatprep.subr.bf16.mxu1 %v2324_v11 }
  0x2f   : > { %645 = vmatpush1.bf16.msra.mxu0 %v2326_v12  ;;  %2240 = vmatpush1.bf16.msra.mxu1 %v2326_v12 }
  0x30   : > { %646 = vmatprep.subr.bf16.mxu0 %v2327_v13  ;;  %2233 = vmatprep.subr.bf16.mxu1 %v2327_v13 }
  0x33   : > { %647 = vmatpush1.bf16.msra.mxu0 %v2329_v14  ;;  %2241 = vmatpush1.bf16.msra.mxu1 %v2329_v14 }
  0x34   : > { %648 = vmatprep.subr.bf16.mxu0 %v2330_v15  ;;  %2234 = vmatprep.subr.bf16.mxu1 %v2330_v15 }
  0x37   : > { %649 = vmatpush1.bf16.msra.mxu0 %v2332_v16  ;;  %2242 = vmatpush1.bf16.msra.mxu1 %v2332_v16 }
  0x3a   : > { %667 = vmatmul.mubr.bf16.vlgmr.msra.gmra.mxu0 %v2333_v17  ;;  %677 = vmatmul.mubr.bf16.vlgmr.msra.gmra.mxu1 %v2334_v18 }
  0xfa   : > { %v668_v26 = vpop.f32.mrf.mxu0  ;;  %v678_v27 = vpop.f32.mrf.mxu1 }
  0xfb   : > { %v669_v28 = vadd.f32 %v668_v26, %v535_v24  ;;  %v679_v29 = vadd.f32 %v678_v27, %v535_v24 }
  0xfc   : > { %v670_v30 = vpop.f32.mrf.mxu0  ;;  %v680_v31 = vpop.f32.mrf.mxu1 }
  0xfd   : > { %v2076_v32 = vpack.c.bf16 %v669_v28, %v669_v28  ;;  %v2078_v33 = vpack.c.bf16 %v679_v29, %v679_v29  ;;  %v671_v34 = vadd.f32 %v670_v30, %v539_v25  ;;  %v681_v35 = vadd.f32 %v680_v31, %v539_v25 }
  0xfe   : > { %v672_v36 = vpop.f32.mrf.mxu0  ;;  %v682_v37 = vpop.f32.mrf.mxu1 }
  0xff   : > { %736 = vst.msk [vmem:[#allocation2] sm:$0xf] %vm735_vm0, %v2076_v32  ;;  %738 = vst.msk [vmem:[#allocation2 + $0x8] sm:$0xf] %vm735_vm0, %v2078_v33  ;;  %v2084_v38 = vpack.c.bf16 %v671_v34, %v671_v34  ;;  %v2086_v39 = vpack.c.bf16 %v681_v35, %v681_v35  ;;  %v673_v40 = vadd.f32 %v672_v36, %v535_v24 }
 0x100   : > { %v683_v41 = vadd.f32 %v682_v37, %v535_v24  ;;  %v674_v42 = vpop.f32.mrf.mxu0  ;;  %v684_v43 = vpop.f32.mrf.mxu1 }
 0x101   : > { %792 = vst.msk [vmem:[#allocation3] sm:$0xf] %vm735_vm0, %v2084_v38  ;;  %794 = vst.msk [vmem:[#allocation3 + $0x8] sm:$0xf] %vm735_vm0, %v2086_v39  ;;  %v2077_v44 = vpack.c.bf16 %v673_v40, %v673_v40  ;;  %v675_v46 = vadd.f32 %v674_v42, %v539_v25  ;;  %v685_v47 = vadd.f32 %v684_v43, %v539_v25 }
 0x102   : > { %v2079_v45 = vpack.c.bf16 %v683_v41, %v683_v41  ;;  %v2289_v48 = vpack.i.bf16 %v673_v40, %v669_v28  ;;  %v2294_v52 = vpack.i.bf16 %v683_v41, %v679_v29 }
 0x103   : > { %737 = vst.msk [vmem:[#allocation2 + $0x4] sm:$0xf] %vm735_vm0, %v2077_v44  ;;  %v2085_v49 = vpack.c.bf16 %v675_v46, %v675_v46  ;;  %v2299_v50 = vpack.i.bf16 %v675_v46, %v671_v34  ;;  %v2087_v51 = vpack.c.bf16 %v685_v47, %v685_v47  ;;  %v2304_v53 = vpack.i.bf16 %v685_v47, %v681_v35 }
 0x104   : > { %739 = vst.msk [vmem:[#allocation2 + $0xc] sm:$0xf] %vm735_vm0, %v2079_v45  ;;  %2290 = vrot.lane.b32.xlu0 %v2289_v48, %s2480_s12 }
 0x105   : > { %793 = vst.msk [vmem:[#allocation3 + $0x4] sm:$0xf] %vm735_vm0, %v2085_v49  ;;  %2300 = vrot.lane.b32.xlu1 %v2299_v50, %s2480_s12  ;;  %795 = vst.msk [vmem:[#allocation3 + $0xc] sm:$0xf] %vm735_vm0, %v2087_v51 }
 0x108   : > { %2295 = vrot.lane.b32.xlu0 %v2294_v52, %s2480_s12 }
 0x109   : > { %2305 = vrot.lane.b32.xlu1 %v2304_v53, %s2480_s12 }
 0x176   : > { %v2291_v54 = vpop.permute.xlu0 %2290 }
 0x177   : > { %v2293_v55 = vunpack.i.h.bf16 %v2291_v54  ;;  %v2292_v56 = vunpack.i.l.bf16 %v2291_v54  ;;  %v2301_v57 = vpop.permute.xlu1 %2300 }
 0x178   : > { %v2303_v58 = vunpack.i.h.bf16 %v2301_v57  ;;  %v2302_v59 = vunpack.i.l.bf16 %v2301_v57 }
 0x179   : > { %v2081_v60 = vpack.c.bf16 %v2293_v55, %v2293_v55  ;;  %v2080_v61 = vpack.c.bf16 %v2292_v56, %v2292_v56 }
 0x17a   : > { %v2089_v62 = vpack.c.bf16 %v2303_v58, %v2303_v58  ;;  %v2088_v63 = vpack.c.bf16 %v2302_v59, %v2302_v59  ;;  %v2296_v0 = vpop.permute.xlu0 %2295 }
 0x17b   : > { %741 = vst.msk [vmem:[#allocation2 + $0x14] sm:$0xf] %vm735_vm0, %v2081_v60  ;;  %740 = vst.msk [vmem:[#allocation2 + $0x10] sm:$0xf] %vm735_vm0, %v2080_v61  ;;  %v2298_v1 = vunpack.i.h.bf16 %v2296_v0  ;;  %v2297_v2 = vunpack.i.l.bf16 %v2296_v0  ;;  %v2306_v3 = vpop.permute.xlu1 %2305 }
 0x17c   : > { %797 = vst.msk [vmem:[#allocation3 + $0x14] sm:$0xf] %vm735_vm0, %v2089_v62  ;;  %796 = vst.msk [vmem:[#allocation3 + $0x10] sm:$0xf] %vm735_vm0, %v2088_v63  ;;  %v2308_v4 = vunpack.i.h.bf16 %v2306_v3  ;;  %v2307_v5 = vunpack.i.l.bf16 %v2306_v3 }
 0x17d   : > { %v2083_v6 = vpack.c.bf16 %v2298_v1, %v2298_v1  ;;  %v2082_v7 = vpack.c.bf16 %v2297_v2, %v2297_v2 }
 0x17e   : > { %v2091_v8 = vpack.c.bf16 %v2308_v4, %v2308_v4  ;;  %v2090_v9 = vpack.c.bf16 %v2307_v5, %v2307_v5 }
 0x17f   : > { %743 = vst.msk [vmem:[#allocation2 + $0x1c] sm:$0xf] %vm735_vm0, %v2083_v6  ;;  %742 = vst.msk [vmem:[#allocation2 + $0x18] sm:$0xf] %vm735_vm0, %v2082_v7 }
 0x180   : > { %799 = vst.msk [vmem:[#allocation3 + $0x1c] sm:$0xf] %vm735_vm0, %v2091_v8  ;;  %798 = vst.msk [vmem:[#allocation3 + $0x18] sm:$0xf] %vm735_vm0, %v2090_v9 }
 0x181 PF: > { %v2481_v10 = vmov 0.0   ;;  %v2340_v11 = vld [vmem:[%s2942_s2 + $0xa8] ss:$12 sps:$4 sm:$0xff]   ;;  %vm2482_vm1 = vmmov 0   ;;  %v2341_v12 = vld [vmem:[%s2942_s2 + $0x90] ss:$12 sps:$4 sm:$0xff]  }
 0x182   : > { %2155 = vmatprep.subr.bf16.mxu0 %v2481_v10  ;;  %2171 = vmatprep.mubr.msk.bf16.mxu0 %vm2482_vm1, %v2481_v10  ;;  %v2342_v13 = vld [vmem:[%s2942_s2 + $0x78] ss:$12 sps:$4 sm:$0xff]   ;;  %s1995_s22 = sshll.u32 %s2461_s29, 4  ;;  %v2349_v14 = vld [vmem:[#allocation2 + $0x8] sm:$0xff]   ;;  %vm961_vm2 = vcmask 523264   ;;  %s2483_s23 = smov 64  }
 0x183   : > { %2175 = vmatprep.subr.bf16.mxu1 %v2481_v10  ;;  %2179 = vmatprep.mubr.msk.bf16.mxu1 %vm2482_vm1, %v2481_v10  ;;  %v2343_v15 = vld [vmem:[%s2942_s2 + $0x60] ss:$12 sps:$4 sm:$0xff]   ;;  %s801_s15 = sshra.s32 %s1995_s22, 3  ;;  %v969_v16 = vsel %vm961_vm2, %v2349_v14, 0  ;;  %v2344_v17 = vld [vmem:[%s2942_s2 + $0x48] ss:$12 sps:$4 sm:$0xff]  }
 0x184   : > { %2156 = vmatpush3.bf16.msra.mxu0 %v2340_v11  ;;  %2176 = vmatpush3.bf16.xpose.msra.mxu1 %v969_v16  ;;  %s1996_s16 = sshll.u32 %s801_s15, 2  ;;  %v2345_v18 = vld [vmem:[%s2942_s2 + $0x30] ss:$12 sps:$4 sm:$0xff]   ;;  %v2346_v19 = vld [vmem:[%s2942_s2 + $0x18] ss:$12 sps:$4 sm:$0xff]   ;;  %vm1087_vm3 = vcmask 261120  }
 0x185   : > { %2157 = vmatprep.subr.bf16.mxu0 %v2481_v10  ;;  %2177 = vmatprep.subr.bf16.mxu1 %v2481_v10  ;;  %s804_s25 = scalar_lea.vmem %s2603_s27, %s1996_s16  ;;  %v2347_v20 = vld [vmem:[%s2942_s2] ss:$12 sps:$4 sm:$0xff]   ;;  %v2352_v35 = vld [vmem:[#allocation2 + $0x10] sm:$0xff]   ;;  %vm1254_vm4 = vcmask 519168   ;;  %vm1269_vm5 = vcmask 1043968   ;;  %s2965_s20 = sld [smem:[#allocation10_spill]] }
 0x186   : > { %v2721_v21 = vld [vmem:[%s804_s25] sm:$0xff]   ;;  %v2351_v27 = vld [vmem:[#allocation2 + $0x18] sm:$0xff]   ;;  %v1026_v36 = vsel %vm961_vm2, %v2352_v35, 0  ;;  %v2353_v8 = vld [vmem:[#allocation3 + $0x8] sm:$0xff]   ;;  %s2966_s26 = sld [smem:[#allocation11_spill]] }
 0x187   : > { %v2350_v22 = vld [vmem:[#allocation2] sm:$0xff]   ;;  %v1029_v34 = vsel %vm961_vm2, %v2351_v27, 0 }
 0x188   : > { %2158 = vmatpush3.bf16.msra.mxu0 %v2341_v12  ;;  %v966_v23 = vsel %vm961_vm2, %v2350_v22, 0  ;;  %v1997_v25 = vld [vmem:[%s2943_s3] ss:$0 sm:$0xff] }
 0x189   : > { %2159 = vmatprep.subr.bf16.mxu0 %v2481_v10  ;;  %v2013_v42 = vld [vmem:[%s494_s24] ss:$0 sm:$0xff] }
 0x18a   : > { %v2354_v9 = vld [vmem:[#allocation3] sm:$0xff]  }
 0x18c   : > { %2160 = vmatpush3.bf16.msra.mxu0 %v2342_v13  ;;  %2178 = vmatpush3.bf16.xpose.msra.mxu1 %v966_v23 }
 0x18d   : > { %2161 = vmatprep.subr.bf16.mxu0 %v2481_v10  ;;  %2183 = vmatprep.subr.bf16.mxu1 %v2481_v10 }
 0x190   : > { %2162 = vmatpush3.bf16.msra.mxu0 %v2343_v15 }
 0x191   : > { %2163 = vmatprep.subr.bf16.mxu0 %v2481_v10 }
 0x194   : > { %2164 = vmatpush3.bf16.msra.mxu0 %v2344_v17 }
 0x195   : > { %2165 = vmatprep.subr.bf16.mxu0 %v2481_v10 }
 0x198   : > { %2166 = vmatpush3.bf16.msra.mxu0 %v2345_v18 }
 0x199   : > { %2167 = vmatprep.subr.bf16.mxu0 %v2481_v10 }
 0x19c   : > { %2168 = vmatpush3.bf16.msra.mxu0 %v2346_v19 }
 0x19d   : > { %2169 = vmatprep.subr.bf16.mxu0 %v2481_v10 }
 0x1a0   : > { %2170 = vmatpush3.bf16.msra.mxu0 %v2347_v20 }
 0x1a1   : > { %2207 = vmatprep.subr.bf16.mxu0 %v2481_v10 }
 0x1a3   : > { %2172 = vmatmul.mubr.bf16.vlgmr.msra.gmra.mxu0 %v2721_v21 }
 0x1a4   : > { %2223 = vmatprep.mubr.msk.bf16.mxu0 %vm2482_vm1, %v2481_v10 }
 0x263   : > { %v918_v24 = vpop.f32.mrf.mxu0 }
 0x264   : > { %v919_v29 = vadd.f32 %v1997_v25, %v918_v24 }
 0x265   : > { %v2173_v26 = vpop.f32.mrf.mxu0 }
 0x267   : > { %v921_v28 = vpop.f32.mrf.mxu0 }
 0x268   : > { %v922_v30 = vadd.f32 %v1997_v25, %v921_v28  ;;  %v2355_v28 = vld [vmem:[#allocation3 + $0x18] sm:$0xff]  }
 0x269   : > { %v2174_v31 = vpop.f32.mrf.mxu0 }
 0x26a   : > { %v933_v32 = vpack.c.bf16 %v922_v30, %v919_v29  ;;  %v2335_v33 = vpack.i.bf16 %v922_v30, %v919_v29  ;;  %v2356_v30 = vld [vmem:[#allocation3 + $0x10] sm:$0xff]  }
 0x26c   : > { %2336 = vrot.lane.b32.xlu0 %v2335_v33, %s2483_s23  ;;  %2180 = vmatmul.mubr.msk.bf16.vlgmr.msra.gmra.mxu1 %vm961_vm2, %v933_v32 }
 0x26d   : > { %2184 = vmatpush3.bf16.xpose.msra.mxu1 %v1029_v34  ;;  %2187 = vmatprep.mubr.msk.bf16.mxu1 %vm2482_vm1, %v2481_v10 }
 0x26e   : > { %2185 = vmatprep.subr.bf16.mxu1 %v2481_v10 }
 0x275   : > { %2186 = vmatpush3.bf16.xpose.msra.mxu1 %v1026_v36 }
 0x276   : > { %2191 = vmatprep.subr.bf16.mxu1 %v2481_v10 }
 0x2de   : > { %v2337_v37 = vpop.permute.xlu0 %2336 }
 0x2df   : > { %v2339_v38 = vunpack.i.h.bf16 %v2337_v37  ;;  %v2338_v39 = vunpack.i.l.bf16 %v2337_v37 }
 0x2e1   : > { %v934_v40 = vpack.c.bf16 %v2339_v38, %v2338_v39  ;;  %v2357_v38 = vld [vmem:[%s2944_s4 + $0x38] sm:$0xff]  }
 0x2e2   : > { %2208 = vmatpush3.bf16.msra.mxu0 %v2357_v38 }
 0x2e3   : > { %2188 = vmatmul.mubr.msk.bf16.vlgmr.msra.gmra.mxu1 %vm961_vm2, %v934_v40  ;;  %v2358_v40 = vld [vmem:[%s2944_s4 + $0x30] sm:$0xff]   ;;  %2209 = vmatprep.subr.bf16.mxu0 %v2481_v10 }
 0x2e4   : > { %2195 = vmatprep.mubr.msk.bf16.mxu1 %vm2482_vm1, %v2481_v10  ;;  %2192 = vmatpush3.bf16.msra.mxu1 %v2353_v8  ;;  %v2368_v8 = vld [vmem:[%s2948_s8 + $0x74] ss:$8 sps:$4 sm:$0xff]  }
 0x2e5   : > { %2193 = vmatprep.subr.bf16.mxu1 %v2481_v10 }
 0x2e6   : > { %2210 = vmatpush3.bf16.msra.mxu0 %v2358_v40 }
 0x2e7   : > { %2211 = vmatprep.subr.bf16.mxu0 %v2481_v10 }
 0x2e8   : > { %2194 = vmatpush3.bf16.msra.mxu1 %v2354_v9 }
 0x2e9   : > { %2199 = vmatprep.subr.bf16.mxu1 %v2481_v10 }
 0x32c   : > { %v1005_v41 = vpop.f32.mrf.mxu1 }
 0x32d   : > { %v1072_v43 = vmul.f32 0.125, %v1005_v41 }
 0x32e   : > { %v2181_v44 = vpop.f32.mrf.mxu1 }
 0x32f   : > { %v1083_v45 = vadd.f32 %v2013_v42, %v1072_v43  ;;  %v2359_v44 = vld [vmem:[%s2944_s4 + $0x28] sm:$0xff]  }
 0x330   : > { %v1008_v46 = vpop.f32.mrf.mxu1  ;;  %2212 = vmatpush3.bf16.msra.mxu0 %v2359_v44 }
 0x331   : > { %v1073_v47 = vmul.f32 0.125, %v1008_v46  ;;  %v1088_v48 = vsel %vm1087_vm3, %v1083_v45, -inf  ;;  %2213 = vmatprep.subr.bf16.mxu0 %v2481_v10 }
 0x332   : > { %1089 = vmax.xlane.f32.xlu0 %v1088_v48  ;;  %v2182_v49 = vpop.f32.mrf.mxu1  ;;  %v2361_v48 = vld [vmem:[%s2944_s4 + $0x18] sm:$0xff]  }
 0x333   : > { %v1084_v50 = vadd.f32 %v2013_v42, %v1073_v47  ;;  %v2360_v47 = vld [vmem:[%s2944_s4 + $0x20] sm:$0xff]   ;;  %v2362_v49 = vld [vmem:[%s2944_s4 + $0x10] sm:$0xff]  }
 0x334   : > { %2214 = vmatpush3.bf16.msra.mxu0 %v2360_v47 }
 0x335   : > { %v1091_v51 = vsel %vm1087_vm3, %v1084_v50, -inf  ;;  %2215 = vmatprep.subr.bf16.mxu0 %v2481_v10 }
 0x336   : > { %1092 = vmax.xlane.f32.xlu1 %v1091_v51  ;;  %v2364_v51 = vld [vmem:[%s2944_s4] sm:$0xff]  }
 0x338   : > { %2216 = vmatpush3.bf16.msra.mxu0 %v2361_v48 }
 0x339   : > { %2217 = vmatprep.subr.bf16.mxu0 %v2481_v10 }
 0x33c   : > { %2218 = vmatpush3.bf16.msra.mxu0 %v2362_v49 }
 0x33d   : > { %2219 = vmatprep.subr.bf16.mxu0 %v2481_v10 }
 0x3a3   : > { %v1065_v52 = vpop.f32.mrf.mxu1 }
 0x3a4   : > { %v1074_v53 = vmul.f32 0.125, %v1065_v52 }
 0x3a5   : > { %v2189_v54 = vpop.f32.mrf.mxu1 }
 0x3a6   : > { %v1085_v55 = vadd.f32 %v2013_v42, %v1074_v53 }
 0x3a7   : > { %v1068_v56 = vpop.f32.mrf.mxu1 }
 0x3a8   : > { %v1075_v57 = vmul.f32 0.125, %v1068_v56  ;;  %v1094_v58 = vsel %vm1087_vm3, %v1085_v55, -inf }
 0x3a9   : > { %1095 = vmax.xlane.f32.xlu1 %v1094_v58  ;;  %v2190_v59 = vpop.f32.mrf.mxu1 }
 0x3aa   : > { %v1086_v60 = vadd.f32 %v2013_v42, %v1075_v57 }
 0x3ac   : > { %v1097_v61 = vsel %vm1087_vm3, %v1086_v60, -inf }
 0x3ad   : > { %1098 = vmax.xlane.f32.xlu1 %v1097_v61  ;;  %v1392_v61 = vunpack.c.l.bf16 %v2721_v21 }
 0x3bb   : > { %v1090_v62 = vpop.xlane.xlu0 %1089 }
 0x3bc   : > { %v1100_v63 = vsub.f32 %v1083_v45, %v1090_v62 }
 0x3be   : > { %v1104_v0 = vmul.f32 1.442695, %v1100_v63 }
 0x3bf   : > { %v1093_v1 = vpop.xlane.xlu1 %1092 }
 0x3c0   : > { %2407 = vpow2.f32 %v1104_v0  ;;  %v1101_v2 = vsub.f32 %v1084_v50, %v1093_v1  ;;  %v2363_v50 = vld [vmem:[%s2944_s4 + $0x8] sm:$0xff]  }
 0x3c1   : > { %2220 = vmatpush3.bf16.msra.mxu0 %v2363_v50  ;;  %v2390_v50 = vld [vmem:[%s2950_s10 + $0x78] sm:$0xff]  }
 0x3c2   : > { %v1106_v3 = vmul.f32 1.442695, %v1101_v2  ;;  %2221 = vmatprep.subr.bf16.mxu0 %v2481_v10  ;;  %v1393_v2 = vunpack.c.h.bf16 %v2721_v21 }
 0x3c4   : > { %2409 = vpow2.f32 %v1106_v3 }
 0x3c5   : > { %2222 = vmatpush3.bf16.msra.mxu0 %v2364_v51  ;;  %v2391_v51 = vld [vmem:[%s2950_s10 + $0x38] sm:$0xff]  }
 0x3c6   : > { %2133 = vmatprep.subr.bf16.mxu0 %v2390_v50 }
 0x3cd   : > { %v2408_v4 = vpop.eup %2407 }
 0x3ce   : > { %v1112_v5 = vsel %vm1087_vm3, %v2408_v4, 0.0 }
 0x3cf   : > { %1113 = vadd.xlane.f32.xlu1 %v1112_v5 }
 0x3d1   : > { %v2410_v6 = vpop.eup %2409 }
 0x3d2   : > { %v1115_v7 = vsel %vm1087_vm3, %v2410_v6, 0.0 }
 0x3d3   : > { %1116 = vadd.xlane.f32.xlu1 %v1115_v7  ;;  %v2366_v7 = vld [vmem:[%s2948_s8 + $0x70] ss:$8 sps:$4 sm:$0xff]  }
 0x432   : > { %v1096_v11 = vpop.xlane.xlu1 %1095 }
 0x433   : > { %v1102_v12 = vsub.f32 %v1085_v55, %v1096_v11 }
 0x435   : > { %v1108_v13 = vmul.f32 1.442695, %v1102_v12 }
 0x436   : > { %v1099_v14 = vpop.xlane.xlu1 %1098 }
 0x437   : > { %2411 = vpow2.f32 %v1108_v13  ;;  %v1103_v15 = vsub.f32 %v1086_v60, %v1099_v14 }
 0x439   : > { %v1110_v16 = vmul.f32 1.442695, %v1103_v15 }
 0x43b   : > { %2413 = vpow2.f32 %v1110_v16 }
 0x444   : > { %v2412_v17 = vpop.eup %2411 }
 0x445   : > { %v1118_v18 = vsel %vm1087_vm3, %v2412_v17, 0.0 }
 0x446   : > { %1119 = vadd.xlane.f32.xlu1 %v1118_v18  ;;  %v2369_v18 = vld [vmem:[%s2948_s8 + $0x60] ss:$8 sps:$4 sm:$0xff]  }
 0x448   : > { %v2414_v19 = vpop.eup %2413 }
 0x449   : > { %v1121_v20 = vsel %vm1087_vm3, %v2414_v19, 0.0 }
 0x44a   : > { %1122 = vadd.xlane.f32.xlu1 %v1121_v20  ;;  %v2372_v20 = vld [vmem:[%s2948_s8 + $0x50] ss:$8 sps:$4 sm:$0xff]  }
 0x458   : > { %v1114_v22 = vpop.xlane.xlu1 %1113 }
 0x459   : > { %2415 = vrcp.f32 %v1114_v22  ;;  %v2375_v22 = vld [vmem:[%s2948_s8 + $0x40] ss:$8 sps:$4 sm:$0xff]  }
 0x45c   : > { %v1117_v23 = vpop.xlane.xlu1 %1116 }
 0x45d   : > { %2417 = vrcp.f32 %v1117_v23  ;;  %v2377_v23 = vld [vmem:[%s2948_s8 + $0x44] ss:$8 sps:$4 sm:$0xff]  }
 0x466   : > { %v2416_v24 = vpop.eup %2415 }
 0x467   : > { %v1128_v26 = vmul.f32 %v2416_v24, %v2408_v4  ;;  %v2380_v24 = vld [vmem:[%s2948_s8 + $0x34] ss:$8 sps:$4 sm:$0xff]  }
 0x46a   : > { %v2418_v25 = vpop.eup %2417 }
 0x46b   : > { %v1129_v27 = vmul.f32 %v2418_v25, %v2410_v6  ;;  %v2378_v25 = vld [vmem:[%s2948_s8 + $0x30] ss:$8 sps:$4 sm:$0xff]  }
 0x46d   : > { %v1132_v29 = vpack.c.bf16 %v1129_v27, %v1128_v26  ;;  %v2383_v26 = vld [vmem:[%s2948_s8 + $0x24] ss:$8 sps:$4 sm:$0xff]   ;;  %v2484_v27 = vmov 0  }
 0x46f   : > { %2196 = vmatmul.mubr.msk.bf16.vlgmr.msra.gmra.mxu1 %vm1087_vm3, %v1132_v29  ;;  %v2386_v29 = vld [vmem:[%s2948_s8 + $0x14] ss:$8 sps:$4 sm:$0xff]  }
 0x470   : > { %2200 = vmatpush3.bf16.msra.mxu1 %v2355_v28  ;;  %2203 = vmatprep.mubr.msk.bf16.mxu1 %vm2482_vm1, %v2481_v10  ;;  %v2381_v28 = vld [vmem:[%s2948_s8 + $0x20] ss:$8 sps:$4 sm:$0xff]  }
 0x471   : > { %2201 = vmatprep.subr.bf16.mxu1 %v2481_v10  ;;  %v2024_v10 = vld [vmem:[%s2945_s5] ss:$0 sm:$0xff] }
 0x474   : > { %2202 = vmatpush3.bf16.msra.mxu1 %v2356_v30  ;;  %v2384_v30 = vld [vmem:[%s2948_s8 + $0x10] ss:$8 sps:$4 sm:$0xff]  }
 0x475   : > { %1546 = vmatprep.subr.bf16.mxu1 %v2368_v8 }
 0x4cf   : > { %v1120_v31 = vpop.xlane.xlu1 %1119 }
 0x4d0   : > { %2419 = vrcp.f32 %v1120_v31  ;;  %v2389_v31 = vld [vmem:[%s2948_s8 + $0x4] ss:$8 sps:$4 sm:$0xff]  }
 0x4d3   : > { %v1123_v32 = vpop.xlane.xlu1 %1122 }
 0x4d4   : > { %2421 = vrcp.f32 %v1123_v32  ;;  %v2387_v32 = vld [vmem:[%s2948_s8] ss:$8 sps:$4 sm:$0xff]  }
 0x4dd   : > { %v2420_v33 = vpop.eup %2419 }
 0x4de   : > { %v1130_v35 = vmul.f32 %v2420_v33, %v2412_v17  ;;  %v2371_v17 = vld [vmem:[%s2948_s8 + $0x64] ss:$8 sps:$4 sm:$0xff]  }
 0x4e1   : > { %v2422_v34 = vpop.eup %2421 }
 0x4e2   : > { %v1131_v36 = vmul.f32 %v2422_v34, %v2414_v19  ;;  %v2374_v19 = vld [vmem:[%s2948_s8 + $0x54] ss:$8 sps:$4 sm:$0xff]  }
 0x4e4   : > { %v1133_v37 = vpack.c.bf16 %v1131_v36, %v1130_v35 }
 0x4e6   : > { %2204 = vmatmul.mubr.msk.bf16.vlgmr.msra.gmra.mxu1 %vm1087_vm3, %v1133_v37 }
 0x4e7   : > { %1547 = vmatpush1.bf16.msra.mxu1 %v2366_v7  ;;  %1578 = vmatprep.mubr.bf16.mxu1 %v2484_v27 }
 0x4e8   : > { %1548 = vmatprep.subr.bf16.mxu1 %v2371_v17 }
 0x4eb   : > { %1549 = vmatpush1.bf16.msra.mxu1 %v2369_v18 }
 0x4ec   : > { %1550 = vmatprep.subr.bf16.mxu1 %v2374_v19 }
 0x4ef   : > { %1551 = vmatpush1.bf16.msra.mxu1 %v2372_v20 }
 0x4f0   : > { %1552 = vmatprep.subr.bf16.mxu1 %v2377_v23 }
 0x4f3   : > { %1553 = vmatpush1.bf16.msra.mxu1 %v2375_v22 }
 0x4f4   : > { %1554 = vmatprep.subr.bf16.mxu1 %v2380_v24 }
 0x4f7   : > { %1555 = vmatpush1.bf16.msra.mxu1 %v2378_v25 }
 0x4f8   : > { %1556 = vmatprep.subr.bf16.mxu1 %v2383_v26 }
 0x4fb   : > { %1557 = vmatpush1.bf16.msra.mxu1 %v2381_v28 }
 0x4fc   : > { %1558 = vmatprep.subr.bf16.mxu1 %v2386_v29 }
 0x4ff   : > { %1559 = vmatpush1.bf16.msra.mxu1 %v2384_v30 }
 0x500   : > { %1560 = vmatprep.subr.bf16.mxu1 %v2389_v31 }
 0x503   : > { %1561 = vmatpush1.bf16.msra.mxu1 %v2387_v32 }
 0x52f   : > { %v1183_v39 = vpop.f32.mrf.mxu1 }
 0x530   : > { %v2092_v41 = vpack.c.bf16 %v1183_v39, %v1183_v39 }
 0x531   : > { %v2197_v42 = vpop.f32.mrf.mxu1 }
 0x532   : > { %1255 = vst.msk [vmem:[#allocation4] sm:$0xf] %vm1254_vm4, %v2092_v41  ;;  %v2034_v41 = vld [vmem:[%s2946_s6] ss:$0 sm:$0xff] }
 0x533   : > { %v1186_v43 = vpop.f32.mrf.mxu1 }
 0x534   : > { %v2093_v45 = vpack.c.bf16 %v1186_v43, %v1186_v43 }
 0x535   : > { %v2198_v46 = vpop.f32.mrf.mxu1 }
 0x536   : > { %1256 = vst.msk [vmem:[#allocation4 + $0x4] sm:$0xf] %vm1254_vm4, %v2093_v45  ;;  %v2035_v45 = vld [vmem:[%s2947_s7] ss:$0 sm:$0xff] }
 0x5a6   : > { %v1239_v52 = vpop.f32.mrf.mxu1 }
 0x5a7   : > { %v2094_v53 = vpack.c.bf16 %v1239_v52, %v1239_v52  ;;  %v2392_v52 = vld [vmem:[%s2950_s10 + $0x70] sm:$0xff]  }
 0x5a8   : > { %v2205_v54 = vpop.f32.mrf.mxu1 }
 0x5a9   : > { %1263 = vrot.lane.b32.xlu1 %v2094_v53, %s2483_s23  ;;  %v2393_v53 = vld [vmem:[%s2950_s10 + $0x30] sm:$0xff]   ;;  %v2394_v54 = vld [vmem:[%s2950_s10 + $0x68] sm:$0xff]  }
 0x5aa   : > { %v1242_v55 = vpop.f32.mrf.mxu1 }
 0x5ab   : > { %v2095_v56 = vpack.c.bf16 %v1242_v55, %v1242_v55  ;;  %v2395_v55 = vld [vmem:[%s2950_s10 + $0x28] sm:$0xff]  }
 0x5ac   : > { %v2206_v57 = vpop.f32.mrf.mxu1 }
 0x5ad   : > { %1265 = vrot.lane.b32.xlu0 %v2095_v56, %s2483_s23  ;;  %v2396_v56 = vld [vmem:[%s2950_s10 + $0x60] sm:$0xff]  }
 0x5ae   : > { %v2397_v57 = vld [vmem:[%s2950_s10 + $0x20] sm:$0xff]  }
 0x61b   : > { %v1264_v58 = vpop.permute.xlu1 %1263 }
 0x61c   : > { %1270 = vst.msk [vmem:[#allocation4] sm:$0xf] %vm1269_vm5, %v1264_v58  ;;  %v2398_v58 = vld [vmem:[%s2950_s10 + $0x58] sm:$0xff]  }
 0x61f   : > { %v1266_v59 = vpop.permute.xlu0 %1265 }
 0x620   : > { %1271 = vst.msk [vmem:[#allocation4 + $0x4] sm:$0xf] %vm1269_vm5, %v1266_v59  ;;  %v2399_v59 = vld [vmem:[%s2950_s10 + $0x18] sm:$0xff]  }
 0x627   : > { %v2365_v60 = vld [vmem:[#allocation4] sm:$0xff]  }
 0x628   : > { %2224 = vmatmul.mubr.bf16.vlgmr.msra.gmra.mxu0 %v2365_v60  ;;  %v2400_v60 = vld [vmem:[%s2950_s10 + $0x50] sm:$0xff]  }
 0x629   : > { %2134 = vmatpush3.bf16.msra.mxu0 %v2391_v51 }
 0x62a   : > { %2135 = vmatprep.subr.bf16.mxu0 %v2392_v52 }
 0x62d   : > { %2136 = vmatpush3.bf16.msra.mxu0 %v2393_v53 }
 0x62e   : > { %2137 = vmatprep.subr.bf16.mxu0 %v2394_v54 }
 0x631   : > { %2138 = vmatpush3.bf16.msra.mxu0 %v2395_v55 }
 0x632   : > { %2139 = vmatprep.subr.bf16.mxu0 %v2396_v56 }
 0x635   : > { %2140 = vmatpush3.bf16.msra.mxu0 %v2397_v57 }
 0x636   : > { %2141 = vmatprep.subr.bf16.mxu0 %v2398_v58  ;;  %v2052_v58 = vld [vmem:[%s2951_s11] ss:$0 sm:$0xff] }
 0x639   : > { %2142 = vmatpush3.bf16.msra.mxu0 %v2399_v59 }
 0x63a   : > { %2143 = vmatprep.subr.bf16.mxu0 %v2400_v60 }
 0x6e8   : > { %v1385_v62 = vpop.f32.mrf.mxu0 }
 0x6e9   : > { %v1386_v63 = vadd.f32 %v2024_v10, %v1385_v62  ;;  %v2403_v62 = vld [vmem:[%s2950_s10 + $0x8] sm:$0xff]  }
 0x6ea   : > { %v2225_v0 = vpop.f32.mrf.mxu0 }
 0x6eb   : > { %v1394_v1 = vadd.f32 %v1392_v61, %v1386_v63  ;;  %v2402_v61 = vld [vmem:[%s2950_s10 + $0x48] sm:$0xff]   ;;  %v2404_v63 = vld [vmem:[%s2950_s10 + $0x40] sm:$0xff]  }
 0x6ec   : > { %v1388_v3 = vpop.f32.mrf.mxu0  ;;  %v2405_v0 = vld [vmem:[%s2950_s10] sm:$0xff]  }
 0x6ed   : > { %v1389_v4 = vadd.f32 %v2024_v10, %v1388_v3  ;;  %1398 = vadd.xlane.f32.xlu1 %v1394_v1  ;;  %v2401_v10 = vld [vmem:[%s2950_s10 + $0x10] sm:$0xff]  }
 0x6ee   : > { %v2226_v5 = vpop.f32.mrf.mxu0  ;;  %2144 = vmatpush3.bf16.msra.mxu0 %v2401_v10 }
 0x6ef   : > { %v1395_v6 = vadd.f32 %v1393_v2, %v1389_v4  ;;  %2145 = vmatprep.subr.bf16.mxu0 %v2402_v61  ;;  %v1454_v4 = vld [vmem:[%s2949_s9] sm:$0x3] }
 0x6f1   : > { %1400 = vadd.xlane.f32.xlu0 %v1395_v6 }
 0x6f2   : > { %2146 = vmatpush3.bf16.msra.mxu0 %v2403_v62 }
 0x6f3   : > { %2147 = vmatprep.subr.bf16.mxu0 %v2404_v63 }
 0x6f6   : > { %2148 = vmatpush3.bf16.msra.mxu0 %v2405_v0 }
 0x776   : > { %v1399_v9 = vpop.xlane.xlu1 %1398 }
 0x777   : > { %v1403_v11 = vmul.f32 0.0078125, %v1399_v9 }
 0x779   : > { %v1405_v12 = vsub.f32 %v1394_v1, %v1403_v11  ;;  %v1456_v1 = vlaneseq }
 0x77a   : > { %v1401_v21 = vpop.xlane.xlu0 %1400 }
 0x77b   : > { %v1404_v13 = vmul.f32 0.0078125, %v1401_v21  ;;  %v1407_v14 = vmul.f32 %v1405_v12, %v1405_v12  ;;  %v1457_v2 = vshrl.u32 %v1456_v1, 7 }
 0x77d   : > { %v1406_v15 = vsub.f32 %v1395_v6, %v1404_v13  ;;  %1409 = vadd.xlane.f32.xlu1 %v1407_v14  ;;  %v1458_v3 = vsub.s32 0, %v1457_v2  ;;  %v1462_v5 = vsub.s32 1, %v1457_v2 }
 0x77f   : > { %v1408_v16 = vmul.f32 %v1406_v15, %v1406_v15  ;;  %v1459_v6 = vrot.slane %v1454_v4, %v1458_v3  ;;  %v1463_v7 = vrot.slane %v1454_v4, %v1462_v5 }
 0x781   : > { %1411 = vadd.xlane.f32.xlu1 %v1408_v16 }
 0x806   : > { %v1410_v33 = vpop.xlane.xlu1 %1409 }
 0x807   : > { %v1413_v34 = vmul.f32 0.0078125, %v1410_v33 }
 0x809   : > { %v1415_v35 = vadd.f32 1e-05, %v1413_v34 }
 0x80a   : > { %v1412_v36 = vpop.xlane.xlu1 %1411 }
 0x80b   : > { %2423 = vrsqrt.f32 %v1415_v35  ;;  %v1414_v37 = vmul.f32 0.0078125, %v1412_v36 }
 0x80d   : > { %v1416_v38 = vadd.f32 1e-05, %v1414_v37 }
 0x80f   : > { %2425 = vrsqrt.f32 %v1416_v38 }
 0x818   : > { %v2424_v39 = vpop.eup %2423 }
 0x819   : > { %v1419_v40 = vmul.f32 %v2424_v39, %v1405_v12 }
 0x81b   : > { %v1427_v44 = vmul.f32 %v2034_v41, %v1419_v40 }
 0x81c   : > { %v2426_v42 = vpop.eup %2425 }
 0x81d   : > { %v1420_v43 = vmul.f32 %v2426_v42, %v1406_v15  ;;  %v2856_v47 = vadd.f32 %v2035_v45, %v1427_v44 }
 0x81f   : > { %v1428_v46 = vmul.f32 %v2034_v41, %v1420_v43 }
 0x821   : > { %v2858_v48 = vadd.f32 %v2035_v45, %v1428_v46 }
 0x823   : > { %v1437_v49 = vpack.c.bf16 %v2858_v48, %v2856_v47 }
 0x825   : > { %1579 = vmatmul.mubr.bf16.vlgmr.msra.gmra.mxu1 %v1437_v49 }
 0x8e5   : > { %v1580_v8 = vpop.f32.mrf.mxu1 }
 0x8e6   : > { %v1581_v9 = vadd.f32 %v1580_v8, %v1459_v6 }
 0x8e7   : > { %v1582_v11 = vpop.f32.mrf.mxu1 }
 0x8e8   : > { %v1589_v12 = vmul.f32 %v1581_v9, %v1581_v9  ;;  %v1583_v21 = vadd.f32 %v1582_v11, %v1463_v7 }
 0x8e9   : > { %v1584_v13 = vpop.f32.mrf.mxu1 }
 0x8ea   : > { %v1593_v14 = vmul.f32 %v1589_v12, %v1581_v9  ;;  %v1590_v15 = vmul.f32 %v1583_v21, %v1583_v21  ;;  %v1585_v16 = vadd.f32 %v1584_v13, %v1459_v6 }
 0x8eb   : > { %v1586_v17 = vpop.f32.mrf.mxu1 }
 0x8ec   : > { %v1597_v18 = vmul.f32 0.044715, %v1593_v14  ;;  %v1594_v19 = vmul.f32 %v1590_v15, %v1583_v21  ;;  %v1591_v20 = vmul.f32 %v1585_v16, %v1585_v16  ;;  %v1587_v22 = vadd.f32 %v1586_v17, %v1463_v7  ;;  %v2069_v17 = vld [vmem:[%s2965_s20] ss:$0 sm:$0xff] }
 0x8ee   : > { %v1601_v23 = vadd.f32 %v1597_v18, %v1581_v9  ;;  %v1598_v24 = vmul.f32 0.044715, %v1594_v19  ;;  %v1595_v25 = vmul.f32 %v1591_v20, %v1585_v16  ;;  %v1592_v26 = vmul.f32 %v1587_v22, %v1587_v22 }
 0x8f0   : > { %v1605_v27 = vmul.f32 0.7978846, %v1601_v23  ;;  %v1602_v28 = vadd.f32 %v1598_v24, %v1583_v21  ;;  %v1599_v29 = vmul.f32 0.044715, %v1595_v25  ;;  %v1596_v30 = vmul.f32 %v1592_v26, %v1587_v22 }
 0x8f2   : > { %v1606_v31 = vmul.f32 0.7978846, %v1602_v28  ;;  %v1603_v32 = vadd.f32 %v1599_v29, %v1585_v16  ;;  %v1600_v33 = vmul.f32 0.044715, %v1596_v30  ;;  %2427 = vtanh.f32 %v1605_v27 }
 0x8f4   : > { %2429 = vtanh.f32 %v1606_v31  ;;  %v1607_v34 = vmul.f32 0.7978846, %v1603_v32  ;;  %v1604_v35 = vadd.f32 %v1600_v33, %v1587_v22 }
 0x8f6   : > { %2431 = vtanh.f32 %v1607_v34  ;;  %v1608_v36 = vmul.f32 0.7978846, %v1604_v35 }
 0x8f8   : > { %2433 = vtanh.f32 %v1608_v36 }
 0x8ff   : > { %v2428_v37 = vpop.eup %2427 }
 0x900   : > { %v1613_v41 = vadd.f32 1.0, %v2428_v37 }
 0x901   : > { %v2430_v38 = vpop.eup %2429 }
 0x902   : > { %v1614_v39 = vadd.f32 1.0, %v2430_v38  ;;  %v1617_v49 = vmul.f32 0.5, %v1613_v41 }
 0x903   : > { %v2432_v40 = vpop.eup %2431 }
 0x904   : > { %v1615_v42 = vadd.f32 1.0, %v2432_v40  ;;  %v1618_v46 = vmul.f32 0.5, %v1614_v39  ;;  %v1621_v54 = vmul.f32 %v1617_v49, %v1581_v9 }
 0x905   : > { %v2434_v43 = vpop.eup %2433 }
 0x906   : > { %v1619_v44 = vmul.f32 0.5, %v1615_v42  ;;  %v1616_v45 = vadd.f32 1.0, %v2434_v43  ;;  %v1622_v52 = vmul.f32 %v1618_v46, %v1583_v21 }
 0x908   : > { %v1620_v50 = vmul.f32 0.5, %v1616_v45  ;;  %v1623_v51 = vmul.f32 %v1619_v44, %v1585_v16 }
 0x90a   : > { %v1624_v53 = vmul.f32 %v1620_v50, %v1587_v22  ;;  %v1625_v56 = vpack.c.bf16 %v1623_v51, %v1621_v54  ;;  %v2070_v22 = vld [vmem:[%s2966_s26] ss:$0 sm:$0xff] }
 0x90c   : > { %v1626_v55 = vpack.c.bf16 %v1624_v53, %v1622_v52 }
 0x90e   : > { %1794 = vmatprep.mubr.bf16.mxu0 %v1626_v55 }
 0x90f   : > { %1795 = vmatmul.mubr.bf16.vlgmr.msra.gmra.mxu0 %v1625_v56 }
 0x9cf   : > { %v2149_v57 = vpop.f32.mrf.mxu0 }
 0x9d1   : > { %v2150_v59 = vpop.f32.mrf.mxu0 }
 0x9d2   : > { %v2151_v60 = vadd.f32 %v2150_v59, %v2149_v57 }
 0x9d3   : > { %v2152_v10 = vpop.f32.mrf.mxu0 }
 0x9d4   : > { %v1797_v61 = vadd.f32 %v2151_v60, %v2052_v58 }
 0x9d5   : > { %v2153_v62 = vpop.f32.mrf.mxu0 }
 0x9d6   : > { %v2154_v63 = vadd.f32 %v2153_v62, %v2152_v10  ;;  %v1803_v0 = vadd.f32 %v1797_v61, %v2856_v47 }
 0x9d8   : > { %v1800_v1 = vadd.f32 %v2154_v63, %v2052_v58  ;;  %1807 = vadd.xlane.f32.xlu0 %v1803_v0 }
 0x9da   : > { %v1804_v2 = vadd.f32 %v1800_v1, %v2858_v48 }
 0x9dc   : > { %1809 = vadd.xlane.f32.xlu1 %v1804_v2 }
 0xa61   : > { %v1808_v3 = vpop.xlane.xlu0 %1807 }
 0xa62   : > { %v1811_v4 = vmul.f32 0.0078125, %v1808_v3 }
 0xa64   : > { %v1813_v5 = vsub.f32 %v1803_v0, %v1811_v4 }
 0xa65   : > { %v1810_v6 = vpop.xlane.xlu1 %1809 }
 0xa66   : > { %v1812_v7 = vmul.f32 0.0078125, %v1810_v6  ;;  %v1815_v8 = vmul.f32 %v1813_v5, %v1813_v5 }
 0xa68   : > { %v1814_v9 = vsub.f32 %v1804_v2, %v1812_v7  ;;  %1817 = vadd.xlane.f32.xlu0 %v1815_v8 }
 0xa6a   : > { %v1816_v11 = vmul.f32 %v1814_v9, %v1814_v9 }
 0xa6c   : > { %1819 = vadd.xlane.f32.xlu1 %v1816_v11 }
 0xaf1   : > { %v1818_v12 = vpop.xlane.xlu0 %1817 }
 0xaf2   : > { %v1821_v21 = vmul.f32 0.0078125, %v1818_v12 }
 0xaf4   : > { %v1823_v13 = vadd.f32 1e-05, %v1821_v21 }
 0xaf5   : > { %v1820_v14 = vpop.xlane.xlu1 %1819 }
 0xaf6   : > { %2435 = vrsqrt.f32 %v1823_v13  ;;  %v1822_v47 = vmul.f32 0.0078125, %v1820_v14 }
 0xaf8   : > { %v1824_v15 = vadd.f32 1e-05, %v1822_v47 }
 0xafa   : > { %2437 = vrsqrt.f32 %v1824_v15 }
 0xb03   : > { %v2436_v48 = vpop.eup %2435 }
 0xb04   : > { %v1827_v16 = vmul.f32 %v2436_v48, %v1813_v5 }
 0xb06   : > { %v1835_v19 = vmul.f32 %v2069_v17, %v1827_v16 }
 0xb07   : > { %v2438_v18 = vpop.eup %2437 }
 0xb08   : > { %v1828_v20 = vmul.f32 %v2438_v18, %v1814_v9  ;;  %v1843_v24 = vadd.f32 %v2070_v22, %v1835_v19 }
 0xb0a   : > { %v1836_v23 = vmul.f32 %v2069_v17, %v1828_v20 }
 0xb0c   : > { %v1844_v25 = vadd.f32 %v2070_v22, %v1836_v23 }
 0xb0e   : > { %v2101_v26 = vpack.c.bf16 %v1844_v25, %v1843_v24 }
 0xb10   : > { %2102 = vst [vmem:[%s2609_s17] sm:$0xff] %v2101_v26  }
 0xb11 PF: > { %s2967_s28 = sld [smem:[#allocation7_spill]] }
 0xb12   : > { %s2968_s29 = sld [smem:[#allocation5_spill]] }
 0xb13   : > { %s2969_s30 = sld [smem:[#allocation6_spill]] }
 0xb14   : > { %s2970_s15 = sld [smem:[#allocation8_spill]] }
 0xb15   : > { %s2971_s16 = sld [smem:[#allocation9_spill]] }
 0xb17   : > { %s24_s17 = sadd.s32 1, %s2967_s28  }
 0xb18   : > { %p21_p8 = scmp.ge.s32.totalorder %s24_s17, 6  }
 0xb1a   :  { %23 = sbr.rel (!%p21_p8) target bundleno = 4 (0x4), region = 114 }

// kernel: barlow_twins_forward.7
= control target key start
LH: loop header
LB: loop body
LE: loop exit
PB: predicated region body
PF: predicated region fallthrough
CT: control target
= control target key end

     0   :  { %7 = vsyncpa [#allocation3], 0  ;;  %s565_s0 = inlined_call_operand.vmem [shape: bf16[2,32,128], index: 0, kind: input, shape index: {}]   ;;  %s566_s1 = inlined_call_operand.vmem [shape: f32[2,32,1], index: 1, kind: input, shape index: {}]   ;;  %s567_s2 = inlined_call_operand.hbm [shape: f32[2,1,128], index: 2, kind: output, shape index: {}]  }
   0x1   :  { %9 = vsyncpa [#allocation3 + $0x1], 0  ;;  %s471_s9 = smov 0   ;;  %s473_s10 = smov 0  }
   0x2   :  { %s475_s11 = smov 0   ;;  %s477_s12 = smov 0  }
   0x3 LB: > { %s492_s13 = sadd.s32 4294967295, %s452_s12   ;;  %s322_s14 = sadd.s32 4294967294, %s452_s12   ;;  %s452_s12 = sphi %s477_s12, %s573_s12   ;;  %s448_s11 = sphi %s475_s11, %s572_s11   ;;  %s444_s10 = sphi %s473_s10, %s571_s10   ;;  %s440_s9 = sphi %s471_s9, %s570_s9  }
   0x4   : > { %s496_s15 = sadd.s32 1, %s452_s12   ;;  %s74_s16 = sadd.s32 1, %s448_s11 }
   0x5   : > { %s71_s17 = ssub.s32 %s452_s12, %s496_s15  ;;  %p84_p0 = scmp.ne.s32.totalorder %s448_s11, %s444_s10 }
   0x6   : > { %p72_p1 = scmp.eq.s32.totalorder %s71_s17, 0  ;;  %p85_p2 = scmp.eq.s32.totalorder %s492_s13, 1 }
   0x7   : > { %p90_p3 = scmp.ne.s32.totalorder %s444_s10, %s440_s9  ;;  %p91_p4 = scmp.eq.s32.totalorder %s322_s14, 1 }
   0x8   : > { %s507_s18 = scalar_select %p72_p1, %s448_s11, %s74_s16  }
   0x9   : > { %p509_p5 = por %p85_p2, %p84_p0  ;;  %p513_p6 = por %p91_p4, %p90_p3 }
   0xa   : > { %p325_p7 = scmp.ge.s32.totalorder %s452_s12, 1  ;;  %p125_p8 = scmp.lt.s32.totalorder %s452_s12, 3 }
   0xc   : > { %p126_p9 = pnand %p325_p7, %p125_p8 }
   0xd   : > { %p151_p10 = scmp.lt.s32.totalorder (!%p126_p9), %s492_s13, 1  ;;  %s149_s30 = sand.u32 (!%p126_p9), 1, %s444_s10  }
   0xe   : > { %129 = sbr.rel (%p126_p9) target bundleno = 374 (0x176), region = 28  ;;  %s330_s3 = sshll.u32 (!%p126_p9), %s492_s13, 4 }
   0xf   : > { %s150_s4 = scalar_lea.vmem (!%p126_p9), [#allocation2], %s149_s30  ;;  %s253_s8 = scalar_lea.hbm (!%p126_p9), %s567_s2, %s330_s3 }
  0x10   : > { %s255_s5 = sshll.u32 (!%p126_p9), %s150_s4, 4  ;;  %s243_s14 = scalar_lea.sflag (!%p126_p9), [#allocation3], %s149_s30  ;;  %s256_s5 = int_to_ptr.vmem [resolvable:$true] %s255_s5 }
  0x11   : > { %s392_s16 = scalar_lea.vmem (!%p126_p9), %s256_s5, 16  ;;  %s455_s17 = smov (!%p126_p9), [#allocation2]  }
  0x12   : > { %p393_p11 = scmp.ne.s32.totalorder (!%p126_p9), %s256_s5, %s392_s16 }
  0x13   : > { %v454_v0 = vmov 0   ;;  %s521_s21 = scalar_select %p151_p10, %s492_s13, 1  ;;  %vm206_vm0 = vcmask 7168  }
  0x14   : > { %384 = vset.pattern.permute.xlu0 %v454_v0  ;;  %385 = vset.pattern.permute.xlu1 %v454_v0  ;;  %p394_p12 = pnand %p393_p11, %p509_p5 }
  0x15   : > { %s334_s22 = sshll.u32 %s521_s21, 5  ;;  %s333_s26 = sshll.u32 %s521_s21, 4 }
  0x16   : > { %s160_s25 = scalar_lea.vmem %s566_s1, %s334_s22  ;;  %s155_s29 = scalar_lea.vmem %s565_s0, %s333_s26 }
  0x17   : > { %v169_v1 = vld [vmem:[%s160_s25] sm:$0xff]  ;;  %v171_v2 = vld [vmem:[%s160_s25 + $0x10] sm:$0xff]  ;;  %v170_v3 = vld [vmem:[%s160_s25 + $0x8] sm:$0xff]  ;;  %p395_p13 = pneg %p394_p12  ;;  %s396_s21 = sshll.u32 %s455_s17, 4  ;;  %s397_s21 = int_to_ptr.vmem [resolvable:$false] %s396_s21 }
  0x18   : > { %175 = vperm.xlu0 %384, %v169_v1   ;;  %v207_v4 = vsel %vm206_vm0, %v169_v1, 0.0  ;;  %185 = vperm.xlu1 %385, %v171_v2   ;;  %v210_v5 = vsel %vm206_vm0, %v171_v2, 0.0  ;;  %v208_v6 = vsel %vm206_vm0, %v170_v3, 0.0  ;;  %v172_v7 = vld [vmem:[%s160_s25 + $0x18] sm:$0xff]  ;;  %v336_v19 = vld [vmem:[%s155_s29] sm:$0xff]   ;;  %v343_v20 = vld [vmem:[%s155_s29 + $0x8] sm:$0xff]   ;;  %p399_p0 = scmp.lt.s32.totalorder %s256_s5, %s397_s21 }
  0x19   : > { %v209_v8 = vadd.f32 %v208_v6, %v207_v4  ;;  %v212_v9 = vsel %vm206_vm0, %v172_v7, 0.0  ;;  %v337_v21 = vunpack.c.l.bf16 %v336_v19  ;;  %v341_v24 = vunpack.c.l.bf16 %v343_v20  ;;  %s398_s13 = scalar_lea.vmem %s397_s21, 32 }
  0x1a   : > { %v338_v25 = vunpack.c.h.bf16 %v336_v19  ;;  %v342_v27 = vunpack.c.h.bf16 %v343_v20  ;;  %p400_p1 = scmp.lt.s32.totalorder %s398_s13, %s392_s16 }
  0x1b   : > { %v211_v10 = vadd.f32 %v210_v5, %v209_v8 }
  0x1c   : > { %180 = vperm.xlu0 %384, %v170_v3   ;;  %190 = vperm.xlu1 %385, %v172_v7   ;;  %p401_p2 = por %p400_p1, %p399_p0 }
  0x1d   : > { %v213_v11 = vadd.f32 %v212_v9, %v211_v10 }
  0x1e   : > { %p402_p3 = pnand %p401_p2, %p395_p13 }
  0x1f   : > { %v214_v12 = vrot.slane %v213_v11, 4 }
  0x21   : > { %v215_v13 = vadd.f32 %v214_v12, %v213_v11 }
  0x23   : > { %v216_v14 = vrot.slane %v215_v13, 2 }
  0x25   : > { %v217_v15 = vadd.f32 %v216_v14, %v215_v13 }
  0x27   : > { %v218_v16 = vrot.slane %v217_v15, 1 }
  0x29   : > { %v219_v17 = vadd.f32 %v218_v16, %v217_v15 }
  0x2b   : > { %v220_v18 = vmax.f32 %v219_v17, 1e-09 }
  0x2d   : > { %223 = vperm.xlu0 %384, %v220_v18  }
  0x93   : > { %v176_v22 = vpop.permute.xlu0 %175  ;;  %v186_v23 = vpop.permute.xlu1 %185 }
  0x94   : > { %v193_v26 = vmul.f32 %v337_v21, %v176_v22  ;;  %v195_v30 = vmul.f32 %v341_v24, %v186_v23 }
  0x97   : > { %v181_v28 = vpop.permute.xlu0 %180  ;;  %v191_v29 = vpop.permute.xlu1 %190 }
  0x98   : > { %v194_v31 = vmul.f32 %v338_v25, %v181_v28  ;;  %v196_v33 = vmul.f32 %v342_v27, %v191_v29 }
  0x9a   : > { %v197_v32 = vadd.f32 %v194_v31, %v193_v26 }
  0x9c   : > { %v198_v34 = vadd.f32 %v197_v32, %v195_v30 }
  0x9e   : > { %v199_v35 = vadd.f32 %v198_v34, %v196_v33 }
  0xa0   : > { %v200_v36 = vrot.slane %v199_v35, 4 }
  0xa2   : > { %v201_v37 = vadd.f32 %v200_v36, %v199_v35 }
  0xa4   : > { %v202_v39 = vrot.slane %v201_v37, 2 }
  0xa6   : > { %v203_v40 = vadd.f32 %v202_v39, %v201_v37 }
  0xa8   : > { %v224_v38 = vpop.permute.xlu0 %223  ;;  %v204_v41 = vrot.slane %v203_v40, 1 }
  0xa9   : > { %386 = vrcp.f32 %v224_v38 }
  0xaa   : > { %v205_v42 = vadd.f32 %v204_v41, %v203_v40 }
  0xb6   : > { %v387_v43 = vpop.eup %386 }
  0xb7   : > { %v227_v44 = vmul.f32 %v387_v43, %v205_v42 }
  0xb9   : > { %v228_v45 = vmul.f32 %v227_v44, %v227_v44 }
  0xbb   : > { %229 = vadd.xlane.f32.xlu1 %v228_v45 }
 0x144   : > { %v230_v46 = vpop.xlane.xlu1 %229 }
 0x145   : > { %388 = vrsqrt.f32 %v230_v46  ;;  %vm233_vm1 = vcmp.eq.f32.partialorder %v230_v46, inf  ;;  %v236_v49 = vand.u32 2147483648, %v230_v46  ;;  %vm235_vm2 = vcmp.eq.f32.partialorder %v230_v46, 0.0 }
 0x152   : > { %v389_v47 = vpop.eup %388 }
 0x153   : > { %v232_v48 = vmul.f32 %v389_v47, %v230_v46 }
 0x155   : > { %v234_v50 = vsel %vm233_vm1, %v230_v46, %v232_v48 }
 0x156   : > { %v237_v51 = vsel %vm235_vm2, %v236_v49, %v234_v50 }
 0x157   : > { %v238_v52 = vmax.f32 %v237_v51, 1e-12 }
 0x159   : > { %390 = vrcp.f32 %v238_v52 }
 0x166   : > { %v391_v53 = vpop.eup %390 }
 0x167   : > { %v240_v54 = vmul.f32 %v391_v53, %v227_v44 }
 0x169   : > { %241 = vst [vmem:[%s150_s4] sm:$0x1] %v240_v54 }
 0x16a   : > { %405 = shalt.err (!%p402_p3)
}
 0x16b   : > { %s406_s22 = scalar_lea.hbm %s253_s8, 16  ;;  %s410_s25 = scalar_lea.hbm %s567_s2, 32 }
 0x16c   : > { %p407_p4 = scmp.ne.s32.totalorder %s253_s8, %s406_s22  ;;  %p411_p9 = scmp.lt.s32.totalorder %s253_s8, %s567_s2 }
 0x16d   : > { %p412_p10 = scmp.lt.s32.totalorder %s410_s25, %s406_s22 }
 0x16e   : > { %p408_p7 = pnand %p407_p4, %p509_p5 }
 0x16f   : > { %p413_p11 = por %p412_p10, %p411_p9 }
 0x170   : > { %p409_p8 = pneg %p408_p7 }
 0x172   : > { %p414_p12 = pnand %p413_p11, %p409_p8 }
 0x174   : > { %417 = shalt.err (!%p414_p12)
}
 0x175   : > { %344 = dma.vmem_to_hbm [thread:$0]  (%p509_p5), %s256_s5, 16, %s253_s8, %s243_s14  }
 0x176 PF: > { %p350_p13 = scmp.ge.s32.totalorder %s452_s12, 2  ;;  %s267_s28 = sand.u32 1, %s440_s9  }
 0x177   : > { %s268_s29 = scalar_lea.sflag [#allocation3], %s267_s28 }
 0x178   : > { %p347_p0 = pnand %p350_p13, %p513_p6 }
 0x17a   : > { %p348_p1 = pneg %p347_p0 }
 0x17c   : > { %435 = dma.done.wait (%p348_p1), %s268_s29, 16  }
 0x17d   : > { %437 = vsyncadd (%p348_p1), %s268_s29, 4294967280  ;;  %p12_p2 = scmp.ge.s32.totalorder %s496_s15, 4   ;;  %s570_s9 = smov %s444_s10 }
 0x17e   : > { %s571_s10 = smov %s448_s11  ;;  %s572_s11 = smov %s507_s18 }
 0x17f   : > { %s573_s12 = smov %s496_s15  ;;  %14 = sbr.rel (!%p12_p2) target bundleno = 3 (0x3), region = 66 }
 0x184   :  { %272 = vsyncpa [#allocation3], 1 }
 0x185   :  { %274 = vsyncpa [#allocation3 + $0x1], 1 }

// kernel: barlow_twins_forward.4
= control target key start
LH: loop header
LB: loop body
LE: loop exit
PB: predicated region body
PF: predicated region fallthrough
CT: control target
= control target key end

     0   :  { %s435_s15 = smov 0   ;;  %s474_s0 = inlined_call_operand.vmem [shape: f32[2,32,128], index: 0, kind: input, shape index: {}]   ;;  %s475_s1 = inlined_call_operand.vmem [shape: f32[1,32,128], index: 1, kind: input, shape index: {}]   ;;  %s476_s2 = inlined_call_operand.vmem [shape: f32[1,128], index: 2, kind: input, shape index: {}]   ;;  %s477_s3 = inlined_call_operand.vmem [shape: f32[1,128], index: 3, kind: input, shape index: {}]   ;;  %s478_s4 = inlined_call_operand.vmem [shape: bf16[2,32,128], index: 4, kind: output, shape index: {}]  }
   0x1 LB: > { %s352_s16 = sadd.s32 4294967295, %s408_s15   ;;  %p356_p0 = scmp.ge.s32.totalorder %s408_s15, 1  ;;  %s408_s15 = sphi %s435_s15, %s14_s15  }
   0x2   : > { %p162_p1 = scmp.lt.s32.totalorder %s408_s15, 3 }
   0x4   : > { %p163_p2 = pnand %p356_p0, %p162_p1 }
   0x5   : > { %p188_p3 = scmp.lt.s32.totalorder (!%p163_p2), %s352_s16, 1 }
   0x6   : > { %166 = sbr.rel (%p163_p2) target bundleno = 334 (0x14e), region = 36 }
   0xb   : > { %s480_s16 = smov (!%p188_p3, %s352_s16), 1  ;;  %v202_v0 = vld [vmem:[%s475_s1] sm:$0xff]  ;;  %v204_v1 = vld [vmem:[%s475_s1 + $0x10] sm:$0xff]  ;;  %v203_v2 = vld [vmem:[%s475_s1 + $0x8] sm:$0xff] }
   0xc   : > { %s369_s17 = sshll.u32 %s480_s16, 5  ;;  %v205_v3 = vld [vmem:[%s475_s1 + $0x18] sm:$0xff]  ;;  %v361_v42 = vld [vmem:[%s476_s2] ss:$0 sm:$0xff]  ;;  %s370_s7 = sshll.u32 %s480_s16, 4 }
   0xd   : > { %s192_s24 = scalar_lea.vmem %s474_s0, %s369_s17  ;;  %v362_v47 = vld [vmem:[%s477_s3] ss:$0 sm:$0xff]  ;;  %s197_s10 = scalar_lea.vmem %s478_s4, %s370_s7 }
   0xe   : > { %v198_v4 = vld [vmem:[%s192_s24] sm:$0xff]  ;;  %v200_v5 = vld [vmem:[%s192_s24 + $0x10] sm:$0xff]  ;;  %v199_v6 = vld [vmem:[%s192_s24 + $0x8] sm:$0xff] }
   0xf   : > { %v206_v7 = vadd.f32 %v202_v0, %v198_v4  ;;  %v208_v8 = vadd.f32 %v204_v1, %v200_v5  ;;  %v201_v9 = vld [vmem:[%s192_s24 + $0x18] sm:$0xff]  ;;  %v207_v10 = vadd.f32 %v203_v2, %v199_v6 }
  0x10   : > { %v209_v11 = vadd.f32 %v205_v3, %v201_v9 }
  0x11   : > { %212 = vadd.xlane.f32.xlu0 %v206_v7  ;;  %216 = vadd.xlane.f32.xlu1 %v208_v8 }
  0x15   : > { %214 = vadd.xlane.f32.xlu0 %v207_v10  ;;  %218 = vadd.xlane.f32.xlu1 %v209_v11 }
  0x9a   : > { %v213_v12 = vpop.xlane.xlu0 %212  ;;  %v217_v13 = vpop.xlane.xlu1 %216 }
  0x9b   : > { %v221_v14 = vmul.f32 0.0078125, %v213_v12  ;;  %v223_v15 = vmul.f32 0.0078125, %v217_v13 }
  0x9d   : > { %v225_v16 = vsub.f32 %v206_v7, %v221_v14  ;;  %v227_v17 = vsub.f32 %v208_v8, %v223_v15 }
  0x9e   : > { %v215_v18 = vpop.xlane.xlu0 %214  ;;  %v219_v19 = vpop.xlane.xlu1 %218 }
  0x9f   : > { %v222_v20 = vmul.f32 0.0078125, %v215_v18  ;;  %v229_v21 = vmul.f32 %v225_v16, %v225_v16  ;;  %v224_v22 = vmul.f32 0.0078125, %v219_v19  ;;  %v231_v25 = vmul.f32 %v227_v17, %v227_v17 }
  0xa1   : > { %v226_v23 = vsub.f32 %v207_v10, %v222_v20  ;;  %233 = vadd.xlane.f32.xlu0 %v229_v21  ;;  %v228_v24 = vsub.f32 %v209_v11, %v224_v22 }
  0xa3   : > { %v230_v26 = vmul.f32 %v226_v23, %v226_v23  ;;  %v232_v27 = vmul.f32 %v228_v24, %v228_v24 }
  0xa5   : > { %237 = vadd.xlane.f32.xlu0 %v231_v25  ;;  %235 = vadd.xlane.f32.xlu1 %v230_v26 }
  0xa9   : > { %239 = vadd.xlane.f32.xlu1 %v232_v27 }
 0x12a   : > { %v234_v28 = vpop.xlane.xlu0 %233 }
 0x12b   : > { %v241_v29 = vmul.f32 0.0078125, %v234_v28 }
 0x12d   : > { %v245_v30 = vadd.f32 1e-05, %v241_v29 }
 0x12e   : > { %v236_v31 = vpop.xlane.xlu1 %235  ;;  %v238_v32 = vpop.xlane.xlu0 %237 }
 0x12f   : > { %394 = vrsqrt.f32 %v245_v30  ;;  %v242_v33 = vmul.f32 0.0078125, %v236_v31  ;;  %v243_v34 = vmul.f32 0.0078125, %v238_v32 }
 0x131   : > { %v246_v35 = vadd.f32 1e-05, %v242_v33  ;;  %v247_v36 = vadd.f32 1e-05, %v243_v34 }
 0x132   : > { %v240_v37 = vpop.xlane.xlu1 %239 }
 0x133   : > { %396 = vrsqrt.f32 %v246_v35  ;;  %v244_v38 = vmul.f32 0.0078125, %v240_v37 }
 0x134   : > { %398 = vrsqrt.f32 %v247_v36 }
 0x135   : > { %v248_v39 = vadd.f32 1e-05, %v244_v38 }
 0x137   : > { %400 = vrsqrt.f32 %v248_v39 }
 0x13c   : > { %v395_v40 = vpop.eup %394 }
 0x13d   : > { %v253_v41 = vmul.f32 %v395_v40, %v225_v16 }
 0x13f   : > { %v263_v45 = vmul.f32 %v361_v42, %v253_v41 }
 0x140   : > { %v397_v43 = vpop.eup %396 }
 0x141   : > { %v399_v44 = vpop.eup %398  ;;  %v254_v46 = vmul.f32 %v397_v43, %v226_v23  ;;  %v273_v51 = vadd.f32 %v362_v47, %v263_v45 }
 0x142   : > { %v255_v48 = vmul.f32 %v399_v44, %v227_v17 }
 0x143   : > { %v264_v49 = vmul.f32 %v361_v42, %v254_v46 }
 0x144   : > { %v401_v50 = vpop.eup %400  ;;  %v265_v53 = vmul.f32 %v361_v42, %v255_v48 }
 0x145   : > { %v274_v52 = vadd.f32 %v362_v47, %v264_v49  ;;  %v256_v54 = vmul.f32 %v401_v50, %v228_v24 }
 0x146   : > { %v275_v57 = vadd.f32 %v362_v47, %v265_v53 }
 0x147   : > { %v378_v55 = vpack.c.bf16 %v274_v52, %v273_v51  ;;  %v266_v56 = vmul.f32 %v361_v42, %v256_v54 }
 0x149   : > { %379 = vst [vmem:[%s197_s10] sm:$0xff] %v378_v55   ;;  %v276_v58 = vadd.f32 %v362_v47, %v266_v56 }
 0x14b   : > { %v383_v59 = vpack.c.bf16 %v276_v58, %v275_v57 }
 0x14d   : > { %385 = vst [vmem:[%s197_s10 + $0x8] sm:$0xff] %v383_v59  }
 0x14e PF: > { %s14_s15 = sadd.s32 1, %s408_s15  }
 0x14f   : > { %p11_p4 = scmp.ge.s32.totalorder %s14_s15, 4  }
 0x151   :  { %13 = sbr.rel (!%p11_p4) target bundleno = 1 (0x1), region = 66 }

// kernel: barlow_twins_forward.5
= control target key start
LH: loop header
LB: loop body
LE: loop exit
PB: predicated region body
PF: predicated region fallthrough
CT: control target
= control target key end

     0   :  { %s2560_s29 = smov 0   ;;  %s2562_s30 = smov 0   ;;  %s2940_s0 = inlined_call_operand.vmem [shape: bf16[2,32,128], index: 0, kind: input, shape index: {}]   ;;  %s2941_s1 = inlined_call_operand.vmem [shape: f32[2,1,32], index: 1, kind: input, shape index: {}]   ;;  %s2942_s2 = inlined_call_operand.vmem [shape: bf16[128,384], index: 2, kind: input, shape index: {}]   ;;  %s2943_s3 = inlined_call_operand.vmem [shape: f32[1,384], index: 3, kind: input, shape index: {}]   ;;  %s2944_s4 = inlined_call_operand.vmem [shape: bf16[128,128], index: 4, kind: input, shape index: {}]   ;;  %s2945_s5 = inlined_call_operand.vmem [shape: f32[1,128], index: 5, kind: input, shape index: {}]   ;;  %s2946_s6 = inlined_call_operand.vmem [shape: f32[1,128], index: 6, kind: input, shape index: {}]   ;;  %s2947_s7 = inlined_call_operand.vmem [shape: f32[1,128], index: 7, kind: input, shape index: {}]   ;;  %s2948_s8 = inlined_call_operand.vmem [shape: bf16[128,256], index: 8, kind: input, shape index: {}]   ;;  %s2949_s9 = inlined_call_operand.vmem [shape: f32[1,256], index: 9, kind: input, shape index: {}]   ;;  %s2950_s10 = inlined_call_operand.vmem [shape: bf16[256,128], index: 10, kind: input, shape index: {}]   ;;  %s2951_s11 = inlined_call_operand.vmem [shape: f32[1,128], index: 11, kind: input, shape index: {}]   ;;  %s2952_s12 = inlined_call_operand.vmem [shape: f32[1,128], index: 12, kind: input, shape index: {}]   ;;  %s2953_s13 = inlined_call_operand.vmem [shape: f32[1,128], index: 13, kind: input, shape index: {}]   ;;  %s2954_s14 = inlined_call_operand.vmem [shape: bf16[2,32,128], index: 14, kind: output, shape index: {}]  }
   0x1   :  { %2958 = sst [smem:[#allocation10_spill]] %s2952_s12  ;;  %s2564_s15 = smov 0  }
   0x2   :  { %2959 = sst [smem:[#allocation11_spill]] %s2953_s13  ;;  %s2566_s16 = smov 0  }
   0x3   :  { %s2568_s17 = smov 0  }
   0x4 LB: > { %2960 = sst [smem:[#allocation5_spill]] %s2469_s15  ;;  %s33_s18 = sadd.s32 1, %s2469_s15  ;;  %s2477_s17 = sphi %s2568_s17, %s24_s17   ;;  %s2473_s16 = sphi %s2566_s16, %s2971_s16   ;;  %s2469_s15 = sphi %s2564_s15, %s2970_s15   ;;  %s2465_s30 = sphi %s2562_s30, %s2969_s30   ;;  %s2461_s29 = sphi %s2560_s29, %s2968_s29  }
   0x5   : > { %2961 = sst [smem:[#allocation6_spill]] %s2473_s16  ;;  %s36_s19 = sadd.s32 1, %s2473_s16 }
   0x6   : > { %2962 = sst [smem:[#allocation7_spill]] %s2477_s17  ;;  %p34_p0 = scmp.ge.s32.totalorder %s33_s18, 2 }
   0x7   : > { %p1954_p1 = scmp.ge.s32.totalorder %s2477_s17, 1  ;;  %p434_p2 = scmp.lt.s32.totalorder %s2477_s17, 5 }
   0x8   : > { %s2973_s18 = smov (%p34_p0, %s33_s18), 0  ;;  %s2975_s19 = smov (!%p34_p0, %s36_s19), %s2473_s16 }
   0x9   : > { %2963 = sst [smem:[#allocation8_spill]] %s2973_s18  ;;  %p435_p3 = pnand %p1954_p1, %p434_p2 }
   0xa   : > { %p38_p4 = scmp.ge.s32.totalorder %s2975_s19, 2  ;;  %p487_p5 = scmp.lt.s32.totalorder (!%p435_p3), %s2465_s30, 1 }
   0xb   : > { %438 = sbr.rel (%p435_p3) target bundleno = 2833 (0xb11), region = 76  ;;  %s1957_s20 = sshll.u32 (!%p435_p3), %s2461_s29, 1 }
   0xc   : > { %s2977_s19 = smov (%p38_p4, %s2975_s19), 0  ;;  %p498_p6 = scmp.lt.s32.totalorder (!%p435_p3), %s1957_s20, 3 }
   0xd   : > { %2964 = sst [smem:[#allocation9_spill]] %s2977_s19  ;;  %p1960_p7 = scmp.ne.s32.totalorder (!%p435_p3), %s2461_s29, 0 }
  0x10   : > { %s2979_s30 = smov (!%p487_p5, %s2465_s30), 1  ;;  %s2981_s20 = smov (!%p498_p6, %s1957_s20), 3 }
  0x11   : > { %s2075_s21 = sshll.u32 %s2979_s30, 4  ;;  %s494_s24 = scalar_lea.vmem %s2941_s1, %s2979_s30 }
  0x12   : > { %s2603_s27 = scalar_lea.vmem %s2940_s0, %s2075_s21  ;;  %s1958_s28 = sshll.u32 %s2979_s30, 2 }
  0x13   : > { %s501_s19 = sadd.s32 %s1958_s28, %s2981_s20  ;;  %509 = sbr.rel (%p1960_p7) target bundleno = 385 (0x181), region = 80 }
  0x14   : > { %s1959_s18 = sshll.u32 %s501_s19, 2  ;;  %s2480_s12 = smov (!%p1960_p7), 64  }
  0x15   : > { %s2609_s17 = scalar_lea.vmem %s2954_s14, %s1959_s18 }
  0x18   : > { %v2309_v0 = vld [vmem:[%s2942_s2 + $0xb0] ss:$12 sps:$4 sm:$0xff]   ;;  %v2311_v1 = vld [vmem:[%s2942_s2 + $0xac] ss:$12 sps:$4 sm:$0xff]   ;;  %v2479_v2 = vmov 0   ;;  %v2333_v17 = vld [vmem:[%s2603_s27] sm:$0xff]   ;;  %v532_v19 = vlaneseq }
  0x19   : > { %666 = vmatprep.mubr.bf16.mxu0 %v2479_v2  ;;  %676 = vmatprep.mubr.bf16.mxu1 %v2479_v2  ;;  %v2312_v3 = vld [vmem:[%s2942_s2 + $0x98] ss:$12 sps:$4 sm:$0xff]   ;;  %v2314_v4 = vld [vmem:[%s2942_s2 + $0x94] ss:$12 sps:$4 sm:$0xff]   ;;  %v2317_v6 = vld [vmem:[%s2942_s2 + $0x7c] ss:$12 sps:$4 sm:$0xff]  }
  0x1a   : > { %634 = vmatprep.subr.bf16.mxu0 %v2309_v0  ;;  %2227 = vmatprep.subr.bf16.mxu1 %v2309_v0  ;;  %v2315_v5 = vld [vmem:[%s2942_s2 + $0x80] ss:$12 sps:$4 sm:$0xff]   ;;  %v2318_v7 = vld [vmem:[%s2942_s2 + $0x68] ss:$12 sps:$4 sm:$0xff]   ;;  %v2320_v8 = vld [vmem:[%s2942_s2 + $0x64] ss:$12 sps:$4 sm:$0xff]  }
  0x1b   : > { %635 = vmatpush1.bf16.msra.mxu0 %v2311_v1  ;;  %2235 = vmatpush1.bf16.msra.mxu1 %v2311_v1  ;;  %v2321_v9 = vld [vmem:[%s2942_s2 + $0x50] ss:$12 sps:$4 sm:$0xff]   ;;  %v2323_v10 = vld [vmem:[%s2942_s2 + $0x4c] ss:$12 sps:$4 sm:$0xff]   ;;  %v2326_v12 = vld [vmem:[%s2942_s2 + $0x34] ss:$12 sps:$4 sm:$0xff]  }
  0x1c   : > { %636 = vmatprep.subr.bf16.mxu0 %v2312_v3  ;;  %2228 = vmatprep.subr.bf16.mxu1 %v2312_v3  ;;  %v2324_v11 = vld [vmem:[%s2942_s2 + $0x38] ss:$12 sps:$4 sm:$0xff]   ;;  %v2327_v13 = vld [vmem:[%s2942_s2 + $0x20] ss:$12 sps:$4 sm:$0xff]   ;;  %v2329_v14 = vld [vmem:[%s2942_s2 + $0x1c] ss:$12 sps:$4 sm:$0xff]  }
  0x1d   : > { %v2330_v15 = vld [vmem:[%s2942_s2 + $0x8] ss:$12 sps:$4 sm:$0xff]   ;;  %v2332_v16 = vld [vmem:[%s2942_s2 + $0x4] ss:$12 sps:$4 sm:$0xff]   ;;  %v533_v20 = vshrl.u32 %v532_v19, 7  ;;  %vm735_vm0 = vcmask 519168  }
  0x1e   : > { %v2334_v18 = vld [vmem:[%s2603_s27 + $0x8] sm:$0xff]   ;;  %v530_v22 = vld [vmem:[%s2943_s3 + $0x1] sm:$0x3] }
  0x1f   : > { %637 = vmatpush1.bf16.msra.mxu0 %v2314_v4  ;;  %2236 = vmatpush1.bf16.msra.mxu1 %v2314_v4  ;;  %v534_v21 = vsub.s32 0, %v533_v20  ;;  %v538_v23 = vsub.s32 1, %v533_v20 }
  0x20   : > { %638 = vmatprep.subr.bf16.mxu0 %v2315_v5  ;;  %2229 = vmatprep.subr.bf16.mxu1 %v2315_v5 }
  0x21   : > { %v535_v24 = vrot.slane %v530_v22, %v534_v21  ;;  %v539_v25 = vrot.slane %v530_v22, %v538_v23 }
  0x23   : > { %639 = vmatpush1.bf16.msra.mxu0 %v2317_v6  ;;  %2237 = vmatpush1.bf16.msra.mxu1 %v2317_v6 }
  0x24   : > { %640 = vmatprep.subr.bf16.mxu0 %v2318_v7  ;;  %2230 = vmatprep.subr.bf16.mxu1 %v2318_v7 }
  0x27   : > { %641 = vmatpush1.bf16.msra.mxu0 %v2320_v8  ;;  %2238 = vmatpush1.bf16.msra.mxu1 %v2320_v8 }
  0x28   : > { %642 = vmatprep.subr.bf16.mxu0 %v2321_v9  ;;  %2231 = vmatprep.subr.bf16.mxu1 %v2321_v9 }
  0x2b   : > { %643 = vmatpush1.bf16.msra.mxu0 %v2323_v10  ;;  %2239 = vmatpush1.bf16.msra.mxu1 %v2323_v10 }
  0x2c   : > { %644 = vmatprep.subr.bf16.mxu0 %v2324_v11  ;;  %2232 = vmatprep.subr.bf16.mxu1 %v2324_v11 }
  0x2f   : > { %645 = vmatpush1.bf16.msra.mxu0 %v2326_v12  ;;  %2240 = vmatpush1.bf16.msra.mxu1 %v2326_v12 }
  0x30   : > { %646 = vmatprep.subr.bf16.mxu0 %v2327_v13  ;;  %2233 = vmatprep.subr.bf16.mxu1 %v2327_v13 }
  0x33   : > { %647 = vmatpush1.bf16.msra.mxu0 %v2329_v14  ;;  %2241 = vmatpush1.bf16.msra.mxu1 %v2329_v14 }
  0x34   : > { %648 = vmatprep.subr.bf16.mxu0 %v2330_v15  ;;  %2234 = vmatprep.subr.bf16.mxu1 %v2330_v15 }
  0x37   : > { %649 = vmatpush1.bf16.msra.mxu0 %v2332_v16  ;;  %2242 = vmatpush1.bf16.msra.mxu1 %v2332_v16 }
  0x3a   : > { %667 = vmatmul.mubr.bf16.vlgmr.msra.gmra.mxu0 %v2333_v17  ;;  %677 = vmatmul.mubr.bf16.vlgmr.msra.gmra.mxu1 %v2334_v18 }
  0xfa   : > { %v668_v26 = vpop.f32.mrf.mxu0  ;;  %v678_v27 = vpop.f32.mrf.mxu1 }
  0xfb   : > { %v669_v28 = vadd.f32 %v668_v26, %v535_v24  ;;  %v679_v29 = vadd.f32 %v678_v27, %v535_v24 }
  0xfc   : > { %v670_v30 = vpop.f32.mrf.mxu0  ;;  %v680_v31 = vpop.f32.mrf.mxu1 }
  0xfd   : > { %v2076_v32 = vpack.c.bf16 %v669_v28, %v669_v28  ;;  %v2078_v33 = vpack.c.bf16 %v679_v29, %v679_v29  ;;  %v671_v34 = vadd.f32 %v670_v30, %v539_v25  ;;  %v681_v35 = vadd.f32 %v680_v31, %v539_v25 }
  0xfe   : > { %v672_v36 = vpop.f32.mrf.mxu0  ;;  %v682_v37 = vpop.f32.mrf.mxu1 }
  0xff   : > { %736 = vst.msk [vmem:[#allocation2] sm:$0xf] %vm735_vm0, %v2076_v32  ;;  %738 = vst.msk [vmem:[#allocation2 + $0x8] sm:$0xf] %vm735_vm0, %v2078_v33  ;;  %v2084_v38 = vpack.c.bf16 %v671_v34, %v671_v34  ;;  %v2086_v39 = vpack.c.bf16 %v681_v35, %v681_v35  ;;  %v673_v40 = vadd.f32 %v672_v36, %v535_v24 }
 0x100   : > { %v683_v41 = vadd.f32 %v682_v37, %v535_v24  ;;  %v674_v42 = vpop.f32.mrf.mxu0  ;;  %v684_v43 = vpop.f32.mrf.mxu1 }
 0x101   : > { %792 = vst.msk [vmem:[#allocation3] sm:$0xf] %vm735_vm0, %v2084_v38  ;;  %794 = vst.msk [vmem:[#allocation3 + $0x8] sm:$0xf] %vm735_vm0, %v2086_v39  ;;  %v2077_v44 = vpack.c.bf16 %v673_v40, %v673_v40  ;;  %v675_v46 = vadd.f32 %v674_v42, %v539_v25  ;;  %v685_v47 = vadd.f32 %v684_v43, %v539_v25 }
 0x102   : > { %v2079_v45 = vpack.c.bf16 %v683_v41, %v683_v41  ;;  %v2289_v48 = vpack.i.bf16 %v673_v40, %v669_v28  ;;  %v2294_v52 = vpack.i.bf16 %v683_v41, %v679_v29 }
 0x103   : > { %737 = vst.msk [vmem:[#allocation2 + $0x4] sm:$0xf] %vm735_vm0, %v2077_v44  ;;  %v2085_v49 = vpack.c.bf16 %v675_v46, %v675_v46  ;;  %v2299_v50 = vpack.i.bf16 %v675_v46, %v671_v34  ;;  %v2087_v51 = vpack.c.bf16 %v685_v47, %v685_v47  ;;  %v2304_v53 = vpack.i.bf16 %v685_v47, %v681_v35 }
 0x104   : > { %739 = vst.msk [vmem:[#allocation2 + $0xc] sm:$0xf] %vm735_vm0, %v2079_v45  ;;  %2290 = vrot.lane.b32.xlu0 %v2289_v48, %s2480_s12 }
 0x105   : > { %793 = vst.msk [vmem:[#allocation3 + $0x4] sm:$0xf] %vm735_vm0, %v2085_v49  ;;  %2300 = vrot.lane.b32.xlu1 %v2299_v50, %s2480_s12  ;;  %795 = vst.msk [vmem:[#allocation3 + $0xc] sm:$0xf] %vm735_vm0, %v2087_v51 }
 0x108   : > { %2295 = vrot.lane.b32.xlu0 %v2294_v52, %s2480_s12 }
 0x109   : > { %2305 = vrot.lane.b32.xlu1 %v2304_v53, %s2480_s12 }
 0x176   : > { %v2291_v54 = vpop.permute.xlu0 %2290 }
 0x177   : > { %v2293_v55 = vunpack.i.h.bf16 %v2291_v54  ;;  %v2292_v56 = vunpack.i.l.bf16 %v2291_v54  ;;  %v2301_v57 = vpop.permute.xlu1 %2300 }
 0x178   : > { %v2303_v58 = vunpack.i.h.bf16 %v2301_v57  ;;  %v2302_v59 = vunpack.i.l.bf16 %v2301_v57 }
 0x179   : > { %v2081_v60 = vpack.c.bf16 %v2293_v55, %v2293_v55  ;;  %v2080_v61 = vpack.c.bf16 %v2292_v56, %v2292_v56 }
 0x17a   : > { %v2089_v62 = vpack.c.bf16 %v2303_v58, %v2303_v58  ;;  %v2088_v63 = vpack.c.bf16 %v2302_v59, %v2302_v59  ;;  %v2296_v0 = vpop.permute.xlu0 %2295 }
 0x17b   : > { %741 = vst.msk [vmem:[#allocation2 + $0x14] sm:$0xf] %vm735_vm0, %v2081_v60  ;;  %740 = vst.msk [vmem:[#allocation2 + $0x10] sm:$0xf] %vm735_vm0, %v2080_v61  ;;  %v2298_v1 = vunpack.i.h.bf16 %v2296_v0  ;;  %v2297_v2 = vunpack.i.l.bf16 %v2296_v0  ;;  %v2306_v3 = vpop.permute.xlu1 %2305 }
 0x17c   : > { %797 = vst.msk [vmem:[#allocation3 + $0x14] sm:$0xf] %vm735_vm0, %v2089_v62  ;;  %796 = vst.msk [vmem:[#allocation3 + $0x10] sm:$0xf] %vm735_vm0, %v2088_v63  ;;  %v2308_v4 = vunpack.i.h.bf16 %v2306_v3  ;;  %v2307_v5 = vunpack.i.l.bf16 %v2306_v3 }
 0x17d   : > { %v2083_v6 = vpack.c.bf16 %v2298_v1, %v2298_v1  ;;  %v2082_v7 = vpack.c.bf16 %v2297_v2, %v2297_v2 }
 0x17e   : > { %v2091_v8 = vpack.c.bf16 %v2308_v4, %v2308_v4  ;;  %v2090_v9 = vpack.c.bf16 %v2307_v5, %v2307_v5 }
 0x17f   : > { %743 = vst.msk [vmem:[#allocation2 + $0x1c] sm:$0xf] %vm735_vm0, %v2083_v6  ;;  %742 = vst.msk [vmem:[#allocation2 + $0x18] sm:$0xf] %vm735_vm0, %v2082_v7 }
 0x180   : > { %799 = vst.msk [vmem:[#allocation3 + $0x1c] sm:$0xf] %vm735_vm0, %v2091_v8  ;;  %798 = vst.msk [vmem:[#allocation3 + $0x18] sm:$0xf] %vm735_vm0, %v2090_v9 }
 0x181 PF: > { %v2481_v10 = vmov 0.0   ;;  %v2340_v11 = vld [vmem:[%s2942_s2 + $0xa8] ss:$12 sps:$4 sm:$0xff]   ;;  %vm2482_vm1 = vmmov 0   ;;  %v2341_v12 = vld [vmem:[%s2942_s2 + $0x90] ss:$12 sps:$4 sm:$0xff]  }
 0x182   : > { %2155 = vmatprep.subr.bf16.mxu0 %v2481_v10  ;;  %2171 = vmatprep.mubr.msk.bf16.mxu0 %vm2482_vm1, %v2481_v10  ;;  %v2342_v13 = vld [vmem:[%s2942_s2 + $0x78] ss:$12 sps:$4 sm:$0xff]   ;;  %s1995_s22 = sshll.u32 %s2461_s29, 4  ;;  %v2349_v14 = vld [vmem:[#allocation2 + $0x8] sm:$0xff]   ;;  %vm961_vm2 = vcmask 523264   ;;  %s2483_s23 = smov 64  }
 0x183   : > { %2175 = vmatprep.subr.bf16.mxu1 %v2481_v10  ;;  %2179 = vmatprep.mubr.msk.bf16.mxu1 %vm2482_vm1, %v2481_v10  ;;  %v2343_v15 = vld [vmem:[%s2942_s2 + $0x60] ss:$12 sps:$4 sm:$0xff]   ;;  %s801_s15 = sshra.s32 %s1995_s22, 3  ;;  %v969_v16 = vsel %vm961_vm2, %v2349_v14, 0  ;;  %v2344_v17 = vld [vmem:[%s2942_s2 + $0x48] ss:$12 sps:$4 sm:$0xff]  }
 0x184   : > { %2156 = vmatpush3.bf16.msra.mxu0 %v2340_v11  ;;  %2176 = vmatpush3.bf16.xpose.msra.mxu1 %v969_v16  ;;  %s1996_s16 = sshll.u32 %s801_s15, 2  ;;  %v2345_v18 = vld [vmem:[%s2942_s2 + $0x30] ss:$12 sps:$4 sm:$0xff]   ;;  %v2346_v19 = vld [vmem:[%s2942_s2 + $0x18] ss:$12 sps:$4 sm:$0xff]   ;;  %vm1087_vm3 = vcmask 261120  }
 0x185   : > { %2157 = vmatprep.subr.bf16.mxu0 %v2481_v10  ;;  %2177 = vmatprep.subr.bf16.mxu1 %v2481_v10  ;;  %s804_s25 = scalar_lea.vmem %s2603_s27, %s1996_s16  ;;  %v2347_v20 = vld [vmem:[%s2942_s2] ss:$12 sps:$4 sm:$0xff]   ;;  %v2352_v35 = vld [vmem:[#allocation2 + $0x10] sm:$0xff]   ;;  %vm1254_vm4 = vcmask 519168   ;;  %vm1269_vm5 = vcmask 1043968   ;;  %s2965_s20 = sld [smem:[#allocation10_spill]] }
 0x186   : > { %v2721_v21 = vld [vmem:[%s804_s25] sm:$0xff]   ;;  %v2351_v27 = vld [vmem:[#allocation2 + $0x18] sm:$0xff]   ;;  %v1026_v36 = vsel %vm961_vm2, %v2352_v35, 0  ;;  %v2353_v8 = vld [vmem:[#allocation3 + $0x8] sm:$0xff]   ;;  %s2966_s26 = sld [smem:[#allocation11_spill]] }
 0x187   : > { %v2350_v22 = vld [vmem:[#allocation2] sm:$0xff]   ;;  %v1029_v34 = vsel %vm961_vm2, %v2351_v27, 0 }
 0x188   : > { %2158 = vmatpush3.bf16.msra.mxu0 %v2341_v12  ;;  %v966_v23 = vsel %vm961_vm2, %v2350_v22, 0  ;;  %v1997_v25 = vld [vmem:[%s2943_s3] ss:$0 sm:$0xff] }
 0x189   : > { %2159 = vmatprep.subr.bf16.mxu0 %v2481_v10  ;;  %v2013_v42 = vld [vmem:[%s494_s24] ss:$0 sm:$0xff] }
 0x18a   : > { %v2354_v9 = vld [vmem:[#allocation3] sm:$0xff]  }
 0x18c   : > { %2160 = vmatpush3.bf16.msra.mxu0 %v2342_v13  ;;  %2178 = vmatpush3.bf16.xpose.msra.mxu1 %v966_v23 }
 0x18d   : > { %2161 = vmatprep.subr.bf16.mxu0 %v2481_v10  ;;  %2183 = vmatprep.subr.bf16.mxu1 %v2481_v10 }
 0x190   : > { %2162 = vmatpush3.bf16.msra.mxu0 %v2343_v15 }
 0x191   : > { %2163 = vmatprep.subr.bf16.mxu0 %v2481_v10 }
 0x194   : > { %2164 = vmatpush3.bf16.msra.mxu0 %v2344_v17 }
 0x195   : > { %2165 = vmatprep.subr.bf16.mxu0 %v2481_v10 }
 0x198   : > { %2166 = vmatpush3.bf16.msra.mxu0 %v2345_v18 }
 0x199   : > { %2167 = vmatprep.subr.bf16.mxu0 %v2481_v10 }
 0x19c   : > { %2168 = vmatpush3.bf16.msra.mxu0 %v2346_v19 }
 0x19d   : > { %2169 = vmatprep.subr.bf16.mxu0 %v2481_v10 }
 0x1a0   : > { %2170 = vmatpush3.bf16.msra.mxu0 %v2347_v20 }
 0x1a1   : > { %2207 = vmatprep.subr.bf16.mxu0 %v2481_v10 }
 0x1a3   : > { %2172 = vmatmul.mubr.bf16.vlgmr.msra.gmra.mxu0 %v2721_v21 }
 0x1a4   : > { %2223 = vmatprep.mubr.msk.bf16.mxu0 %vm2482_vm1, %v2481_v10 }
 0x263   : > { %v918_v24 = vpop.f32.mrf.mxu0 }
 0x264   : > { %v919_v29 = vadd.f32 %v1997_v25, %v918_v24 }
 0x265   : > { %v2173_v26 = vpop.f32.mrf.mxu0 }
 0x267   : > { %v921_v28 = vpop.f32.mrf.mxu0 }
 0x268   : > { %v922_v30 = vadd.f32 %v1997_v25, %v921_v28  ;;  %v2355_v28 = vld [vmem:[#allocation3 + $0x18] sm:$0xff]  }
 0x269   : > { %v2174_v31 = vpop.f32.mrf.mxu0 }
 0x26a   : > { %v933_v32 = vpack.c.bf16 %v922_v30, %v919_v29  ;;  %v2335_v33 = vpack.i.bf16 %v922_v30, %v919_v29  ;;  %v2356_v30 = vld [vmem:[#allocation3 + $0x10] sm:$0xff]  }
 0x26c   : > { %2336 = vrot.lane.b32.xlu0 %v2335_v33, %s2483_s23  ;;  %2180 = vmatmul.mubr.msk.bf16.vlgmr.msra.gmra.mxu1 %vm961_vm2, %v933_v32 }
 0x26d   : > { %2184 = vmatpush3.bf16.xpose.msra.mxu1 %v1029_v34  ;;  %2187 = vmatprep.mubr.msk.bf16.mxu1 %vm2482_vm1, %v2481_v10 }
 0x26e   : > { %2185 = vmatprep.subr.bf16.mxu1 %v2481_v10 }
 0x275   : > { %2186 = vmatpush3.bf16.xpose.msra.mxu1 %v1026_v36 }
 0x276   : > { %2191 = vmatprep.subr.bf16.mxu1 %v2481_v10 }
 0x2de   : > { %v2337_v37 = vpop.permute.xlu0 %2336 }
 0x2df   : > { %v2339_v38 = vunpack.i.h.bf16 %v2337_v37  ;;  %v2338_v39 = vunpack.i.l.bf16 %v2337_v37 }
 0x2e1   : > { %v934_v40 = vpack.c.bf16 %v2339_v38, %v2338_v39  ;;  %v2357_v38 = vld [vmem:[%s2944_s4 + $0x38] sm:$0xff]  }
 0x2e2   : > { %2208 = vmatpush3.bf16.msra.mxu0 %v2357_v38 }
 0x2e3   : > { %2188 = vmatmul.mubr.msk.bf16.vlgmr.msra.gmra.mxu1 %vm961_vm2, %v934_v40  ;;  %v2358_v40 = vld [vmem:[%s2944_s4 + $0x30] sm:$0xff]   ;;  %2209 = vmatprep.subr.bf16.mxu0 %v2481_v10 }
 0x2e4   : > { %2195 = vmatprep.mubr.msk.bf16.mxu1 %vm2482_vm1, %v2481_v10  ;;  %2192 = vmatpush3.bf16.msra.mxu1 %v2353_v8  ;;  %v2368_v8 = vld [vmem:[%s2948_s8 + $0x74] ss:$8 sps:$4 sm:$0xff]  }
 0x2e5   : > { %2193 = vmatprep.subr.bf16.mxu1 %v2481_v10 }
 0x2e6   : > { %2210 = vmatpush3.bf16.msra.mxu0 %v2358_v40 }
 0x2e7   : > { %2211 = vmatprep.subr.bf16.mxu0 %v2481_v10 }
 0x2e8   : > { %2194 = vmatpush3.bf16.msra.mxu1 %v2354_v9 }
 0x2e9   : > { %2199 = vmatprep.subr.bf16.mxu1 %v2481_v10 }
 0x32c   : > { %v1005_v41 = vpop.f32.mrf.mxu1 }
 0x32d   : > { %v1072_v43 = vmul.f32 0.125, %v1005_v41 }
 0x32e   : > { %v2181_v44 = vpop.f32.mrf.mxu1 }
 0x32f   : > { %v1083_v45 = vadd.f32 %v2013_v42, %v1072_v43  ;;  %v2359_v44 = vld [vmem:[%s2944_s4 + $0x28] sm:$0xff]  }
 0x330   : > { %v1008_v46 = vpop.f32.mrf.mxu1  ;;  %2212 = vmatpush3.bf16.msra.mxu0 %v2359_v44 }
 0x331   : > { %v1073_v47 = vmul.f32 0.125, %v1008_v46  ;;  %v1088_v48 = vsel %vm1087_vm3, %v1083_v45, -inf  ;;  %2213 = vmatprep.subr.bf16.mxu0 %v2481_v10 }
 0x332   : > { %1089 = vmax.xlane.f32.xlu0 %v1088_v48  ;;  %v2182_v49 = vpop.f32.mrf.mxu1  ;;  %v2361_v48 = vld [vmem:[%s2944_s4 + $0x18] sm:$0xff]  }
 0x333   : > { %v1084_v50 = vadd.f32 %v2013_v42, %v1073_v47  ;;  %v2360_v47 = vld [vmem:[%s2944_s4 + $0x20] sm:$0xff]   ;;  %v2362_v49 = vld [vmem:[%s2944_s4 + $0x10] sm:$0xff]  }
 0x334   : > { %2214 = vmatpush3.bf16.msra.mxu0 %v2360_v47 }
 0x335   : > { %v1091_v51 = vsel %vm1087_vm3, %v1084_v50, -inf  ;;  %2215 = vmatprep.subr.bf16.mxu0 %v2481_v10 }
 0x336   : > { %1092 = vmax.xlane.f32.xlu1 %v1091_v51  ;;  %v2364_v51 = vld [vmem:[%s2944_s4] sm:$0xff]  }
 0x338   : > { %2216 = vmatpush3.bf16.msra.mxu0 %v2361_v48 }
 0x339   : > { %2217 = vmatprep.subr.bf16.mxu0 %v2481_v10 }
 0x33c   : > { %2218 = vmatpush3.bf16.msra.mxu0 %v2362_v49 }
 0x33d   : > { %2219 = vmatprep.subr.bf16.mxu0 %v2481_v10 }
 0x3a3   : > { %v1065_v52 = vpop.f32.mrf.mxu1 }
 0x3a4   : > { %v1074_v53 = vmul.f32 0.125, %v1065_v52 }
 0x3a5   : > { %v2189_v54 = vpop.f32.mrf.mxu1 }
 0x3a6   : > { %v1085_v55 = vadd.f32 %v2013_v42, %v1074_v53 }
 0x3a7   : > { %v1068_v56 = vpop.f32.mrf.mxu1 }
 0x3a8   : > { %v1075_v57 = vmul.f32 0.125, %v1068_v56  ;;  %v1094_v58 = vsel %vm1087_vm3, %v1085_v55, -inf }
 0x3a9   : > { %1095 = vmax.xlane.f32.xlu1 %v1094_v58  ;;  %v2190_v59 = vpop.f32.mrf.mxu1 }
 0x3aa   : > { %v1086_v60 = vadd.f32 %v2013_v42, %v1075_v57 }
 0x3ac   : > { %v1097_v61 = vsel %vm1087_vm3, %v1086_v60, -inf }
 0x3ad   : > { %1098 = vmax.xlane.f32.xlu1 %v1097_v61  ;;  %v1392_v61 = vunpack.c.l.bf16 %v2721_v21 }
 0x3bb   : > { %v1090_v62 = vpop.xlane.xlu0 %1089 }
 0x3bc   : > { %v1100_v63 = vsub.f32 %v1083_v45, %v1090_v62 }
 0x3be   : > { %v1104_v0 = vmul.f32 1.442695, %v1100_v63 }
 0x3bf   : > { %v1093_v1 = vpop.xlane.xlu1 %1092 }
 0x3c0   : > { %2407 = vpow2.f32 %v1104_v0  ;;  %v1101_v2 = vsub.f32 %v1084_v50, %v1093_v1  ;;  %v2363_v50 = vld [vmem:[%s2944_s4 + $0x8] sm:$0xff]  }
 0x3c1   : > { %2220 = vmatpush3.bf16.msra.mxu0 %v2363_v50  ;;  %v2390_v50 = vld [vmem:[%s2950_s10 + $0x78] sm:$0xff]  }
 0x3c2   : > { %v1106_v3 = vmul.f32 1.442695, %v1101_v2  ;;  %2221 = vmatprep.subr.bf16.mxu0 %v2481_v10  ;;  %v1393_v2 = vunpack.c.h.bf16 %v2721_v21 }
 0x3c4   : > { %2409 = vpow2.f32 %v1106_v3 }
 0x3c5   : > { %2222 = vmatpush3.bf16.msra.mxu0 %v2364_v51  ;;  %v2391_v51 = vld [vmem:[%s2950_s10 + $0x38] sm:$0xff]  }
 0x3c6   : > { %2133 = vmatprep.subr.bf16.mxu0 %v2390_v50 }
 0x3cd   : > { %v2408_v4 = vpop.eup %2407 }
 0x3ce   : > { %v1112_v5 = vsel %vm1087_vm3, %v2408_v4, 0.0 }
 0x3cf   : > { %1113 = vadd.xlane.f32.xlu1 %v1112_v5 }
 0x3d1   : > { %v2410_v6 = vpop.eup %2409 }
 0x3d2   : > { %v1115_v7 = vsel %vm1087_vm3, %v2410_v6, 0.0 }
 0x3d3   : > { %1116 = vadd.xlane.f32.xlu1 %v1115_v7  ;;  %v2366_v7 = vld [vmem:[%s2948_s8 + $0x70] ss:$8 sps:$4 sm:$0xff]  }
 0x432   : > { %v1096_v11 = vpop.xlane.xlu1 %1095 }
 0x433   : > { %v1102_v12 = vsub.f32 %v1085_v55, %v1096_v11 }
 0x435   : > { %v1108_v13 = vmul.f32 1.442695, %v1102_v12 }
 0x436   : > { %v1099_v14 = vpop.xlane.xlu1 %1098 }
 0x437   : > { %2411 = vpow2.f32 %v1108_v13  ;;  %v1103_v15 = vsub.f32 %v1086_v60, %v1099_v14 }
 0x439   : > { %v1110_v16 = vmul.f32 1.442695, %v1103_v15 }
 0x43b   : > { %2413 = vpow2.f32 %v1110_v16 }
 0x444   : > { %v2412_v17 = vpop.eup %2411 }
 0x445   : > { %v1118_v18 = vsel %vm1087_vm3, %v2412_v17, 0.0 }
 0x446   : > { %1119 = vadd.xlane.f32.xlu1 %v1118_v18  ;;  %v2369_v18 = vld [vmem:[%s2948_s8 + $0x60] ss:$8 sps:$4 sm:$0xff]  }
 0x448   : > { %v2414_v19 = vpop.eup %2413 }
 0x449   : > { %v1121_v20 = vsel %vm1087_vm3, %v2414_v19, 0.0 }
 0x44a   : > { %1122 = vadd.xlane.f32.xlu1 %v1121_v20  ;;  %v2372_v20 = vld [vmem:[%s2948_s8 + $0x50] ss:$8 sps:$4 sm:$0xff]  }
 0x458   : > { %v1114_v22 = vpop.xlane.xlu1 %1113 }
 0x459   : > { %2415 = vrcp.f32 %v1114_v22  ;;  %v2375_v22 = vld [vmem:[%s2948_s8 + $0x40] ss:$8 sps:$4 sm:$0xff]  }
 0x45c   : > { %v1117_v23 = vpop.xlane.xlu1 %1116 }
 0x45d   : > { %2417 = vrcp.f32 %v1117_v23  ;;  %v2377_v23 = vld [vmem:[%s2948_s8 + $0x44] ss:$8 sps:$4 sm:$0xff]  }
 0x466   : > { %v2416_v24 = vpop.eup %2415 }
 0x467   : > { %v1128_v26 = vmul.f32 %v2416_v24, %v2408_v4  ;;  %v2380_v24 = vld [vmem:[%s2948_s8 + $0x34] ss:$8 sps:$4 sm:$0xff]  }
 0x46a   : > { %v2418_v25 = vpop.eup %2417 }
 0x46b   : > { %v1129_v27 = vmul.f32 %v2418_v25, %v2410_v6  ;;  %v2378_v25 = vld [vmem:[%s2948_s8 + $0x30] ss:$8 sps:$4 sm:$0xff]  }
 0x46d   : > { %v1132_v29 = vpack.c.bf16 %v1129_v27, %v1128_v26  ;;  %v2383_v26 = vld [vmem:[%s2948_s8 + $0x24] ss:$8 sps:$4 sm:$0xff]   ;;  %v2484_v27 = vmov 0  }
 0x46f   : > { %2196 = vmatmul.mubr.msk.bf16.vlgmr.msra.gmra.mxu1 %vm1087_vm3, %v1132_v29  ;;  %v2386_v29 = vld [vmem:[%s2948_s8 + $0x14] ss:$8 sps:$4 sm:$0xff]  }
 0x470   : > { %2200 = vmatpush3.bf16.msra.mxu1 %v2355_v28  ;;  %2203 = vmatprep.mubr.msk.bf16.mxu1 %vm2482_vm1, %v2481_v10  ;;  %v2381_v28 = vld [vmem:[%s2948_s8 + $0x20] ss:$8 sps:$4 sm:$0xff]  }
 0x471   : > { %2201 = vmatprep.subr.bf16.mxu1 %v2481_v10  ;;  %v2024_v10 = vld [vmem:[%s2945_s5] ss:$0 sm:$0xff] }
 0x474   : > { %2202 = vmatpush3.bf16.msra.mxu1 %v2356_v30  ;;  %v2384_v30 = vld [vmem:[%s2948_s8 + $0x10] ss:$8 sps:$4 sm:$0xff]  }
 0x475   : > { %1546 = vmatprep.subr.bf16.mxu1 %v2368_v8 }
 0x4cf   : > { %v1120_v31 = vpop.xlane.xlu1 %1119 }
 0x4d0   : > { %2419 = vrcp.f32 %v1120_v31  ;;  %v2389_v31 = vld [vmem:[%s2948_s8 + $0x4] ss:$8 sps:$4 sm:$0xff]  }
 0x4d3   : > { %v1123_v32 = vpop.xlane.xlu1 %1122 }
 0x4d4   : > { %2421 = vrcp.f32 %v1123_v32  ;;  %v2387_v32 = vld [vmem:[%s2948_s8] ss:$8 sps:$4 sm:$0xff]  }
 0x4dd   : > { %v2420_v33 = vpop.eup %2419 }
 0x4de   : > { %v1130_v35 = vmul.f32 %v2420_v33, %v2412_v17  ;;  %v2371_v17 = vld [vmem:[%s2948_s8 + $0x64] ss:$8 sps:$4 sm:$0xff]  }
 0x4e1   : > { %v2422_v34 = vpop.eup %2421 }
 0x4e2   : > { %v1131_v36 = vmul.f32 %v2422_v34, %v2414_v19  ;;  %v2374_v19 = vld [vmem:[%s2948_s8 + $0x54] ss:$8 sps:$4 sm:$0xff]  }
 0x4e4   : > { %v1133_v37 = vpack.c.bf16 %v1131_v36, %v1130_v35 }
 0x4e6   : > { %2204 = vmatmul.mubr.msk.bf16.vlgmr.msra.gmra.mxu1 %vm1087_vm3, %v1133_v37 }
 0x4e7   : > { %1547 = vmatpush1.bf16.msra.mxu1 %v2366_v7  ;;  %1578 = vmatprep.mubr.bf16.mxu1 %v2484_v27 }
 0x4e8   : > { %1548 = vmatprep.subr.bf16.mxu1 %v2371_v17 }
 0x4eb   : > { %1549 = vmatpush1.bf16.msra.mxu1 %v2369_v18 }
 0x4ec   : > { %1550 = vmatprep.subr.bf16.mxu1 %v2374_v19 }
 0x4ef   : > { %1551 = vmatpush1.bf16.msra.mxu1 %v2372_v20 }
 0x4f0   : > { %1552 = vmatprep.subr.bf16.mxu1 %v2377_v23 }
 0x4f3   : > { %1553 = vmatpush1.bf16.msra.mxu1 %v2375_v22 }
 0x4f4   : > { %1554 = vmatprep.subr.bf16.mxu1 %v2380_v24 }
 0x4f7   : > { %1555 = vmatpush1.bf16.msra.mxu1 %v2378_v25 }
 0x4f8   : > { %1556 = vmatprep.subr.bf16.mxu1 %v2383_v26 }
 0x4fb   : > { %1557 = vmatpush1.bf16.msra.mxu1 %v2381_v28 }
 0x4fc   : > { %1558 = vmatprep.subr.bf16.mxu1 %v2386_v29 }
 0x4ff   : > { %1559 = vmatpush1.bf16.msra.mxu1 %v2384_v30 }
 0x500   : > { %1560 = vmatprep.subr.bf16.mxu1 %v2389_v31 }
 0x503   : > { %1561 = vmatpush1.bf16.msra.mxu1 %v2387_v32 }
 0x52f   : > { %v1183_v39 = vpop.f32.mrf.mxu1 }
 0x530   : > { %v2092_v41 = vpack.c.bf16 %v1183_v39, %v1183_v39 }
 0x531   : > { %v2197_v42 = vpop.f32.mrf.mxu1 }
 0x532   : > { %1255 = vst.msk [vmem:[#allocation4] sm:$0xf] %vm1254_vm4, %v2092_v41  ;;  %v2034_v41 = vld [vmem:[%s2946_s6] ss:$0 sm:$0xff] }
 0x533   : > { %v1186_v43 = vpop.f32.mrf.mxu1 }
 0x534   : > { %v2093_v45 = vpack.c.bf16 %v1186_v43, %v1186_v43 }
 0x535   : > { %v2198_v46 = vpop.f32.mrf.mxu1 }
 0x536   : > { %1256 = vst.msk [vmem:[#allocation4 + $0x4] sm:$0xf] %vm1254_vm4, %v2093_v45  ;;  %v2035_v45 = vld [vmem:[%s2947_s7] ss:$0 sm:$0xff] }
 0x5a6   : > { %v1239_v52 = vpop.f32.mrf.mxu1 }
 0x5a7   : > { %v2094_v53 = vpack.c.bf16 %v1239_v52, %v1239_v52  ;;  %v2392_v52 = vld [vmem:[%s2950_s10 + $0x70] sm:$0xff]  }
 0x5a8   : > { %v2205_v54 = vpop.f32.mrf.mxu1 }
 0x5a9   : > { %1263 = vrot.lane.b32.xlu1 %v2094_v53, %s2483_s23  ;;  %v2393_v53 = vld [vmem:[%s2950_s10 + $0x30] sm:$0xff]   ;;  %v2394_v54 = vld [vmem:[%s2950_s10 + $0x68] sm:$0xff]  }
 0x5aa   : > { %v1242_v55 = vpop.f32.mrf.mxu1 }
 0x5ab   : > { %v2095_v56 = vpack.c.bf16 %v1242_v55, %v1242_v55  ;;  %v2395_v55 = vld [vmem:[%s2950_s10 + $0x28] sm:$0xff]  }
 0x5ac   : > { %v2206_v57 = vpop.f32.mrf.mxu1 }
 0x5ad   : > { %1265 = vrot.lane.b32.xlu0 %v2095_v56, %s2483_s23  ;;  %v2396_v56 = vld [vmem:[%s2950_s10 + $0x60] sm:$0xff]  }
 0x5ae   : > { %v2397_v57 = vld [vmem:[%s2950_s10 + $0x20] sm:$0xff]  }
 0x61b   : > { %v1264_v58 = vpop.permute.xlu1 %1263 }
 0x61c   : > { %1270 = vst.msk [vmem:[#allocation4] sm:$0xf] %vm1269_vm5, %v1264_v58  ;;  %v2398_v58 = vld [vmem:[%s2950_s10 + $0x58] sm:$0xff]  }
 0x61f   : > { %v1266_v59 = vpop.permute.xlu0 %1265 }
 0x620   : > { %1271 = vst.msk [vmem:[#allocation4 + $0x4] sm:$0xf] %vm1269_vm5, %v1266_v59  ;;  %v2399_v59 = vld [vmem:[%s2950_s10 + $0x18] sm:$0xff]  }
 0x627   : > { %v2365_v60 = vld [vmem:[#allocation4] sm:$0xff]  }
 0x628   : > { %2224 = vmatmul.mubr.bf16.vlgmr.msra.gmra.mxu0 %v2365_v60  ;;  %v2400_v60 = vld [vmem:[%s2950_s10 + $0x50] sm:$0xff]  }
 0x629   : > { %2134 = vmatpush3.bf16.msra.mxu0 %v2391_v51 }
 0x62a   : > { %2135 = vmatprep.subr.bf16.mxu0 %v2392_v52 }
 0x62d   : > { %2136 = vmatpush3.bf16.msra.mxu0 %v2393_v53 }
 0x62e   : > { %2137 = vmatprep.subr.bf16.mxu0 %v2394_v54 }
 0x631   : > { %2138 = vmatpush3.bf16.msra.mxu0 %v2395_v55 }
 0x632   : > { %2139 = vmatprep.subr.bf16.mxu0 %v2396_v56 }
 0x635   : > { %2140 = vmatpush3.bf16.msra.mxu0 %v2397_v57 }
 0x636   : > { %2141 = vmatprep.subr.bf16.mxu0 %v2398_v58  ;;  %v2052_v58 = vld [vmem:[%s2951_s11] ss:$0 sm:$0xff] }
 0x639   : > { %2142 = vmatpush3.bf16.msra.mxu0 %v2399_v59 }
 0x63a   : > { %2143 = vmatprep.subr.bf16.mxu0 %v2400_v60 }
 0x6e8   : > { %v1385_v62 = vpop.f32.mrf.mxu0 }
 0x6e9   : > { %v1386_v63 = vadd.f32 %v2024_v10, %v1385_v62  ;;  %v2403_v62 = vld [vmem:[%s2950_s10 + $0x8] sm:$0xff]  }
 0x6ea   : > { %v2225_v0 = vpop.f32.mrf.mxu0 }
 0x6eb   : > { %v1394_v1 = vadd.f32 %v1392_v61, %v1386_v63  ;;  %v2402_v61 = vld [vmem:[%s2950_s10 + $0x48] sm:$0xff]   ;;  %v2404_v63 = vld [vmem:[%s2950_s10 + $0x40] sm:$0xff]  }
 0x6ec   : > { %v1388_v3 = vpop.f32.mrf.mxu0  ;;  %v2405_v0 = vld [vmem:[%s2950_s10] sm:$0xff]  }
 0x6ed   : > { %v1389_v4 = vadd.f32 %v2024_v10, %v1388_v3  ;;  %1398 = vadd.xlane.f32.xlu1 %v1394_v1  ;;  %v2401_v10 = vld [vmem:[%s2950_s10 + $0x10] sm:$0xff]  }
 0x6ee   : > { %v2226_v5 = vpop.f32.mrf.mxu0  ;;  %2144 = vmatpush3.bf16.msra.mxu0 %v2401_v10 }
 0x6ef   : > { %v1395_v6 = vadd.f32 %v1393_v2, %v1389_v4  ;;  %2145 = vmatprep.subr.bf16.mxu0 %v2402_v61  ;;  %v1454_v4 = vld [vmem:[%s2949_s9] sm:$0x3] }
 0x6f1   : > { %1400 = vadd.xlane.f32.xlu0 %v1395_v6 }
 0x6f2   : > { %2146 = vmatpush3.bf16.msra.mxu0 %v2403_v62 }
 0x6f3   : > { %2147 = vmatprep.subr.bf16.mxu0 %v2404_v63 }
 0x6f6   : > { %2148 = vmatpush3.bf16.msra.mxu0 %v2405_v0 }
 0x776   : > { %v1399_v9 = vpop.xlane.xlu1 %1398 }
 0x777   : > { %v1403_v11 = vmul.f32 0.0078125, %v1399_v9 }
 0x779   : > { %v1405_v12 = vsub.f32 %v1394_v1, %v1403_v11  ;;  %v1456_v1 = vlaneseq }
 0x77a   : > { %v1401_v21 = vpop.xlane.xlu0 %1400 }
 0x77b   : > { %v1404_v13 = vmul.f32 0.0078125, %v1401_v21  ;;  %v1407_v14 = vmul.f32 %v1405_v12, %v1405_v12  ;;  %v1457_v2 = vshrl.u32 %v1456_v1, 7 }
 0x77d   : > { %v1406_v15 = vsub.f32 %v1395_v6, %v1404_v13  ;;  %1409 = vadd.xlane.f32.xlu1 %v1407_v14  ;;  %v1458_v3 = vsub.s32 0, %v1457_v2  ;;  %v1462_v5 = vsub.s32 1, %v1457_v2 }
 0x77f   : > { %v1408_v16 = vmul.f32 %v1406_v15, %v1406_v15  ;;  %v1459_v6 = vrot.slane %v1454_v4, %v1458_v3  ;;  %v1463_v7 = vrot.slane %v1454_v4, %v1462_v5 }
 0x781   : > { %1411 = vadd.xlane.f32.xlu1 %v1408_v16 }
 0x806   : > { %v1410_v33 = vpop.xlane.xlu1 %1409 }
 0x807   : > { %v1413_v34 = vmul.f32 0.0078125, %v1410_v33 }
 0x809   : > { %v1415_v35 = vadd.f32 1e-05, %v1413_v34 }
 0x80a   : > { %v1412_v36 = vpop.xlane.xlu1 %1411 }
 0x80b   : > { %2423 = vrsqrt.f32 %v1415_v35  ;;  %v1414_v37 = vmul.f32 0.0078125, %v1412_v36 }
 0x80d   : > { %v1416_v38 = vadd.f32 1e-05, %v1414_v37 }
 0x80f   : > { %2425 = vrsqrt.f32 %v1416_v38 }
 0x818   : > { %v2424_v39 = vpop.eup %2423 }
 0x819   : > { %v1419_v40 = vmul.f32 %v2424_v39, %v1405_v12 }
 0x81b   : > { %v1427_v44 = vmul.f32 %v2034_v41, %v1419_v40 }
 0x81c   : > { %v2426_v42 = vpop.eup %2425 }
 0x81d   : > { %v1420_v43 = vmul.f32 %v2426_v42, %v1406_v15  ;;  %v2856_v47 = vadd.f32 %v2035_v45, %v1427_v44 }
 0x81f   : > { %v1428_v46 = vmul.f32 %v2034_v41, %v1420_v43 }
 0x821   : > { %v2858_v48 = vadd.f32 %v2035_v45, %v1428_v46 }
 0x823   : > { %v1437_v49 = vpack.c.bf16 %v2858_v48, %v2856_v47 }
 0x825   : > { %1579 = vmatmul.mubr.bf16.vlgmr.msra.gmra.mxu1 %v1437_v49 }
 0x8e5   : > { %v1580_v8 = vpop.f32.mrf.mxu1 }
 0x8e6   : > { %v1581_v9 = vadd.f32 %v1580_v8, %v1459_v6 }
 0x8e7   : > { %v1582_v11 = vpop.f32.mrf.mxu1 }
 0x8e8   : > { %v1589_v12 = vmul.f32 %v1581_v9, %v1581_v9  ;;  %v1583_v21 = vadd.f32 %v1582_v11, %v1463_v7 }
 0x8e9   : > { %v1584_v13 = vpop.f32.mrf.mxu1 }
 0x8ea   : > { %v1593_v14 = vmul.f32 %v1589_v12, %v1581_v9  ;;  %v1590_v15 = vmul.f32 %v1583_v21, %v1583_v21  ;;  %v1585_v16 = vadd.f32 %v1584_v13, %v1459_v6 }
 0x8eb   : > { %v1586_v17 = vpop.f32.mrf.mxu1 }
 0x8ec   : > { %v1597_v18 = vmul.f32 0.044715, %v1593_v14  ;;  %v1594_v19 = vmul.f32 %v1590_v15, %v1583_v21  ;;  %v1591_v20 = vmul.f32 %v1585_v16, %v1585_v16  ;;  %v1587_v22 = vadd.f32 %v1586_v17, %v1463_v7  ;;  %v2069_v17 = vld [vmem:[%s2965_s20] ss:$0 sm:$0xff] }
 0x8ee   : > { %v1601_v23 = vadd.f32 %v1597_v18, %v1581_v9  ;;  %v1598_v24 = vmul.f32 0.044715, %v1594_v19  ;;  %v1595_v25 = vmul.f32 %v1591_v20, %v1585_v16  ;;  %v1592_v26 = vmul.f32 %v1587_v22, %v1587_v22 }
 0x8f0   : > { %v1605_v27 = vmul.f32 0.7978846, %v1601_v23  ;;  %v1602_v28 = vadd.f32 %v1598_v24, %v1583_v21  ;;  %v1599_v29 = vmul.f32 0.044715, %v1595_v25  ;;  %v1596_v30 = vmul.f32 %v1592_v26, %v1587_v22 }
 0x8f2   : > { %v1606_v31 = vmul.f32 0.7978846, %v1602_v28  ;;  %v1603_v32 = vadd.f32 %v1599_v29, %v1585_v16  ;;  %v1600_v33 = vmul.f32 0.044715, %v1596_v30  ;;  %2427 = vtanh.f32 %v1605_v27 }
 0x8f4   : > { %2429 = vtanh.f32 %v1606_v31  ;;  %v1607_v34 = vmul.f32 0.7978846, %v1603_v32  ;;  %v1604_v35 = vadd.f32 %v1600_v33, %v1587_v22 }
 0x8f6   : > { %2431 = vtanh.f32 %v1607_v34  ;;  %v1608_v36 = vmul.f32 0.7978846, %v1604_v35 }
 0x8f8   : > { %2433 = vtanh.f32 %v1608_v36 }
 0x8ff   : > { %v2428_v37 = vpop.eup %2427 }
 0x900   : > { %v1613_v41 = vadd.f32 1.0, %v2428_v37 }
 0x901   : > { %v2430_v38 = vpop.eup %2429 }
 0x902   : > { %v1614_v39 = vadd.f32 1.0, %v2430_v38  ;;  %v1617_v49 = vmul.f32 0.5, %v1613_v41 }
 0x903   : > { %v2432_v40 = vpop.eup %2431 }
 0x904   : > { %v1615_v42 = vadd.f32 1.0, %v2432_v40  ;;  %v1618_v46 = vmul.f32 0.5, %v1614_v39  ;;  %v1621_v54 = vmul.f32 %v1617_v49, %v1581_v9 }
 0x905   : > { %v2434_v43 = vpop.eup %2433 }
 0x906   : > { %v1619_v44 = vmul.f32 0.5, %v1615_v42  ;;  %v1616_v45 = vadd.f32 1.0, %v2434_v43  ;;  %v1622_v52 = vmul.f32 %v1618_v46, %v1583_v21 }
 0x908   : > { %v1620_v50 = vmul.f32 0.5, %v1616_v45  ;;  %v1623_v51 = vmul.f32 %v1619_v44, %v1585_v16 }
 0x90a   : > { %v1624_v53 = vmul.f32 %v1620_v50, %v1587_v22  ;;  %v1625_v56 = vpack.c.bf16 %v1623_v51, %v1621_v54  ;;  %v2070_v22 = vld [vmem:[%s2966_s26] ss:$0 sm:$0xff] }
 0x90c   : > { %v1626_v55 = vpack.c.bf16 %v1624_v53, %v1622_v52 }
 0x90e   : > { %1794 = vmatprep.mubr.bf16.mxu0 %v1626_v55 }
 0x90f   : > { %1795 = vmatmul.mubr.bf16.vlgmr.msra.gmra.mxu0 %v1625_v56 }
 0x9cf   : > { %v2149_v57 = vpop.f32.mrf.mxu0 }
 0x9d1   : > { %v2150_v59 = vpop.f32.mrf.mxu0 }
 0x9d2   : > { %v2151_v60 = vadd.f32 %v2150_v59, %v2149_v57 }
 0x9d3   : > { %v2152_v10 = vpop.f32.mrf.mxu0 }
 0x9d4   : > { %v1797_v61 = vadd.f32 %v2151_v60, %v2052_v58 }
 0x9d5   : > { %v2153_v62 = vpop.f32.mrf.mxu0 }
 0x9d6   : > { %v2154_v63 = vadd.f32 %v2153_v62, %v2152_v10  ;;  %v1803_v0 = vadd.f32 %v1797_v61, %v2856_v47 }
 0x9d8   : > { %v1800_v1 = vadd.f32 %v2154_v63, %v2052_v58  ;;  %1807 = vadd.xlane.f32.xlu0 %v1803_v0 }
 0x9da   : > { %v1804_v2 = vadd.f32 %v1800_v1, %v2858_v48 }
 0x9dc   : > { %1809 = vadd.xlane.f32.xlu1 %v1804_v2 }
 0xa61   : > { %v1808_v3 = vpop.xlane.xlu0 %1807 }
 0xa62   : > { %v1811_v4 = vmul.f32 0.0078125, %v1808_v3 }
 0xa64   : > { %v1813_v5 = vsub.f32 %v1803_v0, %v1811_v4 }
 0xa65   : > { %v1810_v6 = vpop.xlane.xlu1 %1809 }
 0xa66   : > { %v1812_v7 = vmul.f32 0.0078125, %v1810_v6  ;;  %v1815_v8 = vmul.f32 %v1813_v5, %v1813_v5 }
 0xa68   : > { %v1814_v9 = vsub.f32 %v1804_v2, %v1812_v7  ;;  %1817 = vadd.xlane.f32.xlu0 %v1815_v8 }
 0xa6a   : > { %v1816_v11 = vmul.f32 %v1814_v9, %v1814_v9 }
 0xa6c   : > { %1819 = vadd.xlane.f32.xlu1 %v1816_v11 }
 0xaf1   : > { %v1818_v12 = vpop.xlane.xlu0 %1817 }
 0xaf2   : > { %v1821_v21 = vmul.f32 0.0078125, %v1818_v12 }
 0xaf4   : > { %v1823_v13 = vadd.f32 1e-05, %v1821_v21 }
 0xaf5   : > { %v1820_v14 = vpop.xlane.xlu1 %1819 }
 0xaf6   : > { %2435 = vrsqrt.f32 %v1823_v13  ;;  %v1822_v47 = vmul.f32 0.0078125, %v1820_v14 }
 0xaf8   : > { %v1824_v15 = vadd.f32 1e-05, %v1822_v47 }
 0xafa   : > { %2437 = vrsqrt.f32 %v1824_v15 }
 0xb03   : > { %v2436_v48 = vpop.eup %2435 }
 0xb04   : > { %v1827_v16 = vmul.f32 %v2436_v48, %v1813_v5 }
 0xb06   : > { %v1835_v19 = vmul.f32 %v2069_v17, %v1827_v16 }
 0xb07   : > { %v2438_v18 = vpop.eup %2437 }
 0xb08   : > { %v1828_v20 = vmul.f32 %v2438_v18, %v1814_v9  ;;  %v1843_v24 = vadd.f32 %v2070_v22, %v1835_v19 }
 0xb0a   : > { %v1836_v23 = vmul.f32 %v2069_v17, %v1828_v20 }
 0xb0c   : > { %v1844_v25 = vadd.f32 %v2070_v22, %v1836_v23 }
 0xb0e   : > { %v2101_v26 = vpack.c.bf16 %v1844_v25, %v1843_v24 }
 0xb10   : > { %2102 = vst [vmem:[%s2609_s17] sm:$0xff] %v2101_v26  }
 0xb11 PF: > { %s2967_s28 = sld [smem:[#allocation7_spill]] }
 0xb12   : > { %s2968_s29 = sld [smem:[#allocation5_spill]] }
 0xb13   : > { %s2969_s30 = sld [smem:[#allocation6_spill]] }
 0xb14   : > { %s2970_s15 = sld [smem:[#allocation8_spill]] }
 0xb15   : > { %s2971_s16 = sld [smem:[#allocation9_spill]] }
 0xb17   : > { %s24_s17 = sadd.s32 1, %s2967_s28  }
 0xb18   : > { %p21_p8 = scmp.ge.s32.totalorder %s24_s17, 6  }
 0xb1a   :  { %23 = sbr.rel (!%p21_p8) target bundleno = 4 (0x4), region = 114 }

</bundles_post_ra>
